<compile_context>
chip_gen: v5e
topology: v5e:2x2
jax: 0.10.0
libtpu: 0.0.40
codegen_flags: <defaults>
</compile_context>

<pallas_src>
import jax
import jax.numpy as jnp
from jax.experimental import pallas as pl
from jax.experimental.pallas import tpu as pltpu


def _round_up(v, m):
    return ((v + m - 1) // m) * m


# ---------------------------------------------------------------------------
# Fused Pallas kernel: grid over layers, node state + cached one-hots in VMEM
# ---------------------------------------------------------------------------
def _graphnet_fused_kernel(x0_ref, ea_ref, src_ref, dst_ref, invdeg_ref,
                           batch_ref, invcnt_ref, w2_ref, wroot_ref, bias_ref,
                           out_ref, x_ref, gat_ref, sct_ref):
    l = pl.program_id(0)
    n_pad, ch = x_ref.shape
    e_pad = gat_ref.shape[0]
    f_dim = ea_ref.shape[1]
    g_pad = out_ref.shape[0]

    # ---- one-time init: node state + cached bf16 one-hot gather/scatter ----
    @pl.when(l == 0)
    def _():
        x_ref[...] = x0_ref[...]
        # gather[e, n] = (src[e] == n); padded edges use sentinel -> zero row
        iota_n = jax.lax.broadcasted_iota(jnp.int32, (e_pad, n_pad), 1)
        gat_ref[...] = jnp.where(iota_n == src_ref[...], 1.0, 0.0
                                 ).astype(jnp.bfloat16)
        # scatter[n, e] = (dst[e] == n) * 1/deg(dst[e])   ('mean' aggregation,
        # 1/deg folded in; 0 for padded edges)
        iota_d = jax.lax.broadcasted_iota(jnp.int32, (n_pad, e_pad), 0)
        sct_ref[...] = jnp.where(iota_d == dst_ref[...], invdeg_ref[...], 0.0
                                 ).astype(jnp.bfloat16)

    x = x_ref[...]                          # [N_pad, CH] f32 node state
    x_b = x.astype(jnp.bfloat16)
    ea = ea_ref[...]                        # [E_pad, F]  f32

    # ---- gather source-node features (bf16 MXU, f32 accumulate) ------------
    x_src = jnp.dot(gat_ref[...], x_b, preferred_element_type=jnp.float32)

    # ---- edge-conditioned message: single deep-K matmul ---------------------
    #   m[e,o] = sum_f (ea[e,f] * x_src[e,:]) @ W2[f] + x_src @ Bmat
    #          = concat_f(ea_f * x_src, x_src) @ W2aug
    parts = [(ea[:, f:f + 1] * x_src).astype(jnp.bfloat16) for f in range(f_dim)]
    parts.append(x_src.astype(jnp.bfloat16))          # Bmat block (constant "1")
    xe = jnp.concatenate(parts, axis=-1)               # [E_pad, (F+1)*CH] bf16
    m = jnp.dot(xe, w2_ref[...], preferred_element_type=jnp.float32)

    # ---- scatter-mean to destination nodes ---------------------------------
    aggr = jnp.dot(sct_ref[...], m.astype(jnp.bfloat16),
                   preferred_element_type=jnp.float32)            # [N_pad, CH]

    # ---- root transform + bias ----------------------------------------------
    root = jnp.dot(x_b, wroot_ref[...], preferred_element_type=jnp.float32)
    x_new = root + aggr + bias_ref[...]
    x_ref[...] = x_new      # conv_activation = identity, Dropout(0.0) = identity

    # ---- final layer: global_mean_pool built in-registers from batch ids ----
    @pl.when(l == pl.num_programs(0) - 1)
    def _():
        iota_g = jax.lax.broadcasted_iota(jnp.int32, (g_pad, n_pad), 0)
        pool = jnp.where(iota_g == batch_ref[...], invcnt_ref[...], 0.0
                         ).astype(jnp.bfloat16)       # 1/count folded in
        out_ref[...] = jnp.dot(pool, x_new.astype(jnp.bfloat16),
                               preferred_element_type=jnp.float32)


def _graphnet_forward(x_p, ea_p, src_p, dst_p, invdeg_p, batch_p, invcnt_p,
                      w2, wroot, bias, num_layers, g_pad):
    n_pad, ch = x_p.shape
    e_pad, f_dim = ea_p.shape
    k2 = (f_dim + 1) * ch
    return pl.pallas_call(
        _graphnet_fused_kernel,
        out_shape=jax.ShapeDtypeStruct((g_pad, ch), jnp.float32),
        grid_spec=pltpu.PrefetchScalarGridSpec(
            num_scalar_prefetch=0,
            grid=(num_layers,),
            in_specs=[
                pl.BlockSpec((n_pad, ch), lambda l: (0, 0)),          # x0
                pl.BlockSpec((e_pad, f_dim), lambda l: (0, 0)),       # edge_attr
                pl.BlockSpec((e_pad, 1), lambda l: (0, 0)),           # src idx
                pl.BlockSpec((1, e_pad), lambda l: (0, 0)),           # dst idx
                pl.BlockSpec((1, e_pad), lambda l: (0, 0)),           # 1/deg per edge
                pl.BlockSpec((1, n_pad), lambda l: (0, 0)),           # batch ids
                pl.BlockSpec((1, n_pad), lambda l: (0, 0)),           # 1/count per node
                pl.BlockSpec((None, k2, ch), lambda l: (l, 0, 0)),    # W2aug (bf16)
                pl.BlockSpec((None, ch, ch), lambda l: (l, 0, 0)),    # Wroot (bf16)
                pl.BlockSpec((None, 1, ch), lambda l: (l, 0, 0)),     # bias  (f32)
            ],
            out_specs=pl.BlockSpec((g_pad, ch), lambda l: (0, 0)),
            scratch_shapes=[
                pltpu.VMEM((n_pad, ch), jnp.float32),      # node state
                pltpu.VMEM((e_pad, n_pad), jnp.bfloat16),  # cached gather one-hot
                pltpu.VMEM((n_pad, e_pad), jnp.bfloat16),  # cached scatter*invdeg
            ],
        ),
        compiler_params=pltpu.CompilerParams(
            dimension_semantics=("arbitrary",),   # layers sequentially dependent
            vmem_limit_bytes=48 * 1024 * 1024,    # <=56MiB for v7x, ample on v5e/v6e
        ),
    )(x_p, ea_p, src_p, dst_p, invdeg_p, batch_p, invcnt_p, w2, wroot, bias)


# ---------------------------------------------------------------------------
# Model wrapper
# ---------------------------------------------------------------------------
class GraphNetPallas:
    """Pallas re-implementation of communitynet.GraphNet (NNConv stack + mean pool)."""

    def __init__(self, in_channels, out_channels, num_edge_features,
                 hidden_channels=(), key=None):
        if key is None:
            key = jax.random.PRNGKey(0)
        all_ch = [in_channels] + list(hidden_channels) + [out_channels]
        self.out_channels = out_channels
        self.num_edge_features = num_edge_features
        self.ch_pad = _round_up(max(all_ch), 128)    # lane-dense channel padding
        self.params = []
        for i in range(len(all_ch) - 1):
            cin, cout = all_ch[i], all_ch[i + 1]
            key, k1, k2, k3, k4 = jax.random.split(key, 5)
            w_nn = 0.1 * jax.random.normal(k1, (num_edge_features, cin * cout), jnp.float32)
            b_nn = 0.01 * jax.random.normal(k2, (cin * cout,), jnp.float32)
            w_root = 0.1 * jax.random.normal(k3, (cin, cout), jnp.float32)
            bias = 0.01 * jax.random.normal(k4, (cout,), jnp.float32)
            self.params.append((w_nn, b_nn, w_root, bias))
        self.num_layers = len(self.params)
        self.packed = self._pack_params()

    def _pack_params(self):
        """Pack per-layer weights: W2aug = [W2[0];..;W2[F-1]; Bmat] in bf16."""
        ch, f_dim, nl = self.ch_pad, self.num_edge_features, self.num_layers
        k2 = (f_dim + 1) * ch
        w2 = jnp.zeros((nl, k2, ch), jnp.float32)
        wr = jnp.zeros((nl, ch, ch), jnp.float32)
        bs = jnp.zeros((nl, 1, ch), jnp.float32)
        for l, (w_nn, b_nn, w_root, bias) in enumerate(self.params):
            cin, cout = w_root.shape
            wn = w_nn.reshape(f_dim, cin, cout)
            for f in range(f_dim):
                w2 = w2.at[l, f * ch:f * ch + cin, :cout].set(wn[f])
            w2 = w2.at[l, f_dim * ch:f_dim * ch + cin, :cout].set(b_nn.reshape(cin, cout))
            wr = wr.at[l, :cin, :cout].set(w_root)
            bs = bs.at[l, 0, :cout].set(bias)
        return w2.astype(jnp.bfloat16), wr.astype(jnp.bfloat16), bs

    def __call__(self, x, edge_index, edge_attr, batch, num_graphs):
        n, in_ch = x.shape
        e = edge_index.shape[1]
        f_dim = edge_attr.shape[1]
        ch = self.ch_pad
        # lane / MXU-contraction dims padded to 128; graph rows to 8 sublanes
        n_pad = _round_up(max(n, 128), 128)
        e_pad = _round_up(max(e, 128), 128)
        g_pad = _round_up(max(num_graphs, 8), 8)

        src = edge_index[0].astype(jnp.int32)
        dst = edge_index[1].astype(jnp.int32)

        # zero-pad nodes/edges/channels; sentinel index matches no iota row.
        x_p = jnp.zeros((n_pad, ch), jnp.float32).at[:n, :in_ch].set(x)
        ea_p = jnp.zeros((e_pad, f_dim), jnp.float32).at[:e, :].set(edge_attr)
        src_p = jnp.full((e_pad, 1), n_pad, jnp.int32).at[:e, 0].set(src)
        dst_p = jnp.full((1, e_pad), n_pad, jnp.int32).at[0, :e].set(dst)

        # mean aggregation: per-edge 1/deg(dst), 0 for padded edges
        deg = jnp.zeros((n,), jnp.float32).at[dst].add(1.0)
        inv_deg_edge = (1.0 / jnp.maximum(deg, 1.0))[dst]
        invdeg_p = jnp.zeros((1, e_pad), jnp.float32).at[0, :e].set(inv_deg_edge)

        # global_mean_pool: batch ids + per-node 1/count (0 on padded nodes)
        batch = batch.astype(jnp.int32)
        cnt = jnp.zeros((num_graphs,), jnp.float32).at[batch].add(1.0)
        inv_cnt_node = (1.0 / jnp.maximum(cnt, 1.0))[batch]
        batch_p = jnp.full((1, n_pad), g_pad, jnp.int32).at[0, :n].set(batch)
        invcnt_p = jnp.zeros((1, n_pad), jnp.float32).at[0, :n].set(inv_cnt_node)

        w2, wr, bs = self.packed
        pooled = _graphnet_forward(x_p, ea_p, src_p, dst_p, invdeg_p,
                                   batch_p, invcnt_p, w2, wr, bs,
                                   self.num_layers, g_pad)
        return pooled[:num_graphs, :self.out_channels].reshape(-1)


# ---------------------------------------------------------------------------
# Pure-JAX reference (for correctness check)
# ---------------------------------------------------------------------------
def reference_forward(params, x, edge_index, edge_attr, batch, num_graphs):
    src, dst = edge_index[0], edge_index[1]
    n = x.shape[0]
    for (w_nn, b_nn, w_root, bias) in params:
        cin, cout = w_root.shape
        we = (edge_attr @ w_nn + b_nn).reshape(-1, cin, cout)
        m = jnp.einsum('ec,eco->eo', x[src], we)
        summ = jnp.zeros((n, cout), jnp.float32).at[dst].add(m)
        deg = jnp.zeros((n,), jnp.float32).at[dst].add(1.0)
        aggr = summ / jnp.maximum(deg, 1.0)[:, None]
        x = x @ w_root + aggr + bias
    pooled = jnp.zeros((num_graphs, x.shape[1]), jnp.float32).at[batch].add(x)
    cnt = jnp.zeros((num_graphs,), jnp.float32).at[batch].add(1.0)
    return (pooled / cnt[:, None]).reshape(-1)


# ---------------------------------------------------------------------------
# Demo
# ---------------------------------------------------------------------------
if __name__ == "__main__":
    N, F, G = 16, 8, 2                 # nodes, edge-feature dim, graphs in batch
    in_ch, hidden, out_ch = 8, [16], 8
    nodes_per_graph = N // G

    # deterministic ring + skip edges within each graph
    src_list, dst_list = [], []
    for g in range(G):
        base = g * nodes_per_graph
        for i in range(nodes_per_graph):
            src_list.append(base + i); dst_list.append(base + (i + 1) % nodes_per_graph)
            src_list.append(base + i); dst_list.append(base + (i + 3) % nodes_per_graph)
    edge_index = jnp.array([src_list, dst_list], dtype=jnp.int32)
    E = edge_index.shape[1]

    kx, ke = jax.random.split(jax.random.PRNGKey(0), 2)
    x = jax.random.normal(kx, (N, in_ch), jnp.float32)
    edge_attr = jax.random.normal(ke, (E, F), jnp.float32)
    batch = jnp.repeat(jnp.arange(G, dtype=jnp.int32), nodes_per_graph)

    model = GraphNetPallas(in_ch, out_ch, F, hidden_channels=hidden,
                           key=jax.random.PRNGKey(42))
    out = jax.block_until_ready(model(x, edge_index, edge_attr, batch, G))

    ref = reference_forward(model.params, x, edge_index, edge_attr, batch, G)
    assert out.shape == (G * out_ch,)
    # bf16 MXU operands are a deliberate numerics change -> relaxed tolerance
    assert jnp.allclose(out, ref, atol=3e-2, rtol=3e-2)
    print("KERNEL_OK")
</pallas_src>

<mosaic_0001>
module attributes {stable_mosaic.version = 11 : i64} {
  func.func @_graphnet_fused_kernel(%arg0: i32, %arg1: memref<128x128xf32, #tpu.memory_space<vmem>>, %arg2: memref<128x8xf32, #tpu.memory_space<vmem>>, %arg3: memref<128x1xi32, #tpu.memory_space<vmem>>, %arg4: memref<1x128xi32, #tpu.memory_space<vmem>>, %arg5: memref<1x128xf32, #tpu.memory_space<vmem>>, %arg6: memref<1x128xi32, #tpu.memory_space<vmem>>, %arg7: memref<1x128xf32, #tpu.memory_space<vmem>>, %arg8: memref<1x1152x128xbf16, #tpu.memory_space<vmem>>, %arg9: memref<1x128x128xbf16, #tpu.memory_space<vmem>>, %arg10: memref<1x1x128xf32, #tpu.memory_space<vmem>>, %arg11: memref<8x128xf32, #tpu.memory_space<vmem>>, %arg12: memref<128x128xf32, #tpu.memory_space<vmem>>, %arg13: memref<128x128xbf16, #tpu.memory_space<vmem>>, %arg14: memref<128x128xbf16, #tpu.memory_space<vmem>>) attributes {dimension_semantics = [#tpu.dimension_semantics<arbitrary>], iteration_bounds = array<i64: 2>, scalar_prefetch = 0 : i64, scratch_operands = 3 : i64, tpu.core_type = #tpu.core_type<tc>, window_params = [{pipeline_mode = #tpu.pipeline_mode<synchronous>, transform_indices = @transform_0, window_bounds = array<i64: 128, 128>}, {pipeline_mode = #tpu.pipeline_mode<synchronous>, transform_indices = @transform_1, window_bounds = array<i64: 128, 8>}, {pipeline_mode = #tpu.pipeline_mode<synchronous>, transform_indices = @transform_2, window_bounds = array<i64: 128, 1>}, {pipeline_mode = #tpu.pipeline_mode<synchronous>, transform_indices = @transform_3, window_bounds = array<i64: 1, 128>}, {pipeline_mode = #tpu.pipeline_mode<synchronous>, transform_indices = @transform_4, window_bounds = array<i64: 1, 128>}, {pipeline_mode = #tpu.pipeline_mode<synchronous>, transform_indices = @transform_5, window_bounds = array<i64: 1, 128>}, {pipeline_mode = #tpu.pipeline_mode<synchronous>, transform_indices = @transform_6, window_bounds = array<i64: 1, 128>}, {transform_indices = @transform_7, window_bounds = array<i64: 1, 1152, 128>}, {transform_indices = @transform_8, window_bounds = array<i64: 1, 128, 128>}, {transform_indices = @transform_9, window_bounds = array<i64: 1, 1, 128>}, {pipeline_mode = #tpu.pipeline_mode<synchronous>, transform_indices = @transform_10, window_bounds = array<i64: 8, 128>}]} {
    %c0_i32 = arith.constant 0 : i32
    %0 = arith.cmpi eq, %arg0, %c0_i32 : i32
    %1 = arith.extui %0 : i1 to i32
    %c0_i32_0 = arith.constant 0 : i32
    %2 = arith.cmpi ne, %1, %c0_i32_0 : i32
    scf.if %2 {
      %c0_23 = arith.constant 0 : index
      %c0_24 = arith.constant 0 : index
      %60 = vector.load %arg1[%c0_23, %c0_24] : memref<128x128xf32, #tpu.memory_space<vmem>>, vector<128x128xf32>
      %c0_25 = arith.constant 0 : index
      %c0_26 = arith.constant 0 : index
      %61 = vector.load %arg12[%c0_25, %c0_26] : memref<128x128xf32, #tpu.memory_space<vmem>>, vector<128x128xf32>
      tpu.vector_store %arg12[%c0_25, %c0_26], %60 {strides = array<i32>} : memref<128x128xf32, #tpu.memory_space<vmem>>, vector<128x128xf32>,
      %62 = tpu.iota {dimensions = array<i32: 1>} : vector<128x128xi32>
      %c0_27 = arith.constant 0 : index
      %c0_28 = arith.constant 0 : index
      %63 = vector.load %arg3[%c0_27, %c0_28] : memref<128x1xi32, #tpu.memory_space<vmem>>, vector<128x1xi32>
      %64 = vector.broadcast %63 : vector<128x1xi32> to vector<128x128xi32>
      %65 = arith.cmpi eq, %62, %64 : vector<128x128xi32>
      %cst_29 = arith.constant 1.000000e+00 : f32
      %cst_30 = arith.constant 0.000000e+00 : f32
      %66 = vector.broadcast %cst_29 : f32 to vector<128x128xf32>
      %67 = vector.broadcast %cst_30 : f32 to vector<128x128xf32>
      %68 = arith.select %65, %66, %67 : vector<128x128xi1>, vector<128x128xf32>
      %69 = arith.truncf %68 : vector<128x128xf32> to vector<128x128xbf16>
      %c0_31 = arith.constant 0 : index
      %c0_32 = arith.constant 0 : index
      %70 = vector.load %arg13[%c0_31, %c0_32] : memref<128x128xbf16, #tpu.memory_space<vmem>>, vector<128x128xbf16>
      tpu.vector_store %arg13[%c0_31, %c0_32], %69 {strides = array<i32>} : memref<128x128xbf16, #tpu.memory_space<vmem>>, vector<128x128xbf16>,
      %71 = tpu.iota {dimensions = array<i32: 0>} : vector<128x128xi32>
      %c0_33 = arith.constant 0 : index
      %c0_34 = arith.constant 0 : index
      %72 = vector.load %arg4[%c0_33, %c0_34] : memref<1x128xi32, #tpu.memory_space<vmem>>, vector<1x128xi32>
      %73 = vector.broadcast %72 : vector<1x128xi32> to vector<128x128xi32>
      %74 = arith.cmpi eq, %71, %73 : vector<128x128xi32>
      %c0_35 = arith.constant 0 : index
      %c0_36 = arith.constant 0 : index
      %75 = vector.load %arg5[%c0_35, %c0_36] : memref<1x128xf32, #tpu.memory_space<vmem>>, vector<1x128xf32>
      %cst_37 = arith.constant 0.000000e+00 : f32
      %76 = vector.shape_cast %75 : vector<1x128xf32> to vector<1x128xf32>
      %77 = vector.broadcast %76 : vector<1x128xf32> to vector<128x128xf32>
      %78 = vector.broadcast %cst_37 : f32 to vector<128x128xf32>
      %79 = arith.select %74, %77, %78 : vector<128x128xi1>, vector<128x128xf32>
      %80 = arith.truncf %79 : vector<128x128xf32> to vector<128x128xbf16>
      %c0_38 = arith.constant 0 : index
      %c0_39 = arith.constant 0 : index
      %81 = vector.load %arg14[%c0_38, %c0_39] : memref<128x128xbf16, #tpu.memory_space<vmem>>, vector<128x128xbf16>
      tpu.vector_store %arg14[%c0_38, %c0_39], %80 {strides = array<i32>} : memref<128x128xbf16, #tpu.memory_space<vmem>>, vector<128x128xbf16>,
    } else {
    }
    %c0 = arith.constant 0 : index
    %c0_1 = arith.constant 0 : index
    %3 = vector.load %arg12[%c0, %c0_1] : memref<128x128xf32, #tpu.memory_space<vmem>>, vector<128x128xf32>
    %4 = arith.truncf %3 : vector<128x128xf32> to vector<128x128xbf16>
    %c0_2 = arith.constant 0 : index
    %c0_3 = arith.constant 0 : index
    %5 = vector.load %arg2[%c0_2, %c0_3] : memref<128x8xf32, #tpu.memory_space<vmem>>, vector<128x8xf32>
    %c0_4 = arith.constant 0 : index
    %c0_5 = arith.constant 0 : index
    %6 = vector.load %arg13[%c0_4, %c0_5] : memref<128x128xbf16, #tpu.memory_space<vmem>>, vector<128x128xbf16>
    %cst = arith.constant dense<0.000000e+00> : vector<128x128xf32>
    %7 = tpu.matmul %6, %4, %cst {dimension_numbers = #tpu.dot_dimension_numbers<[1], [0], [0], [1], [0, 0, 1, 1], [], []>} : vector<128x128xbf16>, vector<128x128xbf16>, vector<128x128xf32> -> vector<128x128xf32>
    %8 = vector.extract_strided_slice %5 {offsets = [0, 0], sizes = [128, 1], strides = [1, 1]} : vector<128x8xf32> to vector<128x1xf32>
    %9 = vector.broadcast %8 : vector<128x1xf32> to vector<128x128xf32>
    %10 = arith.mulf %9, %7 : vector<128x128xf32>
    %11 = arith.truncf %10 : vector<128x128xf32> to vector<128x128xbf16>
    %12 = vector.extract_strided_slice %5 {offsets = [0, 1], sizes = [128, 1], strides = [1, 1]} : vector<128x8xf32> to vector<128x1xf32>
    %13 = vector.broadcast %12 : vector<128x1xf32> to vector<128x128xf32>
    %14 = arith.mulf %13, %7 : vector<128x128xf32>
    %15 = arith.truncf %14 : vector<128x128xf32> to vector<128x128xbf16>
    %16 = vector.extract_strided_slice %5 {offsets = [0, 2], sizes = [128, 1], strides = [1, 1]} : vector<128x8xf32> to vector<128x1xf32>
    %17 = vector.broadcast %16 : vector<128x1xf32> to vector<128x128xf32>
    %18 = arith.mulf %17, %7 : vector<128x128xf32>
    %19 = arith.truncf %18 : vector<128x128xf32> to vector<128x128xbf16>
    %20 = vector.extract_strided_slice %5 {offsets = [0, 3], sizes = [128, 1], strides = [1, 1]} : vector<128x8xf32> to vector<128x1xf32>
    %21 = vector.broadcast %20 : vector<128x1xf32> to vector<128x128xf32>
    %22 = arith.mulf %21, %7 : vector<128x128xf32>
    %23 = arith.truncf %22 : vector<128x128xf32> to vector<128x128xbf16>
    %24 = vector.extract_strided_slice %5 {offsets = [0, 4], sizes = [128, 1], strides = [1, 1]} : vector<128x8xf32> to vector<128x1xf32>
    %25 = vector.broadcast %24 : vector<128x1xf32> to vector<128x128xf32>
    %26 = arith.mulf %25, %7 : vector<128x128xf32>
    %27 = arith.truncf %26 : vector<128x128xf32> to vector<128x128xbf16>
    %28 = vector.extract_strided_slice %5 {offsets = [0, 5], sizes = [128, 1], strides = [1, 1]} : vector<128x8xf32> to vector<128x1xf32>
    %29 = vector.broadcast %28 : vector<128x1xf32> to vector<128x128xf32>
    %30 = arith.mulf %29, %7 : vector<128x128xf32>
    %31 = arith.truncf %30 : vector<128x128xf32> to vector<128x128xbf16>
    %32 = vector.extract_strided_slice %5 {offsets = [0, 6], sizes = [128, 1], strides = [1, 1]} : vector<128x8xf32> to vector<128x1xf32>
    %33 = vector.broadcast %32 : vector<128x1xf32> to vector<128x128xf32>
    %34 = arith.mulf %33, %7 : vector<128x128xf32>
    %35 = arith.truncf %34 : vector<128x128xf32> to vector<128x128xbf16>
    %36 = vector.extract_strided_slice %5 {offsets = [0, 7], sizes = [128, 1], strides = [1, 1]} : vector<128x8xf32> to vector<128x1xf32>
    %37 = vector.broadcast %36 : vector<128x1xf32> to vector<128x128xf32>
    %38 = arith.mulf %37, %7 : vector<128x128xf32>
    %39 = arith.truncf %38 : vector<128x128xf32> to vector<128x128xbf16>
    %40 = arith.truncf %7 : vector<128x128xf32> to vector<128x128xbf16>
    %41 = tpu.concatenate %11, %15, %19, %23, %27, %31, %35, %39, %40 in 1 : vector<128x128xbf16>, vector<128x128xbf16>, vector<128x128xbf16>, vector<128x128xbf16>, vector<128x128xbf16>, vector<128x128xbf16>, vector<128x128xbf16>, vector<128x128xbf16>, vector<128x128xbf16> -> vector<128x1152xbf16>
    %c0_6 = arith.constant 0 : index
    %c0_7 = arith.constant 0 : index
    %c0_8 = arith.constant 0 : index
    %42 = vector.load %arg8[%c0_6, %c0_7, %c0_8] : memref<1x1152x128xbf16, #tpu.memory_space<vmem>>, vector<1x1152x128xbf16>
    %43 = vector.shape_cast %42 : vector<1x1152x128xbf16> to vector<1152x128xbf16>
    %cst_9 = arith.constant dense<0.000000e+00> : vector<128x128xf32>
    %44 = tpu.matmul %41, %43, %cst_9 {dimension_numbers = #tpu.dot_dimension_numbers<[1], [0], [0], [1], [0, 0, 1, 1], [], []>} : vector<128x1152xbf16>, vector<1152x128xbf16>, vector<128x128xf32> -> vector<128x128xf32>
    %c0_10 = arith.constant 0 : index
    %c0_11 = arith.constant 0 : index
    %45 = vector.load %arg14[%c0_10, %c0_11] : memref<128x128xbf16, #tpu.memory_space<vmem>>, vector<128x128xbf16>
    %46 = arith.truncf %44 : vector<128x128xf32> to vector<128x128xbf16>
    %cst_12 = arith.constant dense<0.000000e+00> : vector<128x128xf32>
    %47 = tpu.matmul %45, %46, %cst_12 {dimension_numbers = #tpu.dot_dimension_numbers<[1], [0], [0], [1], [0, 0, 1, 1], [], []>} : vector<128x128xbf16>, vector<128x128xbf16>, vector<128x128xf32> -> vector<128x128xf32>
    %c0_13 = arith.constant 0 : index
    %c0_14 = arith.constant 0 : index
    %c0_15 = arith.constant 0 : index
    %48 = vector.load %arg9[%c0_13, %c0_14, %c0_15] : memref<1x128x128xbf16, #tpu.memory_space<vmem>>, vector<1x128x128xbf16>
    %49 = vector.shape_cast %48 : vector<1x128x128xbf16> to vector<128x128xbf16>
    %cst_16 = arith.constant dense<0.000000e+00> : vector<128x128xf32>
    %50 = tpu.matmul %4, %49, %cst_16 {dimension_numbers = #tpu.dot_dimension_numbers<[1], [0], [0], [1], [0, 0, 1, 1], [], []>} : vector<128x128xbf16>, vector<128x128xbf16>, vector<128x128xf32> -> vector<128x128xf32>
    %51 = arith.addf %50, %47 : vector<128x128xf32>
    %c0_17 = arith.constant 0 : index
    %c0_18 = arith.constant 0 : index
    %c0_19 = arith.constant 0 : index
    %52 = vector.load %arg10[%c0_17, %c0_18, %c0_19] : memref<1x1x128xf32, #tpu.memory_space<vmem>>, vector<1x1x128xf32>
    %53 = vector.shape_cast %52 : vector<1x1x128xf32> to vector<1x128xf32>
    %54 = vector.broadcast %53 : vector<1x128xf32> to vector<128x128xf32>
    %55 = arith.addf %51, %54 : vector<128x128xf32>
    %c0_20 = arith.constant 0 : index
    %c0_21 = arith.constant 0 : index
    %56 = vector.load %arg12[%c0_20, %c0_21] : memref<128x128xf32, #tpu.memory_space<vmem>>, vector<128x128xf32>
    tpu.vector_store %arg12[%c0_20, %c0_21], %55 {strides = array<i32>} : memref<128x128xf32, #tpu.memory_space<vmem>>, vector<128x128xf32>,
    %c1_i32 = arith.constant 1 : i32
    %57 = arith.cmpi eq, %arg0, %c1_i32 : i32
    %58 = arith.extui %57 : i1 to i32
    %c0_i32_22 = arith.constant 0 : i32
    %59 = arith.cmpi ne, %58, %c0_i32_22 : i32
    scf.if %59 {
      %60 = tpu.iota {dimensions = array<i32: 0>} : vector<8x128xi32>
      %c0_23 = arith.constant 0 : index
      %c0_24 = arith.constant 0 : index
      %61 = vector.load %arg6[%c0_23, %c0_24] : memref<1x128xi32, #tpu.memory_space<vmem>>, vector<1x128xi32>
      %62 = vector.broadcast %61 : vector<1x128xi32> to vector<8x128xi32>
      %63 = arith.cmpi eq, %60, %62 : vector<8x128xi32>
      %c0_25 = arith.constant 0 : index
      %c0_26 = arith.constant 0 : index
      %64 = vector.load %arg7[%c0_25, %c0_26] : memref<1x128xf32, #tpu.memory_space<vmem>>, vector<1x128xf32>
      %cst_27 = arith.constant 0.000000e+00 : f32
      %65 = vector.shape_cast %64 : vector<1x128xf32> to vector<1x128xf32>
      %66 = vector.broadcast %65 : vector<1x128xf32> to vector<8x128xf32>
      %67 = vector.broadcast %cst_27 : f32 to vector<8x128xf32>
      %68 = arith.select %63, %66, %67 : vector<8x128xi1>, vector<8x128xf32>
      %69 = arith.truncf %68 : vector<8x128xf32> to vector<8x128xbf16>
      %70 = arith.truncf %55 : vector<128x128xf32> to vector<128x128xbf16>
      %cst_28 = arith.constant dense<0.000000e+00> : vector<8x128xf32>
      %71 = tpu.matmul %69, %70, %cst_28 {dimension_numbers = #tpu.dot_dimension_numbers<[1], [0], [0], [1], [0, 0, 1, 1], [], []>} : vector<8x128xbf16>, vector<128x128xbf16>, vector<8x128xf32> -> vector<8x128xf32>
      %c0_29 = arith.constant 0 : index
      %c0_30 = arith.constant 0 : index
      %72 = vector.load %arg11[%c0_29, %c0_30] : memref<8x128xf32, #tpu.memory_space<vmem>>, vector<8x128xf32>
      tpu.vector_store %arg11[%c0_29, %c0_30], %71 {strides = array<i32>} : memref<8x128xf32, #tpu.memory_space<vmem>>, vector<8x128xf32>,
    } else {
    }
    return
  }
  func.func @transform_0(%arg0: i32) -> (i32, i32) {
    %c0_i32 = arith.constant 0 : i32
    %c0_i32_0 = arith.constant 0 : i32
    %c0_i32_1 = arith.constant 0 : i32
    return %c0_i32, %c0_i32_0 : i32, i32
  }
  func.func @transform_1(%arg0: i32) -> (i32, i32) {
    %c0_i32 = arith.constant 0 : i32
    %c0_i32_0 = arith.constant 0 : i32
    %c0_i32_1 = arith.constant 0 : i32
    return %c0_i32, %c0_i32_0 : i32, i32
  }
  func.func @transform_2(%arg0: i32) -> (i32, i32) {
    %c0_i32 = arith.constant 0 : i32
    %c0_i32_0 = arith.constant 0 : i32
    %c0_i32_1 = arith.constant 0 : i32
    return %c0_i32, %c0_i32_0 : i32, i32
  }
  func.func @transform_3(%arg0: i32) -> (i32, i32) {
    %c0_i32 = arith.constant 0 : i32
    %c0_i32_0 = arith.constant 0 : i32
    %c0_i32_1 = arith.constant 0 : i32
    return %c0_i32, %c0_i32_0 : i32, i32
  }
  func.func @transform_4(%arg0: i32) -> (i32, i32) {
    %c0_i32 = arith.constant 0 : i32
    %c0_i32_0 = arith.constant 0 : i32
    %c0_i32_1 = arith.constant 0 : i32
    return %c0_i32, %c0_i32_0 : i32, i32
  }
  func.func @transform_5(%arg0: i32) -> (i32, i32) {
    %c0_i32 = arith.constant 0 : i32
    %c0_i32_0 = arith.constant 0 : i32
    %c0_i32_1 = arith.constant 0 : i32
    return %c0_i32, %c0_i32_0 : i32, i32
  }
  func.func @transform_6(%arg0: i32) -> (i32, i32) {
    %c0_i32 = arith.constant 0 : i32
    %c0_i32_0 = arith.constant 0 : i32
    %c0_i32_1 = arith.constant 0 : i32
    return %c0_i32, %c0_i32_0 : i32, i32
  }
  func.func @transform_7(%arg0: i32) -> (i32, i32, i32) {
    %c0_i32 = arith.constant 0 : i32
    %c0_i32_0 = arith.constant 0 : i32
    %c0_i32_1 = arith.constant 0 : i32
    return %arg0, %c0_i32, %c0_i32_0 : i32, i32, i32
  }
  func.func @transform_8(%arg0: i32) -> (i32, i32, i32) {
    %c0_i32 = arith.constant 0 : i32
    %c0_i32_0 = arith.constant 0 : i32
    %c0_i32_1 = arith.constant 0 : i32
    return %arg0, %c0_i32, %c0_i32_0 : i32, i32, i32
  }
  func.func @transform_9(%arg0: i32) -> (i32, i32, i32) {
    %c0_i32 = arith.constant 0 : i32
    %c0_i32_0 = arith.constant 0 : i32
    %c0_i32_1 = arith.constant 0 : i32
    return %arg0, %c0_i32, %c0_i32_0 : i32, i32, i32
  }
  func.func @transform_10(%arg0: i32) -> (i32, i32) {
    %c0_i32 = arith.constant 0 : i32
    %c0_i32_0 = arith.constant 0 : i32
    %c0_i32_1 = arith.constant 0 : i32
    return %c0_i32, %c0_i32_0 : i32, i32
  }
}

</mosaic_0001>

<bundles_post_ra>
// kernel: tpu_custom_call.1
= control target key start
LH: loop header
LB: loop body
LE: loop exit
PB: predicated region body
PF: predicated region fallthrough
CT: control target
= control target key end

     0   :  { %15 = vsyncpa [#allocation6], 0  ;;  %s5678_s0 = inlined_call_operand.vmem [shape: f32[128,128], index: 0, kind: input, shape index: {}]   ;;  %s5679_s1 = inlined_call_operand.vmem [shape: f32[128,8], index: 1, kind: input, shape index: {}]   ;;  %s5680_s2 = inlined_call_operand.vmem [shape: s32[128,1], index: 2, kind: input, shape index: {}]   ;;  %s5681_s3 = inlined_call_operand.vmem [shape: s32[1,128], index: 3, kind: input, shape index: {}]   ;;  %s5682_s4 = inlined_call_operand.vmem [shape: f32[1,128], index: 4, kind: input, shape index: {}]   ;;  %s5683_s5 = inlined_call_operand.vmem [shape: s32[1,128], index: 5, kind: input, shape index: {}]   ;;  %s5684_s6 = inlined_call_operand.vmem [shape: f32[1,128], index: 6, kind: input, shape index: {}]   ;;  %s5685_s7 = inlined_call_operand.hbm [shape: bf16[2,1152,128], index: 7, kind: input, shape index: {}]   ;;  %s5686_s8 = inlined_call_operand.vmem [shape: bf16[2,128,128], index: 8, kind: input, shape index: {}]   ;;  %s5687_s9 = inlined_call_operand.vmem [shape: f32[2,1,128], index: 9, kind: input, shape index: {}]   ;;  %s5688_s10 = inlined_call_operand.hbm [shape: f32[8,128], index: 10, kind: output, shape index: {}]  }
   0x1   :  { %17 = vsyncpa [#allocation6 + $0x1], 0 }
   0x2   :  { %18 = vsyncpa [#allocation7], 0  ;;  %s4377_s13 = smov 0   ;;  %s4379_s14 = smov 0  }
   0x3   :  { %s4381_s15 = smov 0   ;;  %s4383_s16 = smov 0  }
   0x4 LB: > { %5712 = sst [smem:[#allocation11_spill]] %s4303_s15  ;;  %s4396_s17 = sadd.s32 4294967295, %s4307_s16   ;;  %s4307_s16 = sphi %s4383_s16, %s5753_s16   ;;  %s4303_s15 = sphi %s4381_s15, %s5750_s15   ;;  %s4299_s14 = sphi %s4379_s14, %s5752_s14   ;;  %s4295_s13 = sphi %s4377_s13, %s5751_s13  }
   0x5   : > { %s4399_s18 = sadd.s32 1, %s4307_s16   ;;  %s178_s20 = sadd.s32 1, %s4303_s15 }
   0x6   : > { %s175_s19 = ssub.s32 %s4307_s16, %s4399_s18  ;;  %p185_p1 = scmp.ne.s32.totalorder %s4303_s15, %s4299_s14 }
   0x7   : > { %p176_p0 = scmp.eq.s32.totalorder %s175_s19, 0  ;;  %p186_p2 = scmp.eq.s32.totalorder %s4307_s16, 0 }
   0x8   : > { %p191_p3 = scmp.ne.s32.totalorder %s4299_s14, %s4295_s13  ;;  %p192_p5 = scmp.eq.s32.totalorder %s4396_s17, 0 }
   0x9   : > { %s4409_s21 = scalar_select %p176_p0, %s4303_s15, %s178_s20  }
   0xa   : > { %p187_p4 = por %p186_p2, %p185_p1  ;;  %p4032_p6 = scmp.lt.s32.totalorder %s4307_s16, 2 }
   0xb   : > { %5713 = sst [smem:[#allocation12_spill]] %s4409_s21  ;;  %p4413_p7 = por %p192_p5, %p191_p3 }
   0xc   : > { %s309_s23 = sand.u32 1, %s4303_s15   ;;  %s4020_s25 = smul.u32 576, %s4307_s16 }
   0xd   : > { %s4019_s24 = smul.u32 576, %s309_s23  ;;  %p4419_p8 = pnand %p4032_p6, %p187_p4 }
   0xe   : > { %s318_s29 = scalar_lea.hbm %s5685_s7, %s4020_s25  ;;  %p3448_p9 = scmp.ge.s32.totalorder %s4307_s16, 1 }
   0xf   : > { %s313_s30 = scalar_lea.vmem [#allocation5], %s4019_s24  ;;  %s319_s12 = sshll.u32 %s318_s29, 4  ;;  %s320_s12 = int_to_ptr.hbm [resolvable:$true] %s319_s12 }
  0x10   : > { %s321_s11 = sshll.u32 %s313_s30, 4  ;;  %s310_s13 = scalar_lea.sflag [#allocation6], %s309_s23  ;;  %s322_s11 = int_to_ptr.vmem [resolvable:$true] %s321_s11 }
  0x11   : > { %s4211_s19 = sshra.s32 %s320_s12, 4  ;;  %p4215_p11 = pneg %p4419_p8  ;;  %s4212_s19 = int_to_ptr.hbm [resolvable:$true] %s4211_s19 }
  0x12   : > { %s4213_s20 = scalar_lea.hbm %s4212_s19, 576  ;;  %s4218_s27 = scalar_lea.hbm %s5685_s7, 1152 }
  0x13   : > { %p4214_p10 = scmp.ne.s32.totalorder %s4212_s19, %s4213_s20  ;;  %p4219_p0 = scmp.lt.s32.totalorder %s4212_s19, %s5685_s7 }
  0x14   : > { %p4220_p1 = scmp.lt.s32.totalorder %s4218_s27, %s4213_s20 }
  0x15   : > { %p4216_p12 = pnand %p4215_p11, %p4214_p10 }
  0x16   : > { %p4221_p2 = por %p4220_p1, %p4219_p0 }
  0x17   : > { %p4217_p13 = pneg %p4216_p12 }
  0x19   : > { %p4222_p3 = pnand %p4221_p2, %p4217_p13 }
  0x1b   : > { %4225 = shalt.err (!%p4222_p3)
}
  0x1c   : > { %s4309_s23 = smov 64   ;;  %s4310_s28 = smov 4  }
  0x1d   : > { %4031 = dma.hbm_to_vmem [thread:$0]  (!%p4419_p8), %s320_s12, 9216, %s322_s11, %s310_s13, %s4309_s23, %s4309_s23, %s4310_s28  }
  0x1e   : > { %p343_p4 = scmp.lt.s32.totalorder %s4307_s16, 3 }
  0x20   : > { %p344_p5 = pnand %p3448_p9, %p343_p4 }
  0x22   : > { %347 = sbr.rel (%p344_p5) target bundleno = 1374 (0x55e), region = 60 }
  0x27   : > { %s349_s15 = sand.u32 1, %s4299_s14  }
  0x28   : > { %s4021_s21 = smul.u32 576, %s349_s15  ;;  %s350_s29 = scalar_lea.sflag [#allocation6], %s349_s15 }
  0x2a   : > { %s4441_s30 = scalar_lea.vmem [#allocation5], %s4021_s21 }
  0x2b   : > { %4286 = dma.done.wait (%p4413_p7), %s350_s29, 9216  }
  0x2c   : > { %4288 = vsyncadd (%p4413_p7), %s350_s29, 4294958080  ;;  %p394_p6 = scmp.lt.s32.totalorder %s4396_s17, 1  ;;  %p3451_p8 = scmp.ne.s32.totalorder %s4396_s17, 0 }
  0x2e   : > { %s4449_s26 = scalar_select %p394_p6, %s4396_s17, 1 }
  0x2f   : > { %405 = sbr.rel (%p3451_p8) target bundleno = 215 (0xd7), region = 68 }
  0x30   : > { %s3844_s16 = sshll.u32 %s4449_s26, 6  ;;  %s401_s13 = scalar_lea.vmem %s5687_s9, %s4449_s26 }
  0x31   : > { %s4459_s27 = scalar_lea.vmem %s5686_s8, %s3844_s16 }
  0x34   : > { %v444_v0 = vld [vmem:[%s5680_s2 + $0x20] sm:$0xff]  ;;  %v442_v1 = vld [vmem:[%s5680_s2 + $0x10] sm:$0xff]  ;;  %v4311_v3 = vmov 0   ;;  %v445_v4 = vld [vmem:[%s5680_s2 + $0x28] sm:$0xff]  ;;  %v438_v17 = vlaneseq  ;;  %v4312_v62 = vmov 0.0  }
  0x35   : > { %v440_v2 = vld [vmem:[%s5680_s2] sm:$0xff]  ;;  %4082 = vset.pattern.permute.xlu2 %v4311_v3  ;;  %4081 = vset.pattern.permute.xlu1 %v4311_v3  ;;  %v443_v5 = vld [vmem:[%s5680_s2 + $0x18] sm:$0xff]  ;;  %v441_v6 = vld [vmem:[%s5680_s2 + $0x8] sm:$0xff] }
  0x36   : > { %4080 = vset.pattern.permute.xlu0 %v4311_v3  ;;  %469 = vperm.xlu2 %4082, %v444_v0   ;;  %v448_v7 = vld [vmem:[%s5680_s2 + $0x40] sm:$0xff]  ;;  %v447_v8 = vld [vmem:[%s5680_s2 + $0x38] sm:$0xff]  ;;  %v446_v9 = vld [vmem:[%s5680_s2 + $0x30] sm:$0xff]  ;;  %v569_v18 = vshrl.u32 %v438_v17, 7  ;;  %v4524_v61 = vand.u32 127, %v438_v17 }
  0x37   : > { %463 = vperm.xlu1 %4081, %v442_v1   ;;  %457 = vperm.xlu0 %4080, %v440_v2   ;;  %v451_v10 = vld [vmem:[%s5680_s2 + $0x58] sm:$0xff]  ;;  %v450_v11 = vld [vmem:[%s5680_s2 + $0x50] sm:$0xff]  ;;  %v449_v12 = vld [vmem:[%s5680_s2 + $0x48] sm:$0xff] }
  0x38   : > { %v454_v13 = vld [vmem:[%s5680_s2 + $0x70] sm:$0xff]  ;;  %v453_v14 = vld [vmem:[%s5680_s2 + $0x68] sm:$0xff]  ;;  %v452_v15 = vld [vmem:[%s5680_s2 + $0x60] sm:$0xff]  ;;  %v570_v20 = vadd.s32 8, %v569_v18  ;;  %v571_v21 = vadd.s32 16, %v569_v18  ;;  %v572_v22 = vadd.s32 24, %v569_v18 }
  0x39   : > { %v455_v16 = vld [vmem:[%s5680_s2 + $0x78] sm:$0xff]  ;;  %v4083_v19 = vld [vmem:[%s5681_s3] ss:$0 sm:$0xff]  ;;  %v573_v23 = vadd.s32 32, %v569_v18  ;;  %v574_v24 = vadd.s32 40, %v569_v18  ;;  %v575_v25 = vadd.s32 48, %v569_v18 }
  0x3a   : > { %v576_v26 = vadd.s32 56, %v569_v18  ;;  %v577_v27 = vadd.s32 64, %v569_v18  ;;  %v578_v28 = vadd.s32 72, %v569_v18  ;;  %v579_v29 = vadd.s32 80, %v569_v18  ;;  %v4084_v33 = vld [vmem:[%s5682_s4] ss:$0 sm:$0xff] }
  0x3b   : > { %v580_v30 = vadd.s32 88, %v569_v18  ;;  %v581_v31 = vadd.s32 96, %v569_v18  ;;  %v582_v32 = vadd.s32 104, %v569_v18  ;;  %v583_v34 = vadd.s32 112, %v569_v18  ;;  %v409_v17 = vld [vmem:[%s5678_s0 + $0x18] sm:$0xff] }
  0x3c   : > { %v584_v35 = vadd.s32 120, %v569_v18  ;;  %vm587_vm0 = vcmp.eq.s32.totalorder %v569_v18, %v4083_v19  ;;  %vm588_vm1 = vcmp.eq.s32.totalorder %v570_v20, %v4083_v19  ;;  %vm589_vm2 = vcmp.eq.s32.totalorder %v571_v21, %v4083_v19  ;;  %v410_v20 = vld [vmem:[%s5678_s0 + $0x20] sm:$0xff]  ;;  %v411_v21 = vld [vmem:[%s5678_s0 + $0x28] sm:$0xff]  ;;  %425 = vst [vmem:[#allocation2 + $0x18] sm:$0xff] %v409_v17 }
  0x3d   : > { %vm590_vm3 = vcmp.eq.s32.totalorder %v572_v22, %v4083_v19  ;;  %vm591_vm4 = vcmp.eq.s32.totalorder %v573_v23, %v4083_v19  ;;  %vm592_vm5 = vcmp.eq.s32.totalorder %v574_v24, %v4083_v19  ;;  %vm593_vm6 = vcmp.eq.s32.totalorder %v575_v25, %v4083_v19  ;;  %v412_v25 = vld [vmem:[%s5678_s0 + $0x30] sm:$0xff]  ;;  %426 = vst [vmem:[#allocation2 + $0x50] sm:$0xff] %v410_v20 }
  0x3e   : > { %472 = vperm.xlu2 %4082, %v445_v4   ;;  %vm594_vm7 = vcmp.eq.s32.totalorder %v576_v26, %v4083_v19  ;;  %vm595_vm8 = vcmp.eq.s32.totalorder %v577_v27, %v4083_v19  ;;  %vm596_vm9 = vcmp.eq.s32.totalorder %v578_v28, %v4083_v19  ;;  %vm597_vm10 = vcmp.eq.s32.totalorder %v579_v29, %v4083_v19  ;;  %v413_v26 = vld [vmem:[%s5678_s0 + $0x38] sm:$0xff]  ;;  %v414_v27 = vld [vmem:[%s5678_s0 + $0x40] sm:$0xff]  ;;  %v415_v29 = vld [vmem:[%s5678_s0 + $0x48] sm:$0xff] }
  0x3f   : > { %466 = vperm.xlu1 %4081, %v443_v5   ;;  %460 = vperm.xlu0 %4080, %v441_v6   ;;  %vm598_vm11 = vcmp.eq.s32.totalorder %v580_v30, %v4083_v19  ;;  %vm599_vm12 = vcmp.eq.s32.totalorder %v581_v31, %v4083_v19  ;;  %vm600_vm13 = vcmp.eq.s32.totalorder %v582_v32, %v4083_v19  ;;  %v607_v36 = vsel %vm587_vm0, %v4084_v33, 0.0  ;;  %v416_v30 = vld [vmem:[%s5678_s0 + $0x50] sm:$0xff] }
  0x40   : > { %v608_v37 = vsel %vm588_vm1, %v4084_v33, 0.0  ;;  %v609_v38 = vsel %vm589_vm2, %v4084_v33, 0.0  ;;  %v610_v39 = vsel %vm590_vm3, %v4084_v33, 0.0  ;;  %v611_v40 = vsel %vm591_vm4, %v4084_v33, 0.0  ;;  %427 = vst [vmem:[#allocation2 + $0x68] sm:$0xff] %v411_v21 }
  0x41   : > { %v612_v41 = vsel %vm592_vm5, %v4084_v33, 0.0  ;;  %v613_v42 = vsel %vm593_vm6, %v4084_v33, 0.0  ;;  %v614_v43 = vsel %vm594_vm7, %v4084_v33, 0.0  ;;  %vm601_vm14 = vcmp.eq.s32.totalorder %v583_v34, %v4083_v19  ;;  %428 = vst [vmem:[#allocation2 + $0x8] sm:$0xff] %v412_v25  ;;  %v418_v34 = vld [vmem:[%s5678_s0 + $0x60] sm:$0xff] }
  0x42   : > { %vm602_vm15 = vcmp.eq.s32.totalorder %v584_v35, %v4083_v19  ;;  %v615_v44 = vsel %vm595_vm8, %v4084_v33, 0.0  ;;  %v616_v45 = vsel %vm596_vm9, %v4084_v33, 0.0  ;;  %v617_v46 = vsel %vm597_vm10, %v4084_v33, 0.0  ;;  %429 = vst [vmem:[#allocation2 + $0x48] sm:$0xff] %v413_v26 }
  0x43   : > { %v618_v47 = vsel %vm598_vm11, %v4084_v33, 0.0  ;;  %v619_v48 = vsel %vm599_vm12, %v4084_v33, 0.0  ;;  %v3968_v49 = vpack.c.bf16 %v608_v37, %v607_v36  ;;  %v620_v50 = vsel %vm600_vm13, %v4084_v33, 0.0  ;;  %430 = vst [vmem:[#allocation2 + $0x40] sm:$0xff] %v414_v27 }
  0x44   : > { %v3973_v51 = vpack.c.bf16 %v610_v39, %v609_v38  ;;  %v3978_v52 = vpack.c.bf16 %v612_v41, %v611_v40  ;;  %v3983_v53 = vpack.c.bf16 %v614_v43, %v613_v42  ;;  %v621_v54 = vsel %vm601_vm14, %v4084_v33, 0.0  ;;  %431 = vst [vmem:[#allocation2 + $0x20] sm:$0xff] %v415_v29  ;;  %v419_v41 = vld [vmem:[%s5678_s0 + $0x68] sm:$0xff]  ;;  %v420_v42 = vld [vmem:[%s5678_s0 + $0x70] sm:$0xff]  ;;  %v421_v43 = vld [vmem:[%s5678_s0 + $0x78] sm:$0xff] }
  0x45   : > { %v622_v55 = vsel %vm602_vm15, %v4084_v33, 0.0  ;;  %3969 = vst [vmem:[#allocation4 + $0x30] sm:$0xff] %v3968_v49   ;;  %v3988_v56 = vpack.c.bf16 %v616_v45, %v615_v44  ;;  %v3993_v57 = vpack.c.bf16 %v618_v47, %v617_v46  ;;  %v3998_v58 = vpack.c.bf16 %v620_v50, %v619_v48  ;;  %v417_v33 = vld [vmem:[%s5678_s0 + $0x58] sm:$0xff] }
  0x46   : > { %481 = vperm.xlu2 %4082, %v448_v7   ;;  %4012 = vst [vmem:[#allocation4] sm:$0xff] %v3973_v51   ;;  %v4003_v59 = vpack.c.bf16 %v622_v55, %v621_v54 }
  0x47   : > { %478 = vperm.xlu1 %4081, %v447_v8   ;;  %475 = vperm.xlu0 %4080, %v446_v9   ;;  %4013 = vst [vmem:[#allocation4 + $0x10] sm:$0xff] %v3978_v52  }
  0x48   : > { %4014 = vst [vmem:[#allocation4 + $0x28] sm:$0xff] %v3983_v53  }
  0x49   : > { %4015 = vst [vmem:[#allocation4 + $0x38] sm:$0xff] %v3988_v56  }
  0x4a   : > { %4016 = vst [vmem:[#allocation4 + $0x18] sm:$0xff] %v3993_v57  }
  0x4b   : > { %4017 = vst [vmem:[#allocation4 + $0x8] sm:$0xff] %v3998_v58  }
  0x4c   : > { %4018 = vst [vmem:[#allocation4 + $0x20] sm:$0xff] %v4003_v59  }
  0x4d   : > { %432 = vst [vmem:[#allocation2 + $0x10] sm:$0xff] %v416_v30 }
  0x4e   : > { %490 = vperm.xlu2 %4082, %v451_v10   ;;  %433 = vst [vmem:[#allocation2 + $0x38] sm:$0xff] %v417_v33 }
  0x4f   : > { %487 = vperm.xlu1 %4081, %v450_v11   ;;  %484 = vperm.xlu0 %4080, %v449_v12   ;;  %434 = vst [vmem:[#allocation2 + $0x60] sm:$0xff] %v418_v34 }
  0x50   : > { %435 = vst [vmem:[#allocation2 + $0x70] sm:$0xff] %v419_v41 }
  0x51   : > { %436 = vst [vmem:[#allocation2 + $0x78] sm:$0xff] %v420_v42 }
  0x52   : > { %437 = vst [vmem:[#allocation2 + $0x28] sm:$0xff] %v421_v43 }
  0x56   : > { %499 = vperm.xlu2 %4082, %v454_v13  }
  0x57   : > { %496 = vperm.xlu1 %4081, %v453_v14   ;;  %493 = vperm.xlu0 %4080, %v452_v15   ;;  %v406_v14 = vld [vmem:[%s5678_s0] sm:$0xff]  ;;  %v407_v15 = vld [vmem:[%s5678_s0 + $0x8] sm:$0xff] }
  0x58   : > { %422 = vst [vmem:[#allocation2 + $0x30] sm:$0xff] %v406_v14 }
  0x59   : > { %423 = vst [vmem:[#allocation2] sm:$0xff] %v407_v15 }
  0x5f   : > { %502 = vperm.xlu0 %4080, %v455_v16   ;;  %v408_v16 = vld [vmem:[%s5678_s0 + $0x10] sm:$0xff] }
  0x60   : > { %424 = vst [vmem:[#allocation2 + $0x58] sm:$0xff] %v408_v16 }
  0x90   : > { %v470_v60 = vpop.permute.xlu2 %469 }
  0x91   : > { %vm508_vm0 = vcmp.eq.s32.totalorder %v4524_v61, %v470_v60 }
  0x92   : > { %v524_v63 = vsel %vm508_vm0, 1.0, %v4312_v62 }
  0x98   : > { %v473_v0 = vpop.permute.xlu2 %472 }
  0x99   : > { %vm509_vm1 = vcmp.eq.s32.totalorder %v4524_v61, %v473_v0 }
  0x9a   : > { %v525_v1 = vsel %vm509_vm1, 1.0, %v4312_v62 }
  0x9b   : > { %v3948_v2 = vpack.c.bf16 %v525_v1, %v524_v63 }
  0x9d   : > { %4006 = vst [vmem:[#allocation3 + $0x10] sm:$0xff] %v3948_v2  }
  0xa0   : > { %v482_v13 = vpop.permute.xlu2 %481 }
  0xa1   : > { %vm512_vm8 = vcmp.eq.s32.totalorder %v4524_v61, %v482_v13 }
  0xa2   : > { %v528_v35 = vsel %vm512_vm8, 1.0, %v4312_v62 }
  0xa8   : > { %v491_v28 = vpop.permute.xlu2 %490 }
  0xa9   : > { %v464_v3 = vpop.permute.xlu1 %463  ;;  %v458_v4 = vpop.permute.xlu0 %457  ;;  %vm515_vm9 = vcmp.eq.s32.totalorder %v4524_v61, %v491_v28 }
  0xaa   : > { %vm506_vm2 = vcmp.eq.s32.totalorder %v4524_v61, %v464_v3  ;;  %vm504_vm3 = vcmp.eq.s32.totalorder %v4524_v61, %v458_v4  ;;  %v531_v36 = vsel %vm515_vm9, 1.0, %v4312_v62 }
  0xab   : > { %v522_v5 = vsel %vm506_vm2, 1.0, %v4312_v62  ;;  %v520_v8 = vsel %vm504_vm3, 1.0, %v4312_v62 }
  0xb0   : > { %v500_v49 = vpop.permute.xlu2 %499 }
  0xb1   : > { %v467_v6 = vpop.permute.xlu1 %466  ;;  %v461_v7 = vpop.permute.xlu0 %460  ;;  %vm518_vm14 = vcmp.eq.s32.totalorder %v4524_v61, %v500_v49 }
  0xb2   : > { %vm507_vm4 = vcmp.eq.s32.totalorder %v4524_v61, %v467_v6  ;;  %vm505_vm5 = vcmp.eq.s32.totalorder %v4524_v61, %v461_v7  ;;  %v534_v51 = vsel %vm518_vm14, 1.0, %v4312_v62 }
  0xb3   : > { %v523_v9 = vsel %vm507_vm4, 1.0, %v4312_v62  ;;  %v521_v10 = vsel %vm505_vm5, 1.0, %v4312_v62 }
  0xb4   : > { %v3945_v11 = vpack.c.bf16 %v523_v9, %v522_v5  ;;  %v3942_v12 = vpack.c.bf16 %v521_v10, %v520_v8 }
  0xb6   : > { %4005 = vst [vmem:[#allocation3] sm:$0xff] %v3945_v11  }
  0xb7   : > { %3943 = vst [vmem:[#allocation3 + $0x28] sm:$0xff] %v3942_v12  }
  0xb9   : > { %v479_v18 = vpop.permute.xlu1 %478  ;;  %v476_v19 = vpop.permute.xlu0 %475 }
  0xba   : > { %vm511_vm6 = vcmp.eq.s32.totalorder %v4524_v61, %v479_v18  ;;  %vm510_vm7 = vcmp.eq.s32.totalorder %v4524_v61, %v476_v19 }
  0xbb   : > { %v527_v22 = vsel %vm511_vm6, 1.0, %v4312_v62  ;;  %v526_v23 = vsel %vm510_vm7, 1.0, %v4312_v62 }
  0xbc   : > { %v3951_v24 = vpack.c.bf16 %v527_v22, %v526_v23 }
  0xbe   : > { %4007 = vst [vmem:[#allocation3 + $0x20] sm:$0xff] %v3951_v24  }
  0xc1   : > { %v488_v31 = vpop.permute.xlu1 %487  ;;  %v485_v32 = vpop.permute.xlu0 %484 }
  0xc2   : > { %vm514_vm10 = vcmp.eq.s32.totalorder %v4524_v61, %v488_v31  ;;  %vm513_vm11 = vcmp.eq.s32.totalorder %v4524_v61, %v485_v32 }
  0xc3   : > { %v530_v37 = vsel %vm514_vm10, 1.0, %v4312_v62  ;;  %v529_v38 = vsel %vm513_vm11, 1.0, %v4312_v62 }
  0xc4   : > { %v3957_v39 = vpack.c.bf16 %v531_v36, %v530_v37  ;;  %v3954_v40 = vpack.c.bf16 %v529_v38, %v528_v35 }
  0xc6   : > { %4009 = vst [vmem:[#allocation3 + $0x8] sm:$0xff] %v3957_v39  }
  0xc7   : > { %4008 = vst [vmem:[#allocation3 + $0x18] sm:$0xff] %v3954_v40  }
  0xc9   : > { %v497_v44 = vpop.permute.xlu1 %496  ;;  %v494_v45 = vpop.permute.xlu0 %493 }
  0xca   : > { %vm517_vm12 = vcmp.eq.s32.totalorder %v4524_v61, %v497_v44  ;;  %vm516_vm13 = vcmp.eq.s32.totalorder %v4524_v61, %v494_v45 }
  0xcb   : > { %v533_v46 = vsel %vm517_vm12, 1.0, %v4312_v62  ;;  %v532_v47 = vsel %vm516_vm13, 1.0, %v4312_v62 }
  0xcc   : > { %v3960_v48 = vpack.c.bf16 %v533_v46, %v532_v47 }
  0xce   : > { %4010 = vst [vmem:[#allocation3 + $0x38] sm:$0xff] %v3960_v48  }
  0xd1   : > { %v503_v50 = vpop.permute.xlu0 %502 }
  0xd2   : > { %vm519_vm15 = vcmp.eq.s32.totalorder %v4524_v61, %v503_v50 }
  0xd3   : > { %v535_v52 = vsel %vm519_vm15, 1.0, %v4312_v62 }
  0xd4   : > { %v3963_v53 = vpack.c.bf16 %v535_v52, %v534_v51 }
  0xd6   : > { %4011 = vst [vmem:[#allocation3 + $0x30] sm:$0xff] %v3963_v53  }
  0xd7 PF: > { %v4609_v54 = vld [vmem:[%s5679_s1 + $0x20] sm:$0xff]  ;;  %v4614_v55 = vld [vmem:[%s5679_s1 + $0x10] sm:$0xff]  ;;  %v4313_v57 = vmov 0   ;;  %v669_v58 = vld [vmem:[#allocation2 + $0x78] sm:$0xff]  ;;  %v4314_v32 = vmov 1   ;;  %v4315_v34 = vmov 2  }
  0xd8   : > { %v4619_v56 = vld [vmem:[%s5679_s1] sm:$0xff]  ;;  %4087 = vset.pattern.permute.xlu2 %v4313_v57  ;;  %4086 = vset.pattern.permute.xlu1 %v4313_v57  ;;  %v670_v59 = vld [vmem:[#allocation2 + $0x28] sm:$0xff]  ;;  %v668_v62 = vld [vmem:[#allocation2 + $0x70] sm:$0xff]  ;;  %v4316_v35 = vmov 3   ;;  %v4317_v36 = vmov 4   ;;  %p3836_p7 = scmp.ne.s32.totalorder %s4396_s17, 1 }
  0xd9   : > { %v667_v60 = vld [vmem:[#allocation2 + $0x60] sm:$0xff]  ;;  %4085 = vset.pattern.permute.xlu0 %v4313_v57  ;;  %830 = vperm.xlu2 %4087, %v4609_v54   ;;  %v4622_v61 = vpack.c.bf16 %v670_v59, %v669_v58  ;;  %v665_v0 = vld [vmem:[#allocation2 + $0x10] sm:$0xff]  ;;  %v666_v1 = vld [vmem:[#allocation2 + $0x38] sm:$0xff] }
  0xda   : > { %820 = vperm.xlu1 %4086, %v4614_v55   ;;  %810 = vperm.xlu0 %4085, %v4619_v56   ;;  %v4627_v63 = vpack.c.bf16 %v668_v62, %v667_v60  ;;  %v4632_v2 = vld [vmem:[%s5679_s1 + $0x28] sm:$0xff]  ;;  %v4638_v3 = vld [vmem:[%s5679_s1 + $0x18] sm:$0xff]  ;;  %v4645_v5 = vpack.c.bf16 %v666_v1, %v665_v0  ;;  %v663_v6 = vld [vmem:[#allocation2 + $0x40] sm:$0xff] }
  0xdb   : > { %5716 = vst [vmem:[#allocation13_spill] sm:$0xff] %v4622_v61  ;;  %759 = vmatpush.bf16.msra.mxu0 %v4622_v61  ;;  %v4643_v4 = vld [vmem:[%s5679_s1 + $0x8] sm:$0xff]  ;;  %v664_v7 = vld [vmem:[#allocation2 + $0x20] sm:$0xff]  ;;  %v4662_v12 = vld [vmem:[%s5679_s1 + $0x38] sm:$0xff] }
  0xdc   : > { %5717 = vst [vmem:[#allocation14_spill] sm:$0xff] %v4627_v63  ;;  %v4651_v8 = vpack.c.bf16 %v664_v7, %v663_v6  ;;  %v661_v9 = vld [vmem:[#allocation2 + $0x8] sm:$0xff]  ;;  %v4656_v11 = vld [vmem:[%s5679_s1 + $0x40] sm:$0xff]  ;;  %v4667_v13 = vld [vmem:[%s5679_s1 + $0x30] sm:$0xff] }
  0xdd   : > { %5718 = vst [vmem:[#allocation15_spill] sm:$0xff] %v4645_v5  ;;  %v662_v10 = vld [vmem:[#allocation2 + $0x48] sm:$0xff]  ;;  %v659_v15 = vld [vmem:[#allocation2 + $0x50] sm:$0xff]  ;;  %v657_v18 = vld [vmem:[#allocation2 + $0x58] sm:$0xff] }
  0xde   : > { %5719 = vst [vmem:[#allocation16_spill] sm:$0xff] %v4651_v8  ;;  %v4669_v14 = vpack.c.bf16 %v662_v10, %v661_v9  ;;  %v660_v16 = vld [vmem:[#allocation2 + $0x68] sm:$0xff]  ;;  %v658_v19 = vld [vmem:[#allocation2 + $0x18] sm:$0xff]  ;;  %v4686_v21 = vld [vmem:[%s5679_s1 + $0x50] sm:$0xff] }
  0xdf   : > { %760 = vmatpush.bf16.msra.mxu0 %v4627_v63  ;;  %v4675_v17 = vpack.c.bf16 %v660_v16, %v659_v15  ;;  %v4680_v20 = vld [vmem:[%s5679_s1 + $0x58] sm:$0xff]  ;;  %v4691_v22 = vld [vmem:[%s5679_s1 + $0x48] sm:$0xff]  ;;  %v4693_v23 = vpack.c.bf16 %v658_v19, %v657_v18  ;;  %v655_v24 = vld [vmem:[#allocation2 + $0x30] sm:$0xff] }
  0xe0   : > { %5720 = vst [vmem:[#allocation17_spill] sm:$0xff] %v4669_v14  ;;  %v656_v25 = vld [vmem:[#allocation2] sm:$0xff]  ;;  %v4704_v27 = vld [vmem:[%s5679_s1 + $0x70] sm:$0xff]  ;;  %v4710_v28 = vld [vmem:[%s5679_s1 + $0x68] sm:$0xff] }
  0xe1   : > { %835 = vperm.xlu2 %4087, %v4632_v2   ;;  %5721 = vst [vmem:[#allocation18_spill] sm:$0xff] %v4675_v17  ;;  %v4699_v26 = vpack.c.bf16 %v656_v25, %v655_v24  ;;  %v4715_v29 = vld [vmem:[%s5679_s1 + $0x60] sm:$0xff]  ;;  %v3845_v30 = vld [vmem:[#allocation3 + $0x28] sm:$0xff]  ;;  %v4723_v31 = vld [vmem:[%s5679_s1 + $0x78] sm:$0xff] }
  0xe2   : > { %825 = vperm.xlu1 %4086, %v4638_v3   ;;  %815 = vperm.xlu0 %4085, %v4643_v4   ;;  %5722 = vst [vmem:[#allocation19_spill] sm:$0xff] %v4693_v23  ;;  %v3846_v33 = vld [vmem:[#allocation3] sm:$0xff]  ;;  %v3847_v37 = vld [vmem:[#allocation3 + $0x10] sm:$0xff]  ;;  %v3849_v40 = vld [vmem:[#allocation3 + $0x18] sm:$0xff] }
  0xe3   : > { %761 = vmatpush.bf16.msra.mxu0 %v4645_v5  ;;  %5723 = vst [vmem:[#allocation20_spill] sm:$0xff] %v4699_v26  ;;  %v3848_v38 = vld [vmem:[#allocation3 + $0x20] sm:$0xff]  ;;  %v3850_v43 = vld [vmem:[#allocation3 + $0x8] sm:$0xff]  ;;  %v3860_v44 = vld [vmem:[%s4441_s30 + $0x38] sm:$0xff] }
  0xe4   : > { %v3868_v45 = vld [vmem:[%s4441_s30 + $0x78] sm:$0xff]  ;;  %2616 = vmatpush.bf16.msra.mxu1 %v3860_v44  ;;  %v3859_v50 = vld [vmem:[%s4441_s30 + $0x30] sm:$0xff]  ;;  %v3858_v53 = vld [vmem:[%s4441_s30 + $0x28] sm:$0xff] }
  0xe5   : > { %v3876_v47 = vld [vmem:[%s4441_s30 + $0xb8] sm:$0xff]  ;;  %2665 = vmatpush.bf16.msra.mxu2 %v3868_v45  ;;  %v3867_v51 = vld [vmem:[%s4441_s30 + $0x70] sm:$0xff]  ;;  %v3874_v60 = vld [vmem:[%s4441_s30 + $0xa8] sm:$0xff] }
  0xe6   : > { %2714 = vmatpush.bf16.msra.mxu3 %v3876_v47  ;;  %v3875_v52 = vld [vmem:[%s4441_s30 + $0xb0] sm:$0xff]  ;;  %v3884_v57 = vld [vmem:[%s4441_s30 + $0xf8] sm:$0xff]  ;;  %v3857_v0 = vld [vmem:[%s4441_s30 + $0x20] sm:$0xff] }
  0xe7   : > { %762 = vmatpush.bf16.msra.mxu0 %v4651_v8  ;;  %v3865_v1 = vld [vmem:[%s4441_s30 + $0x60] sm:$0xff]  ;;  %v3883_v6 = vld [vmem:[%s4441_s30 + $0xf0] sm:$0xff]  ;;  %v3851_v7 = vld [vmem:[#allocation3 + $0x38] sm:$0xff] }
  0xe8   : > { %2617 = vmatpush.bf16.msra.mxu1 %v3859_v50  ;;  %v3873_v9 = vld [vmem:[%s4441_s30 + $0xa0] sm:$0xff]  ;;  %v3856_v10 = vld [vmem:[%s4441_s30 + $0x18] sm:$0xff]  ;;  %v3882_v15 = vld [vmem:[%s4441_s30 + $0xe8] sm:$0xff] }
  0xe9   : > { %850 = vperm.xlu2 %4087, %v4656_v11   ;;  %2666 = vmatpush.bf16.msra.mxu2 %v3867_v51  ;;  %v3864_v18 = vld [vmem:[%s4441_s30 + $0x58] sm:$0xff]  ;;  %v3855_v25 = vld [vmem:[%s4441_s30 + $0x10] sm:$0xff]  ;;  %v3862_v45 = vld [vmem:[%s4441_s30 + $0x48] sm:$0xff] }
  0xea   : > { %845 = vperm.xlu1 %4086, %v4662_v12   ;;  %840 = vperm.xlu0 %4085, %v4667_v13   ;;  %v3872_v24 = vld [vmem:[%s4441_s30 + $0x98] sm:$0xff]  ;;  %v3870_v47 = vld [vmem:[%s4441_s30 + $0x88] sm:$0xff]  ;;  %v3853_v50 = vld [vmem:[%s4441_s30] sm:$0xff] }
  0xeb   : > { %763 = vmatpush.bf16.msra.mxu0 %v4669_v14  ;;  %2715 = vmatpush.bf16.msra.mxu3 %v3875_v52  ;;  %v3879_v52 = vld [vmem:[%s4441_s30 + $0xd0] sm:$0xff] }
  0xec   : > { %2618 = vmatpush.bf16.msra.mxu1 %v3858_v53  ;;  %v3852_v53 = vld [vmem:[#allocation3 + $0x30] sm:$0xff] }
  0xef   : > { %764 = vmatpush.bf16.msra.mxu0 %v4675_v17  ;;  %2716 = vmatpush.bf16.msra.mxu3 %v3874_v60  ;;  %v3878_v60 = vld [vmem:[%s4441_s30 + $0xc8] sm:$0xff]  ;;  %v3920_v17 = vld [vmem:[%s4441_s30 + $0x218] sm:$0xff] }
  0xf0   : > { %2619 = vmatpush.bf16.msra.mxu1 %v3857_v0 }
  0xf1   : > { %865 = vperm.xlu2 %4087, %v4680_v20  }
  0xf2   : > { %860 = vperm.xlu1 %4086, %v4686_v21   ;;  %855 = vperm.xlu0 %4085, %v4691_v22  }
  0xf3   : > { %765 = vmatpush.bf16.msra.mxu0 %v4693_v23  ;;  %2717 = vmatpush.bf16.msra.mxu3 %v3873_v9 }
  0xf4   : > { %2620 = vmatpush.bf16.msra.mxu1 %v3856_v10 }
  0xf7   : > { %766 = vmatpush.bf16.msra.mxu0 %v4699_v26  ;;  %2718 = vmatpush.bf16.msra.mxu3 %v3872_v24 }
  0xf8   : > { %2621 = vmatpush.bf16.msra.mxu1 %v3855_v25  ;;  %v5690_v25 = vmov 6  }
  0xf9   : > { %880 = vperm.xlu2 %4087, %v4704_v27  }
  0xfa   : > { %875 = vperm.xlu1 %4086, %v4710_v28   ;;  %870 = vperm.xlu0 %4085, %v4715_v29  }
  0xfb   : > { %767 = vmatmul.bf16.vlgmr.msra.gmra.mxu0 %v3845_v30  ;;  %v3881_v30 = vld [vmem:[%s4441_s30 + $0xe0] sm:$0xff] }
  0xfc   : > { %2763 = vmatpush.bf16.msrb.mxu0 %v3884_v57  ;;  %v3869_v57 = vld [vmem:[%s4441_s30 + $0x80] sm:$0xff] }
 0x100   : > { %2764 = vmatpush.bf16.msrb.mxu0 %v3883_v6  ;;  %v3877_v6 = vld [vmem:[%s4441_s30 + $0xc0] sm:$0xff] }
 0x101   : > { %4089 = vset.pattern.permute.xlu2 %v4314_v32 }
 0x102   : > { %4088 = vset.pattern.permute.xlu1 %v4314_v32  ;;  %885 = vperm.xlu0 %4085, %v4723_v31  }
 0x103   : > { %925 = vperm.xlu2 %4089, %v4643_v4   ;;  %921 = vperm.xlu1 %4088, %v4619_v56  }
 0x104   : > { %2765 = vmatpush.bf16.msrb.mxu0 %v3882_v15 }
 0x108   : > { %2766 = vmatpush.bf16.msrb.mxu0 %v3881_v30 }
 0x10a   : > { %4090 = vset.pattern.permute.xlu0 %v4315_v34 }
 0x10b   : > { %772 = vmatmul.bf16.gmra.mxu0 %v3846_v33  ;;  %4092 = vset.pattern.permute.xlu2 %v4316_v35  ;;  %v3863_v33 = vld [vmem:[%s4441_s30 + $0x50] sm:$0xff] }
 0x10c   : > { %4091 = vset.pattern.permute.xlu1 %v4315_v34  ;;  %1017 = vperm.xlu0 %4090, %v4619_v56  }
 0x10d   : > { %1113 = vperm.xlu2 %4092, %v4619_v56   ;;  %1021 = vperm.xlu1 %4091, %v4643_v4  }
 0x114   : > { %4095 = vset.pattern.permute.xlu0 %v4317_v36 }
 0x115   : > { %4094 = vset.pattern.permute.xlu2 %v4317_v36  ;;  %4093 = vset.pattern.permute.xlu1 %v4316_v35 }
 0x116   : > { %1213 = vperm.xlu0 %4095, %v4643_v4   ;;  %1209 = vperm.xlu2 %4094, %v4619_v56   ;;  %v3866_v56 = vld [vmem:[%s4441_s30 + $0x68] sm:$0xff] }
 0x117   : > { %1117 = vperm.xlu1 %4093, %v4643_v4   ;;  %2667 = vmatpush.bf16.msra.mxu2 %v3866_v56  ;;  %v3861_v56 = vld [vmem:[%s4441_s30 + $0x40] sm:$0xff] }
 0x11b   : > { %777 = vmatmul.bf16.gmra.mxu0 %v3847_v37  ;;  %2668 = vmatpush.bf16.msra.mxu2 %v3865_v1  ;;  %v3871_v37 = vld [vmem:[%s4441_s30 + $0x90] sm:$0xff] }
 0x11c   : > { %2719 = vmatpush.bf16.msra.mxu3 %v3871_v37 }
 0x11e   : > { %4100 = vset.pattern.permute.xlu0 %v4316_v35  ;;  %4097 = vset.pattern.permute.xlu2 %v4314_v32 }
 0x11f   : > { %4096 = vset.pattern.permute.xlu1 %v4314_v32  ;;  %1121 = vperm.xlu0 %4100, %v4614_v55  }
 0x120   : > { %933 = vperm.xlu2 %4097, %v4638_v3   ;;  %929 = vperm.xlu1 %4096, %v4614_v55  }
 0x121   : > { %2669 = vmatpush.bf16.msra.mxu2 %v3864_v18  ;;  %2720 = vmatpush.bf16.msra.mxu3 %v3870_v47 }
 0x125   : > { %2670 = vmatpush.bf16.msra.mxu2 %v3863_v33  ;;  %2721 = vmatpush.bf16.msra.mxu3 %v3869_v57 }
 0x127   : > { %4105 = vset.pattern.permute.xlu0 %v4314_v32 }
 0x128   : > { %4099 = vset.pattern.permute.xlu2 %v4315_v34  ;;  %4098 = vset.pattern.permute.xlu1 %v4315_v34 }
 0x129   : > { %941 = vperm.xlu0 %4105, %v4632_v2   ;;  %1029 = vperm.xlu2 %4099, %v4638_v3  }
 0x12a   : > { %1025 = vperm.xlu1 %4098, %v4614_v55   ;;  %2671 = vmatpush.bf16.msra.mxu2 %v3862_v45 }
 0x12b   : > { %782 = vmatmul.bf16.gmra.mxu0 %v3848_v38  ;;  %v3854_v38 = vld [vmem:[%s4441_s30 + $0x8] sm:$0xff] }
 0x12c   : > { %2622 = vmatpush.bf16.msra.mxu1 %v3854_v38 }
 0x12e   : > { %2672 = vmatpush.bf16.msra.mxu2 %v3861_v56 }
 0x130   : > { %2623 = vmatpush.bf16.msra.mxu1 %v3853_v50 }
 0x131   : > { %953 = vperm.xlu0 %4105, %v4656_v11   ;;  %4102 = vset.pattern.permute.xlu2 %v4317_v36 }
 0x132   : > { %4101 = vset.pattern.permute.xlu1 %v4316_v35  ;;  %1217 = vperm.xlu2 %4102, %v4614_v55  }
 0x133   : > { %1125 = vperm.xlu1 %4101, %v4638_v3   ;;  %v4759_v39 = vpop.permute.xlu2 %830 }
 0x139   : > { %4118 = vset.pattern.permute.xlu0 %v4315_v34 }
 0x13a   : > { %1045 = vperm.xlu0 %4118, %v4662_v12   ;;  %4104 = vset.pattern.permute.xlu2 %v4314_v32 }
 0x13b   : > { %4103 = vset.pattern.permute.xlu1 %v4317_v36  ;;  %937 = vperm.xlu2 %4104, %v4609_v54   ;;  %v4766_v41 = vpop.permute.xlu2 %835 }
 0x13c   : > { %1221 = vperm.xlu1 %4103, %v4638_v3   ;;  %787 = vmatmul.bf16.gmra.mxu0 %v3849_v40  ;;  %v3880_v40 = vld [vmem:[%s4441_s30 + $0xd8] sm:$0xff] }
 0x13d   : > { %2767 = vmatpush.bf16.msrb.mxu0 %v3880_v40 }
 0x141   : > { %2768 = vmatpush.bf16.msrb.mxu0 %v3879_v52 }
 0x142   : > { %1057 = vperm.xlu0 %4118, %v4686_v21  }
 0x143   : > { %4107 = vset.pattern.permute.xlu2 %v4315_v34  ;;  %v4771_v42 = vpop.permute.xlu2 %850 }
 0x144   : > { %4106 = vset.pattern.permute.xlu1 %v4315_v34  ;;  %1037 = vperm.xlu2 %4107, %v4632_v2  }
 0x145   : > { %1033 = vperm.xlu1 %4106, %v4609_v54   ;;  %2769 = vmatpush.bf16.msrb.mxu0 %v3878_v60 }
 0x149   : > { %2770 = vmatpush.bf16.msrb.mxu0 %v3877_v6 }
 0x14a   : > { %4127 = vset.pattern.permute.xlu0 %v4317_v36 }
 0x14b   : > { %1225 = vperm.xlu0 %4127, %v4609_v54   ;;  %v4780_v46 = vpop.permute.xlu2 %865 }
 0x14c   : > { %4109 = vset.pattern.permute.xlu2 %v4316_v35  ;;  %792 = vmatmul.bf16.gmra.mxu0 %v3850_v43  ;;  %v4784_v48 = vpop.permute.xlu1 %820  ;;  %v4786_v49 = vpop.permute.xlu0 %810 }
 0x14d   : > { %4108 = vset.pattern.permute.xlu1 %v4316_v35  ;;  %1133 = vperm.xlu2 %4109, %v4632_v2  }
 0x14e   : > { %1129 = vperm.xlu1 %4108, %v4609_v54  }
 0x153   : > { %1253 = vperm.xlu0 %4127, %v4680_v20   ;;  %v4804_v62 = vpop.permute.xlu2 %880 }
 0x154   : > { %v4798_v58 = vpop.permute.xlu1 %825  ;;  %v4800_v59 = vpop.permute.xlu0 %815 }
 0x155   : > { %4111 = vset.pattern.permute.xlu2 %v4314_v32 }
 0x156   : > { %4110 = vset.pattern.permute.xlu1 %v4317_v36  ;;  %945 = vperm.xlu2 %4111, %v4667_v13  }
 0x157   : > { %1229 = vperm.xlu1 %4110, %v4632_v2  }
 0x15b   : > { %4132 = vset.pattern.permute.xlu0 %v4316_v35 }
 0x15c   : > { %1149 = vperm.xlu0 %4132, %v4691_v22   ;;  %797 = vmatmul.bf16.gmra.mxu0 %v3851_v7  ;;  %v4817_v2 = vpop.permute.xlu1 %845  ;;  %v4819_v16 = vpop.permute.xlu0 %840 }
 0x15d   : > { %v4822_v19 = vpop.permute.xlu2 %925 }
 0x15e   : > { %4113 = vset.pattern.permute.xlu2 %v4315_v34 }
 0x15f   : > { %4112 = vset.pattern.permute.xlu1 %v4314_v32  ;;  %1041 = vperm.xlu2 %4113, %v4667_v13  }
 0x160   : > { %949 = vperm.xlu1 %4112, %v4662_v12  }
 0x164   : > { %1161 = vperm.xlu0 %4132, %v4715_v29   ;;  %v4836_v43 = vpop.permute.xlu1 %860  ;;  %v4838_v44 = vpop.permute.xlu0 %855 }
 0x167   : > { %4115 = vset.pattern.permute.xlu2 %v4316_v35  ;;  %v4844_v51 = vpop.permute.xlu2 %1113 }
 0x168   : > { %4114 = vset.pattern.permute.xlu1 %v4316_v35  ;;  %1141 = vperm.xlu2 %4115, %v4662_v12  }
 0x169   : > { %1137 = vperm.xlu1 %4114, %v4667_v13  }
 0x16c   : > { %4141 = vset.pattern.permute.xlu0 %v4314_v32  ;;  %802 = vmatmul.bf16.gmra.mxu0 %v3852_v53  ;;  %v4854_v0 = vpop.permute.xlu1 %875  ;;  %v4856_v1 = vpop.permute.xlu0 %870 }
 0x16d   : > { %981 = vperm.xlu0 %4141, %v4723_v31  }
 0x170   : > { %4117 = vset.pattern.permute.xlu2 %v4317_v36  ;;  %v1210_v7 = vpop.permute.xlu2 %1209 }
 0x171   : > { %4116 = vset.pattern.permute.xlu1 %v4317_v36  ;;  %1237 = vperm.xlu2 %4117, %v4662_v12  }
 0x172   : > { %1233 = vperm.xlu1 %4116, %v4667_v13  }
 0x174   : > { %v4864_v9 = vpop.permute.xlu0 %885 }
 0x175   : > { %4146 = vset.pattern.permute.xlu0 %v4317_v36  ;;  %v922_v10 = vpop.permute.xlu1 %921 }
 0x176   : > { %1265 = vperm.xlu0 %4146, %v4704_v27  }
 0x178   : > { %v4868_v15 = vpop.f32.mrf.mxu0 }
 0x179   : > { %4120 = vset.pattern.permute.xlu2 %v4315_v34  ;;  %v888_v13 = vmul.f32 %v4786_v49, %v4868_v15  ;;  %v984_v24 = vmul.f32 %v922_v10, %v4868_v15 }
 0x17a   : > { %4119 = vset.pattern.permute.xlu1 %v4314_v32  ;;  %1049 = vperm.xlu2 %4120, %v4656_v11   ;;  %v4873_v18 = vpop.permute.xlu2 %933 }
 0x17b   : > { %957 = vperm.xlu1 %4119, %v4691_v22   ;;  %v904_v33 = vpack.c.bf16 %v888_v13, %v888_v13  ;;  %v1000_v45 = vpack.c.bf16 %v984_v24, %v984_v24 }
 0x17d   : > { %v1624_v53 = vunpack.c.l.b16 %v904_v33  ;;  %v1672_v10 = vunpack.c.l.b16 %v1000_v45 }
 0x17e   : > { %4151 = vset.pattern.permute.xlu0 %v5690_v25  ;;  %v1018_v30 = vpop.permute.xlu0 %1017 }
 0x17f   : > { %1405 = vperm.xlu0 %4151, %v4643_v4   ;;  %v1022_v37 = vpop.permute.xlu1 %1021  ;;  %v1080_v38 = vmul.f32 %v1018_v30, %v4868_v15  ;;  %v1176_v30 = vmul.f32 %v4844_v51, %v4868_v15 }
 0x180   : > { %v4882_v40 = vpop.f32.mrf.mxu0 }
 0x181   : > { %v1096_v47 = vpack.c.bf16 %v1080_v38, %v1080_v38  ;;  %v889_v49 = vmul.f32 %v4800_v59, %v4882_v40  ;;  %v985_v50 = vmul.f32 %v4822_v19, %v4882_v40  ;;  %v1081_v52 = vmul.f32 %v1022_v37, %v4882_v40 }
 0x182   : > { %4122 = vset.pattern.permute.xlu2 %v4316_v35  ;;  %v1272_v59 = vmul.f32 %v1210_v7, %v4868_v15  ;;  %v1192_v45 = vpack.c.bf16 %v1176_v30, %v1176_v30 }
 0x183   : > { %v1720_v56 = vunpack.c.l.b16 %v1096_v47  ;;  %4121 = vset.pattern.permute.xlu1 %v4315_v34  ;;  %1145 = vperm.xlu2 %4122, %v4656_v11   ;;  %v4892_v4 = vpop.permute.xlu2 %1029  ;;  %v905_v57 = vpack.c.bf16 %v889_v49, %v889_v49  ;;  %v1001_v60 = vpack.c.bf16 %v985_v50, %v985_v50  ;;  %v1097_v6 = vpack.c.bf16 %v1081_v52, %v1081_v52 }
 0x184   : > { %1053 = vperm.xlu1 %4121, %v4691_v22   ;;  %v1288_v52 = vpack.c.bf16 %v1272_v59, %v1272_v59 }
 0x185   : > { %v1625_v19 = vunpack.c.l.b16 %v905_v57  ;;  %v1673_v13 = vunpack.c.l.b16 %v1001_v60  ;;  %v1721_v24 = vunpack.c.l.b16 %v1097_v6  ;;  %v1768_v60 = vunpack.c.l.b16 %v1192_v45 }
 0x187   : > { %1409 = vperm.xlu0 %4151, %v4614_v55   ;;  %v1640_v33 = vpack.c.b16 %v1625_v19, %v1624_v53  ;;  %v1688_v37 = vpack.c.b16 %v1673_v13, %v1672_v10  ;;  %v1736_v38 = vpack.c.b16 %v1721_v24, %v1720_v56  ;;  %v4908_v53 = vunpack.c.l.b16 %v1288_v52 }
 0x188   : > { %v1214_v47 = vpop.permute.xlu0 %1213  ;;  %v4899_v49 = vpop.f32.mrf.mxu0  ;;  %v5692_v19 = vmov 7  }
 0x189   : > { %v1273_v50 = vmul.f32 %v1214_v47, %v4882_v40  ;;  %v1118_v25 = vpop.permute.xlu1 %1117  ;;  %2624 = vmatmul.bf16.vlgmr.msra.gmra.mxu1 %v1640_v33  ;;  %2673 = vmatmul.bf16.vlgmr.msra.gmra.mxu2 %v1688_v37 }
 0x18a   : > { %v1177_v7 = vmul.f32 %v1118_v25, %v4882_v40  ;;  %2722 = vmatmul.bf16.vlgmr.msra.gmra.mxu3 %v1736_v38  ;;  %v890_v25 = vmul.f32 %v4784_v48, %v4899_v49 }
 0x18b   : > { %v1289_v57 = vpack.c.bf16 %v1273_v50, %v1273_v50  ;;  %4124 = vset.pattern.permute.xlu2 %v4317_v36 }
 0x18c   : > { %v1193_v55 = vpack.c.bf16 %v1177_v7, %v1177_v7  ;;  %4123 = vset.pattern.permute.xlu1 %v4317_v36  ;;  %1245 = vperm.xlu2 %4124, %v4691_v22   ;;  %v4906_v51 = vpop.permute.xlu2 %1217  ;;  %v906_v33 = vpack.c.bf16 %v890_v25, %v890_v25 }
 0x18d   : > { %v4910_v56 = vunpack.c.l.b16 %v1289_v57  ;;  %1241 = vperm.xlu1 %4123, %v4656_v11  }
 0x18e   : > { %v1769_v6 = vunpack.c.l.b16 %v1193_v55  ;;  %v1626_v7 = vunpack.c.l.b16 %v906_v33 }
 0x18f   : > { %4158 = vset.pattern.permute.xlu0 %v5692_v19 }
 0x190   : > { %v1784_v10 = vpack.c.b16 %v1769_v6, %v1768_v60  ;;  %1509 = vperm.xlu0 %4158, %v4638_v3   ;;  %v4919_v13 = vpop.f32.mrf.mxu0 }
 0x191   : > { %v1122_v24 = vpop.permute.xlu0 %1121  ;;  %v891_v30 = vmul.f32 %v4798_v58, %v4919_v13  ;;  %v987_v48 = vmul.f32 %v4873_v18, %v4919_v13  ;;  %v1083_v25 = vmul.f32 %v4892_v4, %v4919_v13 }
 0x192   : > { %v930_v37 = vpop.permute.xlu1 %929  ;;  %2771 = vmatmul.bf16.vlgmr.msrb.gmra.mxu0 %v1784_v10 }
 0x193   : > { %v986_v38 = vmul.f32 %v930_v37, %v4899_v49  ;;  %v907_v47 = vpack.c.bf16 %v891_v30, %v891_v30  ;;  %v1003_v50 = vpack.c.bf16 %v987_v48, %v987_v48  ;;  %v1099_v33 = vpack.c.bf16 %v1083_v25, %v1083_v25 }
 0x194   : > { %4126 = vset.pattern.permute.xlu2 %v4314_v32 }
 0x195   : > { %v1002_v52 = vpack.c.bf16 %v986_v38, %v986_v38  ;;  %4125 = vset.pattern.permute.xlu1 %v4314_v32  ;;  %965 = vperm.xlu2 %4126, %v4680_v20   ;;  %v938_v3 = vpop.permute.xlu2 %937  ;;  %v1627_v58 = vunpack.c.l.b16 %v907_v47  ;;  %v1675_v45 = vunpack.c.l.b16 %v1003_v50  ;;  %v5694_v47 = vmov 5  }
 0x196   : > { %961 = vperm.xlu1 %4125, %v4686_v21  }
 0x197   : > { %v1674_v18 = vunpack.c.l.b16 %v1002_v52  ;;  %v1641_v57 = vpack.c.b16 %v1627_v58, %v1626_v7  ;;  %v1723_v52 = vunpack.c.l.b16 %v1099_v33 }
 0x198   : > { %1513 = vperm.xlu0 %4158, %v4609_v54   ;;  %v4931_v55 = vpop.f32.mrf.mxu0 }
 0x199   : > { %2629 = vmatmul.bf16.gmra.mxu1 %v1641_v57  ;;  %v1689_v60 = vpack.c.b16 %v1675_v45, %v1674_v18  ;;  %v988_v10 = vmul.f32 %v938_v3, %v4931_v55  ;;  %v892_v54 = vmul.f32 %v4759_v39, %v4931_v55  ;;  %v1178_v45 = vmul.f32 %v1122_v24, %v4899_v49 }
 0x19b   : > { %2678 = vmatmul.bf16.gmra.mxu2 %v1689_v60  ;;  %v942_v6 = vpop.permute.xlu0 %941  ;;  %v1004_v38 = vpack.c.bf16 %v988_v10, %v988_v10  ;;  %v908_v7 = vpack.c.bf16 %v892_v54, %v892_v54 }
 0x19c   : > { %v1026_v30 = vpop.permute.xlu1 %1025 }
 0x19d   : > { %v1082_v48 = vmul.f32 %v1026_v30, %v4899_v49  ;;  %4129 = vset.pattern.permute.xlu2 %v4316_v35  ;;  %v1676_v60 = vunpack.c.l.b16 %v1004_v38  ;;  %v1628_v33 = vunpack.c.l.b16 %v908_v7 }
 0x19e   : > { %4128 = vset.pattern.permute.xlu1 %v4315_v34  ;;  %1153 = vperm.xlu2 %4129, %v4686_v21   ;;  %v1038_v4 = vpop.permute.xlu2 %1037 }
 0x19f   : > { %v1098_v37 = vpack.c.bf16 %v1082_v48, %v1082_v48  ;;  %1061 = vperm.xlu1 %4128, %v4680_v20  }
 0x1a0   : > { %4165 = vset.pattern.permute.xlu0 %v5694_v47  ;;  %v4944_v50 = vpop.f32.mrf.mxu0 }
 0x1a1   : > { %v1722_v3 = vunpack.c.l.b16 %v1098_v37  ;;  %1333 = vperm.xlu0 %4165, %v4662_v12   ;;  %v893_v39 = vmul.f32 %v4766_v41, %v4944_v50  ;;  %v989_v58 = vmul.f32 %v942_v6, %v4944_v50  ;;  %v1194_v12 = vpack.c.bf16 %v1178_v45, %v1178_v45 }
 0x1a3   : > { %v1737_v18 = vpack.c.b16 %v1723_v52, %v1722_v3  ;;  %v909_v57 = vpack.c.bf16 %v893_v39, %v893_v39  ;;  %v1005_v25 = vpack.c.bf16 %v989_v58, %v989_v58  ;;  %v4951_v10 = vpop.permute.xlu0 %953  ;;  %v1770_v52 = vunpack.c.l.b16 %v1194_v12 }
 0x1a4   : > { %v1274_v39 = vmul.f32 %v4906_v51, %v4899_v49  ;;  %v1085_v12 = vmul.f32 %v1038_v4, %v4944_v50 }
 0x1a5   : > { %v1126_v30 = vpop.permute.xlu1 %1125  ;;  %2727 = vmatmul.bf16.gmra.mxu3 %v1737_v18  ;;  %v1629_v48 = vunpack.c.l.b16 %v909_v57  ;;  %v1677_v37 = vunpack.c.l.b16 %v1005_v25 }
 0x1a6   : > { %v1179_v59 = vmul.f32 %v1126_v30, %v4919_v13  ;;  %4131 = vset.pattern.permute.xlu2 %v4317_v36  ;;  %v1290_v18 = vpack.c.bf16 %v1274_v39, %v1274_v39 }
 0x1a7   : > { %4130 = vset.pattern.permute.xlu1 %v4316_v35  ;;  %1249 = vperm.xlu2 %4131, %v4686_v21   ;;  %v1642_v41 = vpack.c.b16 %v1629_v48, %v1628_v33  ;;  %v1690_v24 = vpack.c.b16 %v1677_v37, %v1676_v60  ;;  %v1134_v54 = vpop.permute.xlu2 %1133 }
 0x1a8   : > { %v1195_v6 = vpack.c.bf16 %v1179_v59, %v1179_v59  ;;  %1157 = vperm.xlu1 %4130, %v4680_v20   ;;  %v4958_v38 = vpop.f32.mrf.mxu0  ;;  %v4978_v33 = vunpack.c.l.b16 %v1290_v18 }
 0x1a9   : > { %1337 = vperm.xlu0 %4165, %v4656_v11   ;;  %2634 = vmatmul.bf16.gmra.mxu1 %v1642_v41  ;;  %v894_v58 = vmul.f32 %v4819_v16, %v4958_v38  ;;  %v5724_v16 = vmov 6  }
 0x1aa   : > { %v1771_v3 = vunpack.c.l.b16 %v1195_v6 }
 0x1ab   : > { %2683 = vmatmul.bf16.gmra.mxu2 %v1690_v24  ;;  %v910_v30 = vpack.c.bf16 %v894_v58, %v894_v58 }
 0x1ac   : > { %v1785_v7 = vpack.c.b16 %v1771_v3, %v1770_v52  ;;  %v1046_v45 = vpop.permute.xlu0 %1045 }
 0x1ad   : > { %v1630_v41 = vunpack.c.l.b16 %v910_v30 }
 0x1ae   : > { %v1222_v59 = vpop.permute.xlu1 %1221  ;;  %2776 = vmatmul.bf16.gmra.mxu0 %v1785_v7 }
 0x1af   : > { %v1275_v57 = vmul.f32 %v1222_v59, %v4919_v13  ;;  %4134 = vset.pattern.permute.xlu2 %v4314_v32 }
 0x1b0   : > { %4133 = vset.pattern.permute.xlu1 %v4314_v32  ;;  %973 = vperm.xlu2 %4134, %v4710_v28   ;;  %v4969_v11 = vpop.permute.xlu2 %945  ;;  %v4971_v51 = vpop.f32.mrf.mxu0 }
 0x1b1   : > { %v1291_v25 = vpack.c.bf16 %v1275_v57, %v1275_v57  ;;  %969 = vperm.xlu1 %4133, %v4715_v29   ;;  %4172 = vset.pattern.permute.xlu0 %v5724_v16  ;;  %v895_v60 = vmul.f32 %v4817_v2, %v4971_v51  ;;  %v1181_v57 = vmul.f32 %v1134_v54, %v4944_v50 }
 0x1b2   : > { %1437 = vperm.xlu0 %4172, %v4691_v22   ;;  %v1101_v22 = vpack.c.bf16 %v1085_v12, %v1085_v12 }
 0x1b3   : > { %v4980_v48 = vunpack.c.l.b16 %v1291_v25  ;;  %v911_v37 = vpack.c.bf16 %v895_v60, %v895_v60 }
 0x1b4   : > { %v4985_v39 = vpop.permute.xlu0 %1057  ;;  %v1725_v18 = vunpack.c.l.b16 %v1101_v22  ;;  %v1087_v22 = vmul.f32 %v1046_v45, %v4971_v51 }
 0x1b5   : > { %v1631_v24 = vunpack.c.l.b16 %v911_v37  ;;  %v1197_v37 = vpack.c.bf16 %v1181_v57, %v1181_v57 }
 0x1b7   : > { %v1034_v52 = vpop.permute.xlu1 %1033  ;;  %v1643_v3 = vpack.c.b16 %v1631_v24, %v1630_v41 }
 0x1b8   : > { %v1084_v2 = vmul.f32 %v1034_v52, %v4931_v55  ;;  %4136 = vset.pattern.permute.xlu2 %v4315_v34 }
 0x1b9   : > { %4135 = vset.pattern.permute.xlu1 %v4315_v34  ;;  %1069 = vperm.xlu2 %4136, %v4710_v28   ;;  %v1042_v7 = vpop.permute.xlu2 %1041  ;;  %v4991_v4 = vpop.f32.mrf.mxu0 }
 0x1ba   : > { %v1100_v58 = vpack.c.bf16 %v1084_v2, %v1084_v2  ;;  %1065 = vperm.xlu1 %4135, %v4715_v29   ;;  %1441 = vperm.xlu0 %4172, %v4686_v21   ;;  %v896_v60 = vmul.f32 %v4771_v42, %v4991_v4  ;;  %v1086_v21 = vmul.f32 %v1042_v7, %v4958_v38  ;;  %v1773_v7 = vunpack.c.l.b16 %v1197_v37 }
 0x1bb   : > { %2639 = vmatmul.bf16.gmra.mxu1 %v1643_v3 }
 0x1bc   : > { %v1724_v59 = vunpack.c.l.b16 %v1100_v58  ;;  %v912_v24 = vpack.c.bf16 %v896_v60, %v896_v60 }
 0x1bd   : > { %v1226_v52 = vpop.permute.xlu0 %1225 }
 0x1be   : > { %v1738_v25 = vpack.c.b16 %v1725_v18, %v1724_v59  ;;  %v1102_v59 = vpack.c.bf16 %v1086_v21, %v1086_v21  ;;  %v1276_v18 = vmul.f32 %v1226_v52, %v4931_v55  ;;  %v1632_v57 = vunpack.c.l.b16 %v912_v24  ;;  %v3892_v24 = vld [vmem:[%s4441_s30 + $0x138] sm:$0xff] }
 0x1bf   : > { %2812 = vmatpush.bf16.msrb.mxu1 %v3892_v24 }
 0x1c0   : > { %v1130_v30 = vpop.permute.xlu1 %1129  ;;  %2732 = vmatmul.bf16.gmra.mxu3 %v1738_v25 }
 0x1c1   : > { %v1180_v12 = vmul.f32 %v1130_v30, %v4931_v55  ;;  %4138 = vset.pattern.permute.xlu2 %v4317_v36  ;;  %v5000_v41 = vpop.f32.mrf.mxu0  ;;  %v1103_v30 = vpack.c.bf16 %v1087_v22, %v1087_v22  ;;  %v3891_v22 = vld [vmem:[%s4441_s30 + $0x130] sm:$0xff] }
 0x1c2   : > { %4137 = vset.pattern.permute.xlu1 %v4316_v35  ;;  %4179 = vset.pattern.permute.xlu0 %v5692_v19  ;;  %v5005_v54 = vpop.permute.xlu2 %1141  ;;  %v897_v42 = vmul.f32 %v4838_v44, %v5000_v41  ;;  %v1726_v19 = vunpack.c.l.b16 %v1102_v59 }
 0x1c3   : > { %v1196_v3 = vpack.c.bf16 %v1180_v12, %v1180_v12  ;;  %1257 = vperm.xlu2 %4138, %v4715_v29   ;;  %1165 = vperm.xlu1 %4137, %v4710_v28   ;;  %v1727_v21 = vunpack.c.l.b16 %v1103_v30 }
 0x1c4   : > { %1541 = vperm.xlu0 %4179, %v4680_v20   ;;  %v913_v2 = vpack.c.bf16 %v897_v42, %v897_v42  ;;  %v1292_v20 = vpack.c.bf16 %v1276_v18, %v1276_v18  ;;  %2813 = vmatpush.bf16.msrb.mxu1 %v3891_v22  ;;  %v3888_v22 = vld [vmem:[%s4441_s30 + $0x118] sm:$0xff] }
 0x1c5   : > { %v1772_v58 = vunpack.c.l.b16 %v1196_v3  ;;  %v5055_v24 = vpop.permute.xlu0 %1253 }
 0x1c6   : > { %v1633_v25 = vunpack.c.l.b16 %v913_v2  ;;  %v5025_v52 = vunpack.c.l.b16 %v1292_v20  ;;  %v1183_v20 = vmul.f32 %v5005_v54, %v4971_v51 }
 0x1c7   : > { %v1786_v44 = vpack.c.b16 %v1773_v7, %v1772_v58 }
 0x1c8   : > { %v1644_v60 = vpack.c.b16 %v1633_v25, %v1632_v57  ;;  %v3890_v25 = vld [vmem:[%s4441_s30 + $0x128] sm:$0xff] }
 0x1c9   : > { %v1230_v12 = vpop.permute.xlu1 %1229  ;;  %2781 = vmatmul.bf16.gmra.mxu0 %v1786_v44  ;;  %v5014_v6 = vpop.f32.mrf.mxu0  ;;  %2814 = vmatpush.bf16.msrb.mxu1 %v3890_v25 }
 0x1ca   : > { %v1277_v42 = vmul.f32 %v1230_v12, %v4944_v50  ;;  %v898_v2 = vmul.f32 %v4836_v43, %v5014_v6 }
 0x1cb   : > { %4140 = vset.pattern.permute.xlu2 %v4314_v32  ;;  %4139 = vset.pattern.permute.xlu1 %v4317_v36  ;;  %v5019_v45 = vpop.permute.xlu2 %1237  ;;  %v1739_v32 = vpack.c.b16 %v1727_v21, %v1726_v19 }
 0x1cc   : > { %v1293_v37 = vpack.c.bf16 %v1277_v42, %v1277_v42  ;;  %1545 = vperm.xlu0 %4179, %v4715_v29   ;;  %2644 = vmatmul.bf16.gmra.mxu1 %v1644_v60  ;;  %v990_v29 = vmul.f32 %v4969_v11, %v4958_v38  ;;  %v914_v19 = vpack.c.bf16 %v898_v2, %v898_v2 }
 0x1cd   : > { %977 = vperm.xlu2 %4140, %v4704_v27   ;;  %1261 = vperm.xlu1 %4139, %v4710_v28   ;;  %v1199_v2 = vpack.c.bf16 %v1183_v20, %v1183_v20  ;;  %v1279_v25 = vmul.f32 %v5019_v45, %v4971_v51 }
 0x1ce   : > { %v5027_v3 = vunpack.c.l.b16 %v1293_v37  ;;  %v1006_v18 = vpack.c.bf16 %v990_v29, %v990_v29  ;;  %v3889_v37 = vld [vmem:[%s4441_s30 + $0x120] sm:$0xff]  ;;  %v1150_v20 = vpop.permute.xlu0 %1149 }
 0x1cf   : > { %2815 = vmatpush.bf16.msrb.mxu1 %v3889_v37 }
 0x1d0   : > { %2737 = vmatmul.bf16.gmra.mxu3 %v1739_v32  ;;  %v1678_v30 = vunpack.c.l.b16 %v1006_v18  ;;  %v1775_v18 = vunpack.c.l.b16 %v1199_v2 }
 0x1d1   : > { %v5036_v58 = vpop.f32.mrf.mxu0 }
 0x1d2   : > { %v950_v28 = vpop.permute.xlu1 %949  ;;  %v899_v59 = vmul.f32 %v4780_v46, %v5036_v58  ;;  %v1634_v46 = vunpack.c.l.b16 %v914_v19  ;;  %v5726_v19 = vmov 7  }
 0x1d3   : > { %v991_v43 = vmul.f32 %v950_v28, %v4971_v51  ;;  %2816 = vmatpush.bf16.msrb.mxu1 %v3888_v22 }
 0x1d4   : > { %4186 = vset.pattern.permute.xlu0 %v5694_v47  ;;  %v5042_v57 = vpop.permute.xlu2 %1049  ;;  %v915_v11 = vpack.c.bf16 %v899_v59, %v899_v59 }
 0x1d5   : > { %v1007_v44 = vpack.c.bf16 %v991_v43, %v991_v43  ;;  %4143 = vset.pattern.permute.xlu2 %v4315_v34  ;;  %4142 = vset.pattern.permute.xlu1 %v4315_v34 }
 0x1d6   : > { %1365 = vperm.xlu0 %4186, %v4723_v31   ;;  %1077 = vperm.xlu2 %4143, %v4723_v31   ;;  %v1635_v60 = vunpack.c.l.b16 %v915_v11  ;;  %v3887_v11 = vld [vmem:[%s4441_s30 + $0x110] sm:$0xff] }
 0x1d7   : > { %v1679_v12 = vunpack.c.l.b16 %v1007_v44  ;;  %1073 = vperm.xlu1 %4142, %v4704_v27   ;;  %2817 = vmatpush.bf16.msrb.mxu1 %v3887_v11  ;;  %v3900_v11 = vld [vmem:[%s4441_s30 + $0x178] sm:$0xff] }
 0x1d8   : > { %v1645_v42 = vpack.c.b16 %v1635_v60, %v1634_v46  ;;  %2861 = vmatpush.bf16.msrb.mxu2 %v3900_v11  ;;  %v3899_v11 = vld [vmem:[%s4441_s30 + $0x170] sm:$0xff] }
 0x1d9   : > { %v5053_v21 = vpop.f32.mrf.mxu0  ;;  %v1691_v34 = vpack.c.b16 %v1679_v12, %v1678_v30  ;;  %v1295_v12 = vpack.c.bf16 %v1279_v25, %v1279_v25 }
 0x1da   : > { %5725 = vst [vmem:[#allocation21_spill] sm:$0xff] %v5053_v21  ;;  %v900_v54 = vmul.f32 %v4856_v1, %v5053_v21 }
 0x1db   : > { %v1138_v32 = vpop.permute.xlu1 %1137  ;;  %2688 = vmatmul.bf16.gmra.mxu2 %v1691_v34 }
 0x1dc   : > { %v1182_v29 = vmul.f32 %v1138_v32, %v4958_v38  ;;  %2649 = vmatmul.bf16.gmra.mxu1 %v1645_v42  ;;  %v916_v60 = vpack.c.bf16 %v900_v54, %v900_v54  ;;  %v3886_v42 = vld [vmem:[%s4441_s30 + $0x108] sm:$0xff]  ;;  %2862 = vmatpush.bf16.msrb.mxu2 %v3899_v11  ;;  %v3897_v11 = vld [vmem:[%s4441_s30 + $0x160] sm:$0xff] }
 0x1dd   : > { %v1146_v28 = vpop.permute.xlu2 %1145  ;;  %2818 = vmatpush.bf16.msrb.mxu1 %v3886_v42 }
 0x1de   : > { %v1198_v59 = vpack.c.bf16 %v1182_v29, %v1182_v29  ;;  %4145 = vset.pattern.permute.xlu2 %v4316_v35  ;;  %4191 = vset.pattern.permute.xlu0 %v5726_v19  ;;  %v1184_v37 = vmul.f32 %v1146_v28, %v4991_v4  ;;  %v1636_v45 = vunpack.c.l.b16 %v916_v60  ;;  %v4193_v29 = vld [vmem:[%s5679_s1] sm:$0xff] }
 0x1df   : > { %4144 = vset.pattern.permute.xlu1 %v4316_v35  ;;  %1173 = vperm.xlu2 %4145, %v4723_v31  }
 0x1e0   : > { %v1774_v43 = vunpack.c.l.b16 %v1198_v59  ;;  %1169 = vperm.xlu1 %4144, %v4704_v27   ;;  %v5082_v59 = vunpack.c.l.b16 %v1295_v12 }
 0x1e1   : > { %v5069_v44 = vpop.f32.mrf.mxu0 }
 0x1e2   : > { %5727 = vst [vmem:[#allocation22_spill] sm:$0xff] %v5069_v44  ;;  %v1787_v46 = vpack.c.b16 %v1775_v18, %v1774_v43  ;;  %v901_v1 = vmul.f32 %v4854_v0, %v5069_v44  ;;  %v1185_v0 = vmul.f32 %v1150_v20, %v5000_v41  ;;  %v992_v18 = vmul.f32 %v4951_v10, %v4991_v4  ;;  %v3885_v43 = vld [vmem:[%s4441_s30 + $0x100] sm:$0xff] }
 0x1e3   : > { %2819 = vmatpush.bf16.msrb.mxu1 %v3885_v43 }
 0x1e4   : > { %v1234_v35 = vpop.permute.xlu1 %1233  ;;  %2786 = vmatmul.bf16.gmra.mxu0 %v1787_v46  ;;  %v917_v30 = vpack.c.bf16 %v901_v1, %v901_v1  ;;  %v1201_v25 = vpack.c.bf16 %v1185_v0, %v1185_v0  ;;  %v1008_v1 = vpack.c.bf16 %v992_v18, %v992_v18 }
 0x1e5   : > { %v1278_v27 = vmul.f32 %v1234_v35, %v4958_v38 }
 0x1e6   : > { %v1246_v34 = vpop.permute.xlu2 %1245  ;;  %v1637_v32 = vunpack.c.l.b16 %v917_v30  ;;  %v1777_v12 = vunpack.c.l.b16 %v1201_v25 }
 0x1e7   : > { %v1294_v2 = vpack.c.bf16 %v1278_v27, %v1278_v27  ;;  %4148 = vset.pattern.permute.xlu2 %v5694_v47  ;;  %v1680_v27 = vunpack.c.l.b16 %v1008_v1 }
 0x1e8   : > { %4147 = vset.pattern.permute.xlu1 %v4317_v36  ;;  %1305 = vperm.xlu2 %4148, %v4193_v29   ;;  %v1646_v22 = vpack.c.b16 %v1637_v32, %v1636_v45  ;;  %v1200_v36 = vpack.c.bf16 %v1184_v37, %v1184_v37  ;;  %v4194_v45 = vld [vmem:[%s5679_s1 + $0x8] sm:$0xff] }
 0x1e9   : > { %v5084_v28 = vunpack.c.l.b16 %v1294_v2  ;;  %1269 = vperm.xlu1 %4147, %v4723_v31   ;;  %v5087_v54 = vpop.f32.mrf.mxu0  ;;  %v1088_v2 = vmul.f32 %v5042_v57, %v4991_v4 }
 0x1ea   : > { %5728 = vst [vmem:[#allocation23_spill] sm:$0xff] %v5087_v54  ;;  %v1776_v60 = vunpack.c.l.b16 %v1200_v36  ;;  %v902_v31 = vmul.f32 %v4804_v62, %v5087_v54 }
 0x1eb   : > { %v1104_v25 = vpack.c.bf16 %v1088_v2, %v1088_v2 }
 0x1ec   : > { %2654 = vmatmul.bf16.gmra.mxu1 %v1646_v22  ;;  %v1788_v42 = vpack.c.b16 %v1777_v12, %v1776_v60  ;;  %v918_v32 = vpack.c.bf16 %v902_v31, %v902_v31  ;;  %v1281_v31 = vmul.f32 %v1246_v34, %v5000_v41  ;;  %v4195_v34 = vld [vmem:[%s5679_s1 + $0x18] sm:$0xff] }
 0x1ed   : > { %v958_v46 = vpop.permute.xlu1 %957 }
 0x1ee   : > { %v993_v35 = vmul.f32 %v958_v46, %v5000_v41  ;;  %v1638_v43 = vunpack.c.l.b16 %v918_v32 }
 0x1ef   : > { %v966_v30 = vpop.permute.xlu2 %965 }
 0x1f0   : > { %v1009_v10 = vpack.c.bf16 %v993_v35, %v993_v35  ;;  %4150 = vset.pattern.permute.xlu2 %v5724_v16 }
 0x1f1   : > { %4149 = vset.pattern.permute.xlu1 %v5694_v47  ;;  %1401 = vperm.xlu2 %4150, %v4193_v29   ;;  %v5099_v20 = vpop.f32.mrf.mxu0 }
 0x1f2   : > { %5729 = vst [vmem:[#allocation24_spill] sm:$0xff] %v5099_v20  ;;  %v1681_v37 = vunpack.c.l.b16 %v1009_v10  ;;  %1309 = vperm.xlu1 %4149, %v4194_v45   ;;  %v903_v62 = vmul.f32 %v4864_v9, %v5099_v20  ;;  %v1728_v9 = vunpack.c.l.b16 %v1104_v25  ;;  %v1283_v10 = vmul.f32 %v5055_v24, %v5036_v58 }
 0x1f4   : > { %2791 = vmatmul.bf16.gmra.mxu0 %v1788_v42  ;;  %v1692_v0 = vpack.c.b16 %v1681_v37, %v1680_v27  ;;  %v919_v22 = vpack.c.bf16 %v903_v62, %v903_v62  ;;  %v1297_v42 = vpack.c.bf16 %v1281_v31, %v1281_v31  ;;  %v1299_v2 = vpack.c.bf16 %v1283_v10, %v1283_v10 }
 0x1f6   : > { %v1054_v18 = vpop.permute.xlu1 %1053  ;;  %2693 = vmatmul.bf16.gmra.mxu2 %v1692_v0  ;;  %v1639_v36 = vunpack.c.l.b16 %v919_v22  ;;  %v5123_v24 = vunpack.c.l.b16 %v1297_v42  ;;  %v4196_v22 = vld [vmem:[%s5679_s1 + $0x10] sm:$0xff]  ;;  %v5135_v25 = vunpack.c.l.b16 %v1299_v2  ;;  %v5730_v42 = vpack.c.b16 %v4910_v56, %v4908_v53 }
 0x1f7   : > { %v1089_v46 = vmul.f32 %v1054_v18, %v5000_v41  ;;  %v995_v18 = vmul.f32 %v966_v30, %v5036_v58 }
 0x1f8   : > { %v5109_v1 = vpop.permute.xlu2 %1153  ;;  %v1647_v60 = vpack.c.b16 %v1639_v36, %v1638_v43 }
 0x1f9   : > { %v1105_v35 = vpack.c.bf16 %v1089_v46, %v1089_v46  ;;  %4153 = vset.pattern.permute.xlu2 %v5726_v19 }
 0x1fa   : > { %4152 = vset.pattern.permute.xlu1 %v5726_v19  ;;  %1501 = vperm.xlu2 %4153, %v4194_v45  }
 0x1fb   : > { %v1729_v57 = vunpack.c.l.b16 %v1105_v35  ;;  %1497 = vperm.xlu1 %4152, %v4193_v29  }
 0x1fc   : > { %2659 = vmatmul.bf16.gmra.mxu1 %v1647_v60  ;;  %v3907_v60 = vld [vmem:[%s4441_s30 + $0x1b0] sm:$0xff] }
 0x1fd   : > { %v1740_v12 = vpack.c.b16 %v1729_v57, %v1728_v9  ;;  %v1011_v9 = vpack.c.bf16 %v995_v18, %v995_v18 }
 0x1ff   : > { %v1242_v27 = vpop.permute.xlu1 %1241  ;;  %2742 = vmatmul.bf16.gmra.mxu3 %v1740_v12  ;;  %v1683_v10 = vunpack.c.l.b16 %v1011_v9 }
 0x200   : > { %v1280_v37 = vmul.f32 %v1242_v27, %v4991_v4 }
 0x201   : > { %v1250_v62 = vpop.permute.xlu2 %1249 }
 0x202   : > { %v1296_v32 = vpack.c.bf16 %v1280_v37, %v1280_v37  ;;  %4155 = vset.pattern.permute.xlu2 %v5694_v47  ;;  %v1282_v45 = vmul.f32 %v1250_v62, %v5014_v6 }
 0x203   : > { %4154 = vset.pattern.permute.xlu1 %v5694_v47  ;;  %1317 = vperm.xlu2 %4155, %v4195_v34  }
 0x204   : > { %v5125_v29 = vunpack.c.l.b16 %v1296_v32  ;;  %v1298_v0 = vpack.c.bf16 %v1282_v45, %v1282_v45  ;;  %1313 = vperm.xlu1 %4154, %v4196_v22   ;;  %v1090_v45 = vmul.f32 %v4985_v39, %v5014_v6  ;;  %v4197_v39 = vld [vmem:[%s5679_s1 + $0x28] sm:$0xff] }
 0x206   : > { %v5133_v36 = vunpack.c.l.b16 %v1298_v0  ;;  %v2625_v46 = vpop.f32.mrf.mxu1  ;;  %v1106_v9 = vpack.c.bf16 %v1090_v45, %v1090_v45 }
 0x208   : > { %v962_v35 = vpop.permute.xlu1 %961 }
 0x209   : > { %v994_v57 = vmul.f32 %v962_v35, %v5014_v6 }
 0x20a   : > { %v974_v31 = vpop.permute.xlu2 %973 }
 0x20b   : > { %v1010_v12 = vpack.c.bf16 %v994_v57, %v994_v57  ;;  %4157 = vset.pattern.permute.xlu2 %v5726_v19 }
 0x20c   : > { %4156 = vset.pattern.permute.xlu1 %v5724_v16  ;;  %1505 = vperm.xlu2 %4157, %v4196_v22   ;;  %v2674_v30 = vpop.f32.mrf.mxu2 }
 0x20d   : > { %v1682_v27 = vunpack.c.l.b16 %v1010_v12  ;;  %1413 = vperm.xlu1 %4156, %v4195_v34   ;;  %2820 = vmatmul.bf16.vlgmr.msrb.gmra.mxu1 %v5730_v42  ;;  %v2675_v37 = vadd.f32 %v2674_v30, %v2625_v46  ;;  %v2723_v62 = vpop.f32.mrf.mxu3  ;;  %v4198_v12 = vld [vmem:[%s5679_s1 + $0x20] sm:$0xff] }
 0x20e   : > { %v5145_v32 = vpop.f32.mrf.mxu1 }
 0x20f   : > { %v2724_v2 = vadd.f32 %v2723_v62, %v2675_v37  ;;  %v1693_v0 = vpack.c.b16 %v1683_v10, %v1682_v27  ;;  %v2772_v18 = vpop.f32.mrf.mxu0  ;;  %v1730_v10 = vunpack.c.l.b16 %v1106_v9  ;;  %v1186_v27 = vmul.f32 %v5109_v1, %v5014_v6 }
 0x211   : > { %v5149_v35 = vadd.f32 %v2772_v18, %v2724_v2  ;;  %v1062_v22 = vpop.permute.xlu1 %1061  ;;  %2698 = vmatmul.bf16.gmra.mxu2 %v1693_v0  ;;  %v1202_v62 = vpack.c.bf16 %v1186_v27, %v1186_v27  ;;  %v5731_v0 = vpack.c.b16 %v4980_v48, %v4978_v33  ;;  %v3908_v48 = vld [vmem:[%s4441_s30 + $0x1b8] sm:$0xff] }
 0x212   : > { %v1091_v34 = vmul.f32 %v1062_v22, %v5036_v58  ;;  %2910 = vmatpush.bf16.msrb.mxu3 %v3908_v48  ;;  %v3906_v48 = vld [vmem:[%s4441_s30 + $0x1a8] sm:$0xff] }
 0x213   : > { %v1070_v57 = vpop.permute.xlu2 %1069 }
 0x214   : > { %v1107_v53 = vpack.c.bf16 %v1091_v34, %v1091_v34  ;;  %4160 = vset.pattern.permute.xlu2 %v5694_v47  ;;  %v5153_v56 = vpop.f32.mrf.mxu2  ;;  %v1778_v34 = vunpack.c.l.b16 %v1202_v62 }
 0x215   : > { %4159 = vset.pattern.permute.xlu1 %v5694_v47  ;;  %1325 = vperm.xlu2 %4160, %v4197_v39  }
 0x216   : > { %v1731_v46 = vunpack.c.l.b16 %v1107_v53  ;;  %1321 = vperm.xlu1 %4159, %v4198_v12   ;;  %v2630_v30 = vpop.f32.mrf.mxu1  ;;  %2911 = vmatpush.bf16.msrb.mxu3 %v3907_v60 }
 0x217   : > { %v5178_v27 = vpop.f32.mrf.mxu0 }
 0x218   : > { %v1741_v42 = vpack.c.b16 %v1731_v46, %v1730_v10  ;;  %v997_v46 = vmul.f32 %v974_v31, %v5069_v44  ;;  %v5175_v10 = vpop.f32.mrf.mxu3 }
 0x21a   : > { %v1158_v37 = vpop.permute.xlu1 %1157  ;;  %2747 = vmatmul.bf16.gmra.mxu3 %v1741_v42 }
 0x21b   : > { %v1187_v45 = vmul.f32 %v1158_v37, %v5036_v58  ;;  %v1013_v37 = vpack.c.bf16 %v997_v46, %v997_v46  ;;  %v1093_v46 = vmul.f32 %v1070_v57, %v5069_v44  ;;  %2912 = vmatpush.bf16.msrb.mxu3 %v3906_v48  ;;  %v3904_v48 = vld [vmem:[%s4441_s30 + $0x198] sm:$0xff] }
 0x21d   : > { %v1203_v2 = vpack.c.bf16 %v1187_v45, %v1187_v45  ;;  %2825 = vmatmul.bf16.gmra.mxu1 %v5731_v0  ;;  %4162 = vset.pattern.permute.xlu2 %v5724_v16  ;;  %v5169_v18 = vpop.permute.xlu2 %1257  ;;  %v1162_v0 = vpop.permute.xlu0 %1161  ;;  %v1109_v7 = vpack.c.bf16 %v1093_v46, %v1093_v46 }
 0x21e   : > { %4161 = vset.pattern.permute.xlu1 %v5724_v16  ;;  %1421 = vperm.xlu2 %4162, %v4197_v39   ;;  %v2679_v1 = vpop.f32.mrf.mxu2  ;;  %v5172_v22 = vpop.f32.mrf.mxu1 }
 0x21f   : > { %v1779_v9 = vunpack.c.l.b16 %v1203_v2  ;;  %1417 = vperm.xlu1 %4161, %v4198_v12   ;;  %v2680_v53 = vadd.f32 %v2679_v1, %v2630_v30  ;;  %v5189_v30 = vld [vmem:[%s5679_s1 + $0x30] sm:$0xff]  ;;  %v1685_v1 = vunpack.c.l.b16 %v1013_v37  ;;  %v5732_v37 = vpack.c.b16 %v5027_v3, %v5025_v52 }
 0x221   : > { %v1789_v33 = vpack.c.b16 %v1779_v9, %v1778_v34 }
 0x223   : > { %v970_v42 = vpop.permute.xlu1 %969  ;;  %2796 = vmatmul.bf16.gmra.mxu0 %v1789_v33 }
 0x224   : > { %v996_v45 = vmul.f32 %v970_v42, %v5053_v21 }
 0x226   : > { %v1012_v62 = vpack.c.bf16 %v996_v45, %v996_v45  ;;  %4164 = vset.pattern.permute.xlu2 %v5694_v47  ;;  %v5183_v12 = vpop.f32.mrf.mxu2  ;;  %v2635_v31 = vpop.f32.mrf.mxu1 }
 0x227   : > { %4163 = vset.pattern.permute.xlu1 %v5726_v19  ;;  %1329 = vperm.xlu2 %4164, %v5189_v30   ;;  %v978_v2 = vpop.permute.xlu2 %977 }
 0x228   : > { %v1684_v34 = vunpack.c.l.b16 %v1012_v62  ;;  %1517 = vperm.xlu1 %4163, %v4197_v39   ;;  %v2728_v9 = vpop.f32.mrf.mxu3  ;;  %v3905_v39 = vld [vmem:[%s4441_s30 + $0x1a0] sm:$0xff]  ;;  %v998_v57 = vmul.f32 %v978_v2, %v5087_v54  ;;  %v1733_v2 = vunpack.c.l.b16 %v1109_v7 }
 0x229   : > { %v2729_v33 = vadd.f32 %v2728_v9, %v2680_v53  ;;  %2913 = vmatpush.bf16.msrb.mxu3 %v3905_v39  ;;  %v3903_v39 = vld [vmem:[%s4441_s30 + $0x190] sm:$0xff] }
 0x22a   : > { %v1694_v42 = vpack.c.b16 %v1685_v1, %v1684_v34  ;;  %v982_v1 = vpop.permute.xlu0 %981 }
 0x22b   : > { %v2777_v45 = vpop.f32.mrf.mxu0  ;;  %v999_v3 = vmul.f32 %v982_v1, %v5099_v20 }
 0x22c   : > { %v5194_v43 = vadd.f32 %v2777_v45, %v2729_v33  ;;  %v1066_v47 = vpop.permute.xlu1 %1065  ;;  %2703 = vmatmul.bf16.gmra.mxu2 %v1694_v42  ;;  %v1188_v33 = vmul.f32 %v1162_v0, %v5053_v21 }
 0x22d   : > { %2830 = vmatmul.bf16.gmra.mxu1 %v5732_v37  ;;  %v1092_v60 = vmul.f32 %v1066_v47, %v5053_v21  ;;  %v4200_v47 = vld [vmem:[%s5679_s1 + $0x38] sm:$0xff]  ;;  %v1015_v45 = vpack.c.bf16 %v999_v3, %v999_v3  ;;  %v3898_v37 = vld [vmem:[%s4441_s30 + $0x168] sm:$0xff]  ;;  %2914 = vmatpush.bf16.msrb.mxu3 %v3904_v48 }
 0x22e   : > { %v2684_v53 = vpop.f32.mrf.mxu2  ;;  %v5203_v62 = vpop.f32.mrf.mxu1  ;;  %2863 = vmatpush.bf16.msrb.mxu2 %v3898_v37 }
 0x22f   : > { %v1108_v34 = vpack.c.bf16 %v1092_v60, %v1092_v60  ;;  %4167 = vset.pattern.permute.xlu2 %v5724_v16  ;;  %v5206_v9 = vadd.f32 %v2684_v53, %v2635_v31  ;;  %v1014_v31 = vpack.c.bf16 %v998_v57, %v998_v57  ;;  %v3916_v53 = vld [vmem:[%s4441_s30 + $0x1f8] sm:$0xff]  ;;  %v1687_v3 = vunpack.c.l.b16 %v1015_v45 }
 0x230   : > { %4166 = vset.pattern.permute.xlu1 %v5724_v16  ;;  %1429 = vperm.xlu2 %4167, %v4200_v47   ;;  %v5212_v52 = vpop.permute.xlu2 %1077  ;;  %v5233_v37 = vpop.f32.mrf.mxu3 }
 0x231   : > { %v1732_v46 = vunpack.c.l.b16 %v1108_v34  ;;  %1425 = vperm.xlu1 %4166, %v5189_v30   ;;  %v1686_v1 = vunpack.c.l.b16 %v1014_v31  ;;  %v1204_v34 = vpack.c.bf16 %v1188_v33, %v1188_v33  ;;  %2959 = vmatpush.bf16.msra.mxu0 %v3916_v53  ;;  %v3914_v53 = vld [vmem:[%s4441_s30 + $0x1e8] sm:$0xff] }
 0x232   : > { %2915 = vmatpush.bf16.msrb.mxu3 %v3903_v39  ;;  %2864 = vmatpush.bf16.msrb.mxu2 %v3897_v11  ;;  %v3895_v39 = vld [vmem:[%s4441_s30 + $0x150] sm:$0xff]  ;;  %v4202_v11 = vld [vmem:[%s5679_s1 + $0x48] sm:$0xff] }
 0x233   : > { %v1742_v42 = vpack.c.b16 %v1733_v2, %v1732_v46  ;;  %v3915_v46 = vld [vmem:[%s4441_s30 + $0x1f0] sm:$0xff]  ;;  %v1780_v31 = vunpack.c.l.b16 %v1204_v34  ;;  %v1695_v48 = vpack.c.b16 %v1687_v3, %v1686_v1  ;;  %v3901_v1 = vld [vmem:[%s4441_s30 + $0x180] sm:$0xff] }
 0x235   : > { %v1166_v60 = vpop.permute.xlu1 %1165  ;;  %2752 = vmatmul.bf16.gmra.mxu3 %v1742_v42  ;;  %v3902_v42 = vld [vmem:[%s4441_s30 + $0x188] sm:$0xff]  ;;  %2960 = vmatpush.bf16.msra.mxu0 %v3915_v46 }
 0x236   : > { %v1189_v7 = vmul.f32 %v1166_v60, %v5069_v44  ;;  %v5733_v60 = vpack.c.b16 %v5082_v59, %v5084_v28  ;;  %2916 = vmatpush.bf16.msrb.mxu3 %v3902_v42  ;;  %v5734_v59 = vmov 5   ;;  %v4201_v28 = vld [vmem:[%s5679_s1 + $0x40] sm:$0xff]  ;;  %v1095_v42 = vmul.f32 %v5212_v52, %v5099_v20 }
 0x238   : > { %v1205_v0 = vpack.c.bf16 %v1189_v7, %v1189_v7  ;;  %4169 = vset.pattern.permute.xlu2 %v5726_v19  ;;  %v5224_v57 = vpop.f32.mrf.mxu1  ;;  %v5240_v7 = vpop.f32.mrf.mxu0 }
 0x239   : > { %4168 = vset.pattern.permute.xlu1 %v5726_v19  ;;  %1525 = vperm.xlu2 %4169, %v4200_v47   ;;  %v5228_v2 = vpop.permute.xlu2 %1173  ;;  %v3896_v47 = vld [vmem:[%s4441_s30 + $0x158] sm:$0xff] }
 0x23a   : > { %v1781_v33 = vunpack.c.l.b16 %v1205_v0  ;;  %1521 = vperm.xlu1 %4168, %v5189_v30   ;;  %2865 = vmatpush.bf16.msrb.mxu2 %v3896_v47  ;;  %v3913_v0 = vld [vmem:[%s4441_s30 + $0x1e0] sm:$0xff] }
 0x23b   : > { %2961 = vmatpush.bf16.msra.mxu0 %v3914_v53  ;;  %2917 = vmatpush.bf16.msrb.mxu3 %v3901_v1  ;;  %v3893_v53 = vld [vmem:[%s4441_s30 + $0x140] sm:$0xff] }
 0x23c   : > { %v1790_v45 = vpack.c.b16 %v1781_v33, %v1780_v31  ;;  %2708 = vmatmul.bf16.gmra.mxu2 %v1695_v48  ;;  %v3894_v33 = vld [vmem:[%s4441_s30 + $0x148] sm:$0xff]  ;;  %v3912_v48 = vld [vmem:[%s4441_s30 + $0x1d8] sm:$0xff] }
 0x23d   : > { %2835 = vmatmul.bf16.gmra.mxu1 %v5733_v60  ;;  %v5266_v60 = vpop.permute.xlu0 %1265 }
 0x23e   : > { %2801 = vmatmul.bf16.gmra.mxu0 %v1790_v45  ;;  %2866 = vmatpush.bf16.msrb.mxu2 %v3895_v39  ;;  %v1111_v39 = vpack.c.bf16 %v1095_v42, %v1095_v42 }
 0x23f   : > { %v5242_v30 = vpop.permute.xlu1 %1261  ;;  %2962 = vmatpush.bf16.msra.mxu0 %v3913_v0 }
 0x240   : > { %v5245_v34 = vpop.f32.mrf.mxu1  ;;  %v1735_v42 = vunpack.c.l.b16 %v1111_v39 }
 0x241   : > { %4171 = vset.pattern.permute.xlu2 %v5724_v16 }
 0x242   : > { %4170 = vset.pattern.permute.xlu1 %v5734_v59  ;;  %1433 = vperm.xlu2 %4171, %v4201_v28   ;;  %v5254_v3 = vpop.permute.xlu2 %1305 }
 0x243   : > { %1341 = vperm.xlu1 %4170, %v4202_v11   ;;  %v2733_v46 = vpop.f32.mrf.mxu3  ;;  %2867 = vmatpush.bf16.msrb.mxu2 %v3894_v33  ;;  %v5735_v33 = vpack.c.b16 %v5123_v24, %v5125_v29 }
 0x244   : > { %v2734_v31 = vadd.f32 %v2733_v46, %v5206_v9  ;;  %2963 = vmatpush.bf16.msra.mxu0 %v3912_v48  ;;  %v3911_v9 = vld [vmem:[%s4441_s30 + $0x1d0] sm:$0xff]  ;;  %v3910_v48 = vld [vmem:[%s4441_s30 + $0x1c8] sm:$0xff] }
 0x245   : > { %v1406_v24 = vpop.permute.xlu0 %1405 }
 0x246   : > { %v2782_v45 = vpop.f32.mrf.mxu0 }
 0x247   : > { %v5264_v47 = vadd.f32 %v2782_v45, %v2734_v31  ;;  %2868 = vmatpush.bf16.msrb.mxu2 %v3893_v53  ;;  %v3924_v31 = vld [vmem:[%s4441_s30 + $0x238] sm:$0xff] }
 0x248   : > { %2964 = vmatpush.bf16.msra.mxu0 %v3911_v9  ;;  %3008 = vmatpush.bf16.msra.mxu1 %v3924_v31  ;;  %v4204_v31 = vld [vmem:[%s5679_s1 + $0x50] sm:$0xff] }
 0x249   : > { %v1074_v1 = vpop.permute.xlu1 %1073  ;;  %v5269_v61 = vpop.f32.mrf.mxu1 }
 0x24a   : > { %v1094_v0 = vmul.f32 %v1074_v1, %v5087_v54  ;;  %4174 = vset.pattern.permute.xlu2 %v5726_v19  ;;  %v1191_v1 = vmul.f32 %v5228_v2, %v5099_v20  ;;  %v4203_v2 = vld [vmem:[%s5679_s1 + $0x58] sm:$0xff] }
 0x24b   : > { %4173 = vset.pattern.permute.xlu1 %v5726_v19  ;;  %1533 = vperm.xlu2 %4174, %v4202_v11   ;;  %v1402_v52 = vpop.permute.xlu2 %1401  ;;  %v3923_v11 = vld [vmem:[%s4441_s30 + $0x230] sm:$0xff] }
 0x24c   : > { %v1110_v46 = vpack.c.bf16 %v1094_v0, %v1094_v0  ;;  %1529 = vperm.xlu1 %4173, %v4201_v28   ;;  %2965 = vmatpush.bf16.msra.mxu0 %v3910_v48  ;;  %v3909_v28 = vld [vmem:[%s4441_s30 + $0x1c0] sm:$0xff]  ;;  %v1207_v29 = vpack.c.bf16 %v1191_v1, %v1191_v1  ;;  %v1464_v39 = vmul.f32 %v1402_v52, %v4868_v15  ;;  %v3922_v0 = vld [vmem:[%s4441_s30 + $0x228] sm:$0xff]  ;;  %v5302_v48 = vpop.f32.mrf.mxu3 }
 0x24d   : > { %2840 = vmatmul.bf16.gmra.mxu1 %v5735_v33  ;;  %v1465_v52 = vmul.f32 %v1406_v24, %v4882_v40  ;;  %v5300_v33 = vpop.f32.mrf.mxu2 }
 0x24e   : > { %v1734_v45 = vunpack.c.l.b16 %v1110_v46  ;;  %3009 = vmatpush.bf16.msra.mxu1 %v3923_v11  ;;  %v1480_v1 = vpack.c.bf16 %v1464_v39, %v1464_v39  ;;  %v3921_v11 = vld [vmem:[%s4441_s30 + $0x220] sm:$0xff] }
 0x24f   : > { %v1481_v14 = vpack.c.bf16 %v1465_v52, %v1465_v52 }
 0x250   : > { %v1743_v63 = vpack.c.b16 %v1735_v42, %v1734_v45  ;;  %2966 = vmatpush.bf16.msra.mxu0 %v3909_v28  ;;  %v1783_v42 = vunpack.c.l.b16 %v1207_v29  ;;  %v1912_v24 = vunpack.c.l.b16 %v1480_v1  ;;  %v5736_v29 = vpack.c.b16 %v5135_v25, %v5133_v36 }
 0x251   : > { %v5283_v5 = vpop.f32.mrf.mxu1  ;;  %v1913_v39 = vunpack.c.l.b16 %v1481_v14  ;;  %v1368_v14 = vmul.f32 %v5254_v3, %v4868_v15 }
 0x252   : > { %v1170_v53 = vpop.permute.xlu1 %1169  ;;  %2757 = vmatmul.bf16.gmra.mxu3 %v1743_v63  ;;  %3010 = vmatpush.bf16.msra.mxu1 %v3922_v0 }
 0x253   : > { %v1190_v9 = vmul.f32 %v1170_v53, %v5087_v54  ;;  %4176 = vset.pattern.permute.xlu2 %v5734_v59  ;;  %v5305_v53 = vpop.f32.mrf.mxu0 }
 0x254   : > { %4175 = vset.pattern.permute.xlu1 %v5734_v59  ;;  %1349 = vperm.xlu2 %4176, %v4203_v2   ;;  %v5294_v63 = vpop.permute.xlu2 %1501  ;;  %v2738_v1 = vpop.f32.mrf.mxu3 }
 0x255   : > { %v1206_v46 = vpack.c.bf16 %v1190_v9, %v1190_v9  ;;  %1345 = vperm.xlu1 %4175, %v4204_v31  }
 0x256   : > { %3011 = vmatpush.bf16.msra.mxu1 %v3921_v11  ;;  %v3919_v11 = vld [vmem:[%s4441_s30 + $0x210] sm:$0xff] }
 0x257   : > { %v1782_v45 = vunpack.c.l.b16 %v1206_v46  ;;  %v1285_v46 = vmul.f32 %v5242_v30, %v5069_v44 }
 0x259   : > { %v1791_v9 = vpack.c.b16 %v1783_v42, %v1782_v45  ;;  %v5307_v8 = vpop.f32.mrf.mxu1  ;;  %v1928_v45 = vpack.c.b16 %v1913_v39, %v1912_v24  ;;  %v1301_v30 = vpack.c.bf16 %v1285_v46, %v1285_v46  ;;  %v4206_v46 = vld [vmem:[%s5679_s1 + $0x60] sm:$0xff] }
 0x25a   : > { %3012 = vmatpush.bf16.msra.mxu1 %v3920_v17 }
 0x25b   : > { %v1270_v28 = vpop.permute.xlu1 %1269  ;;  %2806 = vmatmul.bf16.gmra.mxu0 %v1791_v9  ;;  %v1284_v9 = vmul.f32 %v5169_v18, %v5053_v21  ;;  %v1829_v18 = vunpack.c.l.b16 %v1301_v30 }
 0x25c   : > { %4178 = vset.pattern.permute.xlu2 %v5726_v19 }
 0x25d   : > { %4177 = vset.pattern.permute.xlu1 %v5724_v16  ;;  %2845 = vmatmul.bf16.gmra.mxu1 %v5736_v29  ;;  %v1318_v52 = vpop.permute.xlu2 %1317  ;;  %v1300_v24 = vpack.c.bf16 %v1284_v9, %v1284_v9  ;;  %v1384_v29 = vpack.c.bf16 %v1368_v14, %v1368_v14 }
 0x25e   : > { %1537 = vperm.xlu2 %4178, %v4204_v31   ;;  %1445 = vperm.xlu1 %4177, %v4203_v2   ;;  %v2689_v0 = vpop.f32.mrf.mxu2 }
 0x25f   : > { %v2690_v42 = vadd.f32 %v2689_v0, %v5224_v57  ;;  %3013 = vmatpush.bf16.msra.mxu1 %v3919_v11  ;;  %v3918_v57 = vld [vmem:[%s4441_s30 + $0x208] sm:$0xff] }
 0x260   : > { %v4205_v0 = vld [vmem:[%s5679_s1 + $0x68] sm:$0xff] }
 0x261   : > { %v5323_v36 = vpop.f32.mrf.mxu1  ;;  %v2739_v25 = vadd.f32 %v2738_v1, %v2690_v42  ;;  %v2787_v2 = vpop.f32.mrf.mxu0  ;;  %v3917_v42 = vld [vmem:[%s4441_s30 + $0x200] sm:$0xff]  ;;  %v1864_v1 = vunpack.c.l.b16 %v1384_v29 }
 0x262   : > { %2918 = vmatmul.bf16.vlgmr.msrb.gmra.mxu3 %v1928_v45  ;;  %v1828_v45 = vunpack.c.l.b16 %v1300_v24  ;;  %v1287_v24 = vmul.f32 %v1270_v28, %v5099_v20 }
 0x263   : > { %v5325_v31 = vadd.f32 %v2787_v2, %v2739_v25  ;;  %3014 = vmatpush.bf16.msra.mxu1 %v3918_v57  ;;  %v1561_v25 = vmul.f32 %v5294_v63, %v4882_v40  ;;  %v1286_v63 = vmul.f32 %v5266_v60, %v5087_v54 }
 0x264   : > { %v1310_v17 = vpop.permute.xlu1 %1309  ;;  %v1838_v2 = vpack.c.b16 %v1829_v18, %v1828_v45 }
 0x265   : > { %v1369_v39 = vmul.f32 %v1310_v17, %v4882_v40  ;;  %v1410_v17 = vpop.permute.xlu0 %1409  ;;  %v1577_v23 = vpack.c.bf16 %v1561_v25, %v1561_v25 }
 0x266   : > { %4181 = vset.pattern.permute.xlu2 %v5734_v59  ;;  %4180 = vset.pattern.permute.xlu1 %v5734_v59  ;;  %v1506_v9 = vpop.permute.xlu2 %1505  ;;  %v5348_v18 = vpop.f32.mrf.mxu2 }
 0x267   : > { %v1385_v3 = vpack.c.bf16 %v1369_v39, %v1369_v39  ;;  %1357 = vperm.xlu2 %4181, %v4205_v0   ;;  %1353 = vperm.xlu1 %4180, %v4206_v46   ;;  %v1562_v60 = vmul.f32 %v1506_v9, %v4899_v49  ;;  %v5365_v9 = vpop.f32.mrf.mxu3 }
 0x268   : > { %3015 = vmatpush.bf16.msra.mxu1 %v3917_v42  ;;  %v1961_v42 = vunpack.c.l.b16 %v1577_v23 }
 0x269   : > { %v1865_v11 = vunpack.c.l.b16 %v1385_v3  ;;  %v5338_v14 = vpop.f32.mrf.mxu1  ;;  %v5355_v20 = vpop.f32.mrf.mxu0 }
 0x26b   : > { %v1880_v30 = vpack.c.b16 %v1865_v11, %v1864_v1  ;;  %v1303_v1 = vpack.c.bf16 %v1287_v24, %v1287_v24  ;;  %v1371_v11 = vmul.f32 %v1318_v52, %v4919_v13  ;;  %v4207_v24 = vld [vmem:[%s5679_s1 + $0x70] sm:$0xff] }
 0x26d   : > { %v1498_v39 = vpop.permute.xlu1 %1497  ;;  %2850 = vmatmul.bf16.gmra.mxu1 %v1838_v2  ;;  %2869 = vmatmul.bf16.vlgmr.msrb.gmra.mxu2 %v1880_v30  ;;  %v1302_v2 = vpack.c.bf16 %v1286_v63, %v1286_v63 }
 0x26e   : > { %v1560_v57 = vmul.f32 %v1498_v39, %v4868_v15  ;;  %v1510_v39 = vpop.permute.xlu0 %1509 }
 0x26f   : > { %4183 = vset.pattern.permute.xlu2 %v5724_v16  ;;  %4182 = vset.pattern.permute.xlu1 %v5724_v16  ;;  %v1326_v28 = vpop.permute.xlu2 %1325  ;;  %v1830_v23 = vunpack.c.l.b16 %v1302_v2 }
 0x270   : > { %v1576_v29 = vpack.c.bf16 %v1560_v57, %v1560_v57  ;;  %1453 = vperm.xlu2 %4183, %v4205_v0   ;;  %1449 = vperm.xlu1 %4182, %v4206_v46   ;;  %v1831_v57 = vunpack.c.l.b16 %v1303_v1  ;;  %v1387_v46 = vpack.c.bf16 %v1371_v11, %v1371_v11 }
 0x271   : > { %v5350_v3 = vpop.f32.mrf.mxu1 }
 0x272   : > { %v1960_v45 = vunpack.c.l.b16 %v1576_v29  ;;  %v1867_v1 = vunpack.c.l.b16 %v1387_v46 }
 0x274   : > { %v1976_v25 = vpack.c.b16 %v1961_v42, %v1960_v45  ;;  %v1563_v42 = vmul.f32 %v1510_v39, %v4919_v13 }
 0x276   : > { %v1314_v30 = vpop.permute.xlu1 %1313  ;;  %2967 = vmatmul.bf16.vlgmr.msra.gmra.mxu0 %v1976_v25  ;;  %v1578_v25 = vpack.c.bf16 %v1562_v60, %v1562_v60  ;;  %v1579_v54 = vpack.c.bf16 %v1563_v42, %v1563_v42  ;;  %v1593_v42 = vpack.c.bf16 %v4882_v40, %v4882_v40 }
 0x277   : > { %v1370_v26 = vmul.f32 %v1314_v30, %v4899_v49 }
 0x278   : > { %4185 = vset.pattern.permute.xlu2 %v5734_v59  ;;  %4184 = vset.pattern.permute.xlu1 %v5726_v19  ;;  %v1839_v59 = vpack.c.b16 %v1831_v57, %v1830_v23  ;;  %v1422_v2 = vpop.permute.xlu2 %1421  ;;  %v1962_v44 = vunpack.c.l.b16 %v1578_v25  ;;  %v1963_v57 = vunpack.c.l.b16 %v1579_v54  ;;  %v2792_v23 = vpop.f32.mrf.mxu0  ;;  %v1373_v54 = vmul.f32 %v1326_v28, %v4944_v50 }
 0x279   : > { %v1386_v52 = vpack.c.bf16 %v1370_v26, %v1370_v26  ;;  %1361 = vperm.xlu2 %4185, %v4207_v24   ;;  %1549 = vperm.xlu1 %4184, %v4205_v0   ;;  %v5362_v29 = vpop.f32.mrf.mxu1  ;;  %v2694_v63 = vpop.f32.mrf.mxu2  ;;  %v1466_v26 = vmul.f32 %v1410_v17, %v4899_v49  ;;  %v4208_v17 = vld [vmem:[%s5679_s1 + $0x78] sm:$0xff] }
 0x27a   : > { %v2695_v45 = vadd.f32 %v2694_v63, %v5269_v61  ;;  %v1592_v63 = vpack.c.bf16 %v4868_v15, %v4868_v15  ;;  %v2677_v15 = vadd.f32 %v5153_v56, %v5145_v32  ;;  %v1389_v40 = vpack.c.bf16 %v1373_v54, %v1373_v54 }
 0x27b   : > { %v1866_v11 = vunpack.c.l.b16 %v1386_v52  ;;  %v1482_v21 = vpack.c.bf16 %v1466_v26, %v1466_v26 }
 0x27c   : > { %v2726_v32 = vadd.f32 %v5175_v10, %v2677_v15  ;;  %v1869_v56 = vunpack.c.l.b16 %v1389_v40 }
 0x27d   : > { %2855 = vmatmul.bf16.gmra.mxu1 %v1839_v59  ;;  %v1881_v30 = vpack.c.b16 %v1867_v1, %v1866_v11  ;;  %v1977_v59 = vpack.c.b16 %v1963_v57, %v1962_v44 }
 0x27f   : > { %v1414_v0 = vpop.permute.xlu1 %1413  ;;  %2874 = vmatmul.bf16.gmra.mxu2 %v1881_v30 }
 0x280   : > { %v1467_v39 = vmul.f32 %v1414_v0, %v4919_v13  ;;  %v2008_v0 = vunpack.c.l.b16 %v1592_v63 }
 0x281   : > { %4188 = vset.pattern.permute.xlu2 %v5724_v16  ;;  %4187 = vset.pattern.permute.xlu1 %v5724_v16  ;;  %v5372_v61 = vpop.f32.mrf.mxu1  ;;  %v1914_v16 = vunpack.c.l.b16 %v1482_v21  ;;  %v1330_v25 = vpop.permute.xlu2 %1329 }
 0x282   : > { %v1483_v46 = vpack.c.bf16 %v1467_v39, %v1467_v39  ;;  %1461 = vperm.xlu2 %4188, %v4208_v17   ;;  %1457 = vperm.xlu1 %4187, %v4207_v24   ;;  %v2743_v60 = vpop.f32.mrf.mxu3  ;;  %v2696_v30 = vpop.f32.mrf.mxu2  ;;  %v2009_v39 = vunpack.c.l.b16 %v1593_v42 }
 0x283   : > { %v2744_v52 = vadd.f32 %v2743_v60, %v2695_v45  ;;  %v1514_v45 = vpop.permute.xlu0 %1513  ;;  %v2697_v44 = vadd.f32 %v2696_v30, %v5283_v5  ;;  %v2794_v42 = vpop.f32.mrf.mxu0  ;;  %v1469_v5 = vmul.f32 %v1422_v2, %v4944_v50  ;;  %v1374_v2 = vmul.f32 %v1330_v25, %v4958_v38 }
 0x284   : > { %v1915_v1 = vunpack.c.l.b16 %v1483_v46 }
 0x285   : > { %v5382_v11 = vadd.f32 %v2792_v23, %v2744_v52  ;;  %v2024_v52 = vpack.c.b16 %v2009_v39, %v2008_v0  ;;  %v1595_v0 = vpack.c.bf16 %v4919_v13, %v4919_v13 }
 0x286   : > { %2972 = vmatmul.bf16.gmra.mxu0 %v1977_v59  ;;  %v1929_v26 = vpack.c.b16 %v1915_v1, %v1914_v16  ;;  %v2775_v1 = vadd.f32 %v5178_v27, %v2726_v32 }
 0x288   : > { %v1322_v60 = vpop.permute.xlu1 %1321  ;;  %2923 = vmatmul.bf16.gmra.mxu3 %v1929_v26  ;;  %v1485_v26 = vpack.c.bf16 %v1469_v5, %v1469_v5 }
 0x289   : > { %v1372_v21 = vmul.f32 %v1322_v60, %v4931_v55 }
 0x28a   : > { %4190 = vset.pattern.permute.xlu2 %v5726_v19  ;;  %4189 = vset.pattern.permute.xlu1 %v5726_v19  ;;  %v2821_v28 = vpop.f32.mrf.mxu1  ;;  %v2745_v23 = vpop.f32.mrf.mxu3 }
 0x28b   : > { %v1388_v57 = vpack.c.bf16 %v1372_v21, %v1372_v21  ;;  %v5391_v46 = vadd.f32 %v2821_v28, %v5149_v35  ;;  %1557 = vperm.xlu2 %4190, %v4208_v17   ;;  %1553 = vperm.xlu1 %4189, %v4207_v24   ;;  %v2746_v63 = vadd.f32 %v2745_v23, %v2697_v44  ;;  %v1430_v35 = vpop.permute.xlu2 %1429  ;;  %v1334_v17 = vpop.permute.xlu0 %1333  ;;  %v1917_v44 = vunpack.c.l.b16 %v1485_v26 }
 0x28c   : > { %v1594_v24 = vpack.c.bf16 %v4899_v49, %v4899_v49  ;;  %v1375_v15 = vmul.f32 %v1334_v17, %v4971_v51  ;;  %v1564_v49 = vmul.f32 %v1514_v45, %v4931_v55  ;;  %v1390_v23 = vpack.c.bf16 %v1374_v2, %v1374_v2 }
 0x28d   : > { %v1868_v16 = vunpack.c.l.b16 %v1388_v57  ;;  %3016 = vmatmul.bf16.vlgmr.msra.gmra.mxu1 %v2024_v52  ;;  %v5395_v59 = vadd.f32 %v2794_v42, %v2746_v63  ;;  %v2011_v57 = vunpack.c.l.b16 %v1595_v0  ;;  %v2682_v42 = vadd.f32 %v5183_v12, %v5172_v22 }
 0x28e   : > { %v2010_v21 = vunpack.c.l.b16 %v1594_v24  ;;  %v1391_v63 = vpack.c.bf16 %v1375_v15, %v1375_v15  ;;  %v1580_v13 = vpack.c.bf16 %v1564_v49, %v1564_v49  ;;  %v1471_v0 = vmul.f32 %v1430_v35, %v4971_v51 }
 0x28f   : > { %v1882_v19 = vpack.c.b16 %v1869_v56, %v1868_v16  ;;  %v1870_v16 = vunpack.c.l.b16 %v1390_v23  ;;  %v1597_v35 = vpack.c.bf16 %v4944_v50, %v4944_v50 }
 0x290   : > { %v2025_v56 = vpack.c.b16 %v2011_v57, %v2010_v21  ;;  %v1964_v26 = vunpack.c.l.b16 %v1580_v13  ;;  %v1487_v49 = vpack.c.bf16 %v1471_v0, %v1471_v0 }
 0x291   : > { %v1418_v54 = vpop.permute.xlu1 %1417  ;;  %2879 = vmatmul.bf16.gmra.mxu2 %v1882_v19  ;;  %v1871_v19 = vunpack.c.l.b16 %v1391_v63  ;;  %v2013_v13 = vunpack.c.l.b16 %v1597_v35  ;;  %v1599_v35 = vpack.c.bf16 %v4971_v51, %v4971_v51 }
 0x292   : > { %v1468_v10 = vmul.f32 %v1418_v54, %v4931_v55  ;;  %v2823_v30 = vpop.f32.mrf.mxu1 }
 0x293   : > { %v5404_v39 = vadd.f32 %v2823_v30, %v2775_v1  ;;  %v1526_v5 = vpop.permute.xlu2 %1525  ;;  %v2731_v1 = vadd.f32 %v5233_v37, %v2682_v42  ;;  %v1883_v30 = vpack.c.b16 %v1871_v19, %v1870_v16  ;;  %v1338_v15 = vpop.permute.xlu0 %1337 }
 0x294   : > { %v1484_v60 = vpack.c.bf16 %v1468_v10, %v1468_v10  ;;  %v2699_v27 = vpop.f32.mrf.mxu2  ;;  %v1567_v42 = vmul.f32 %v1526_v5, %v4971_v51 }
 0x295   : > { %v2700_v40 = vadd.f32 %v2699_v27, %v5307_v8  ;;  %v2780_v12 = vadd.f32 %v5240_v7, %v2731_v1 }
 0x296   : > { %v1916_v28 = vunpack.c.l.b16 %v1484_v60 }
 0x298   : > { %v1930_v52 = vpack.c.b16 %v1917_v44, %v1916_v28 }
 0x29a   : > { %v1518_v32 = vpop.permute.xlu1 %1517  ;;  %v2826_v25 = vpop.f32.mrf.mxu1  ;;  %2928 = vmatmul.bf16.gmra.mxu3 %v1930_v52 }
 0x29b   : > { %v1565_v8 = vmul.f32 %v1518_v32, %v4944_v50  ;;  %v5413_v45 = vadd.f32 %v2826_v25, %v5194_v43  ;;  %v1919_v32 = vunpack.c.l.b16 %v1487_v49 }
 0x29c   : > { %v2701_v60 = vpop.f32.mrf.mxu2  ;;  %v1434_v28 = vpop.permute.xlu2 %1433 }
 0x29d   : > { %v1581_v54 = vpack.c.bf16 %v1565_v8, %v1565_v8  ;;  %3021 = vmatmul.bf16.gmra.mxu1 %v2025_v56  ;;  %v2748_v24 = vpop.f32.mrf.mxu3  ;;  %v2702_v7 = vadd.f32 %v2701_v60, %v5323_v36  ;;  %v2687_v36 = vadd.f32 %v5300_v33, %v5203_v62  ;;  %v1472_v5 = vmul.f32 %v1434_v28, %v4991_v4 }
 0x29e   : > { %v2749_v17 = vadd.f32 %v2748_v24, %v2700_v40  ;;  %v1596_v40 = vpack.c.bf16 %v4931_v55, %v4931_v55 }
 0x29f   : > { %v1965_v10 = vunpack.c.l.b16 %v1581_v54  ;;  %v1438_v54 = vpop.permute.xlu0 %1437  ;;  %v2736_v24 = vadd.f32 %v5302_v48, %v2687_v36  ;;  %v1488_v48 = vpack.c.bf16 %v1472_v5, %v1472_v5 }
 0x2a0   : > { %v2797_v22 = vpop.f32.mrf.mxu0  ;;  %v2012_v63 = vunpack.c.l.b16 %v1596_v40  ;;  %v1473_v62 = vmul.f32 %v1438_v54, %v5000_v41  ;;  %v1598_v40 = vpack.c.bf16 %v4958_v38, %v4958_v38 }
 0x2a1   : > { %v1978_v2 = vpack.c.b16 %v1965_v10, %v1964_v26  ;;  %2884 = vmatmul.bf16.gmra.mxu2 %v1883_v30  ;;  %v5418_v43 = vadd.f32 %v2797_v22, %v2749_v17  ;;  %v1583_v17 = vpack.c.bf16 %v1567_v42, %v1567_v42  ;;  %v2785_v33 = vadd.f32 %v5305_v53, %v2736_v24 }
 0x2a2   : > { %v2828_v27 = vpop.f32.mrf.mxu1  ;;  %v2026_v19 = vpack.c.b16 %v2013_v13, %v2012_v63  ;;  %v1489_v49 = vpack.c.bf16 %v1473_v62, %v1473_v62  ;;  %v1920_v53 = vunpack.c.l.b16 %v1488_v48  ;;  %v2692_v13 = vadd.f32 %v5348_v18, %v5245_v34 }
 0x2a3   : > { %v5420_v37 = vadd.f32 %v2828_v27, %v2780_v12  ;;  %v1426_v21 = vpop.permute.xlu1 %1425  ;;  %2977 = vmatmul.bf16.gmra.mxu0 %v1978_v2  ;;  %v1967_v22 = vunpack.c.l.b16 %v1583_v17  ;;  %v1376_v2 = vmul.f32 %v1338_v15, %v4991_v4  ;;  %v2014_v15 = vunpack.c.l.b16 %v1598_v40 }
 0x2a4   : > { %v1470_v44 = vmul.f32 %v1426_v21, %v4958_v38  ;;  %v2741_v24 = vadd.f32 %v5365_v9, %v2692_v13  ;;  %v1600_v9 = vpack.c.bf16 %v4991_v4, %v4991_v4 }
 0x2a5   : > { %v2750_v57 = vpop.f32.mrf.mxu3  ;;  %v1534_v10 = vpop.permute.xlu2 %1533 }
 0x2a6   : > { %v1486_v23 = vpack.c.bf16 %v1470_v44, %v1470_v44  ;;  %v2751_v52 = vadd.f32 %v2750_v57, %v2702_v7  ;;  %v2015_v57 = vunpack.c.l.b16 %v1599_v35  ;;  %v2016_v35 = vunpack.c.l.b16 %v1600_v9 }
 0x2a7   : > { %v1442_v34 = vpop.permute.xlu0 %1441 }
 0x2a8   : > { %v1918_v25 = vunpack.c.l.b16 %v1486_v23  ;;  %v2799_v56 = vpop.f32.mrf.mxu0  ;;  %v1921_v23 = vunpack.c.l.b16 %v1489_v49 }
 0x2a9   : > { %v5429_v55 = vadd.f32 %v2799_v56, %v2751_v52 }
 0x2aa   : > { %v2831_v16 = vpop.f32.mrf.mxu1  ;;  %v1931_v50 = vpack.c.b16 %v1919_v32, %v1918_v25  ;;  %v1932_v51 = vpack.c.b16 %v1921_v23, %v1920_v53 }
 0x2ab   : > { %v5434_v8 = vadd.f32 %v2831_v16, %v5264_v47  ;;  %v1569_v16 = vmul.f32 %v1534_v10, %v5000_v41 }
 0x2ac   : > { %v1522_v1 = vpop.permute.xlu1 %1521  ;;  %2933 = vmatmul.bf16.gmra.mxu3 %v1931_v50 }
 0x2ad   : > { %v1566_v26 = vmul.f32 %v1522_v1, %v4958_v38  ;;  %3026 = vmatmul.bf16.gmra.mxu1 %v2026_v19  ;;  %v2027_v19 = vpack.c.b16 %v2015_v57, %v2014_v15  ;;  %v1585_v17 = vpack.c.bf16 %v1569_v16, %v1569_v16 }
 0x2ae   : > { %v1350_v38 = vpop.permute.xlu2 %1349 }
 0x2af   : > { %v1582_v30 = vpack.c.bf16 %v1566_v26, %v1566_v26  ;;  %v2704_v0 = vpop.f32.mrf.mxu2 }
 0x2b0   : > { %v2705_v47 = vadd.f32 %v2704_v0, %v5338_v14  ;;  %v1392_v14 = vpack.c.bf16 %v1376_v2, %v1376_v2  ;;  %v2790_v0 = vadd.f32 %v5355_v20, %v2741_v24 }
 0x2b1   : > { %v1966_v12 = vunpack.c.l.b16 %v1582_v30 }
 0x2b2   : > { %v2833_v60 = vpop.f32.mrf.mxu1  ;;  %v1872_v25 = vunpack.c.l.b16 %v1392_v14 }
 0x2b3   : > { %v1979_v27 = vpack.c.b16 %v1967_v22, %v1966_v12  ;;  %v5443_v21 = vadd.f32 %v2833_v60, %v2785_v33  ;;  %v1969_v22 = vunpack.c.l.b16 %v1585_v17  ;;  %v1601_v60 = vpack.c.bf16 %v5000_v41, %v5000_v41 }
 0x2b5   : > { %v1342_v7 = vpop.permute.xlu1 %1341  ;;  %2982 = vmatmul.bf16.gmra.mxu0 %v1979_v27  ;;  %v2017_v49 = vunpack.c.l.b16 %v1601_v60 }
 0x2b6   : > { %v1377_v44 = vmul.f32 %v1342_v7, %v5000_v41  ;;  %v1542_v7 = vpop.permute.xlu0 %1541 }
 0x2b7   : > { %v2706_v28 = vpop.f32.mrf.mxu2  ;;  %v1571_v15 = vmul.f32 %v1542_v7, %v5036_v58  ;;  %v2028_v57 = vpack.c.b16 %v2017_v49, %v2016_v35 }
 0x2b8   : > { %v1393_v52 = vpack.c.bf16 %v1377_v44, %v1377_v44  ;;  %v2753_v63 = vpop.f32.mrf.mxu3  ;;  %v2707_v26 = vadd.f32 %v2706_v28, %v5350_v3  ;;  %v1538_v12 = vpop.permute.xlu2 %1537 }
 0x2b9   : > { %v2754_v32 = vadd.f32 %v2753_v63, %v2705_v47  ;;  %v1570_v53 = vmul.f32 %v1538_v12, %v5014_v6  ;;  %v1474_v63 = vmul.f32 %v1442_v34, %v5014_v6  ;;  %v1603_v34 = vpack.c.bf16 %v5036_v58, %v5036_v58 }
 0x2ba   : > { %v1873_v56 = vunpack.c.l.b16 %v1393_v52  ;;  %v2836_v42 = vpop.f32.mrf.mxu1 }
 0x2bb   : > { %v5454_v50 = vadd.f32 %v2836_v42, %v5325_v31  ;;  %v2802_v36 = vpop.f32.mrf.mxu0  ;;  %v1586_v13 = vpack.c.bf16 %v1570_v53, %v1570_v53 }
 0x2bc   : > { %v1884_v1 = vpack.c.b16 %v1873_v56, %v1872_v25  ;;  %2938 = vmatmul.bf16.gmra.mxu3 %v1932_v51  ;;  %v5456_v54 = vadd.f32 %v2802_v36, %v2754_v32  ;;  %v1587_v25 = vpack.c.bf16 %v1571_v15, %v1571_v15  ;;  %v1490_v56 = vpack.c.bf16 %v1474_v63, %v1474_v63 }
 0x2bd   : > { %3031 = vmatmul.bf16.gmra.mxu1 %v2027_v19  ;;  %v1970_v42 = vunpack.c.l.b16 %v1586_v13 }
 0x2be   : > { %v1530_v18 = vpop.permute.xlu1 %1529  ;;  %2889 = vmatmul.bf16.gmra.mxu2 %v1884_v1  ;;  %v1971_v19 = vunpack.c.l.b16 %v1587_v25  ;;  %v1546_v9 = vpop.permute.xlu0 %1545  ;;  %v5739_v25 = vld [vmem:[#allocation23_spill] sm:$0xff] }
 0x2bf   : > { %v1568_v5 = vmul.f32 %v1530_v18, %v4991_v4  ;;  %v2709_v10 = vpop.f32.mrf.mxu2  ;;  %v1922_v18 = vunpack.c.l.b16 %v1490_v56 }
 0x2c0   : > { %v2710_v31 = vadd.f32 %v2709_v10, %v5362_v29  ;;  %v2755_v30 = vpop.f32.mrf.mxu3  ;;  %v1379_v29 = vmul.f32 %v1350_v38, %v5036_v58  ;;  %v1981_v17 = vpack.c.b16 %v1971_v19, %v1970_v42  ;;  %v5737_v10 = vld [vmem:[#allocation22_spill] sm:$0xff]  ;;  %v5740_v42 = vld [vmem:[#allocation24_spill] sm:$0xff] }
 0x2c1   : > { %v1584_v62 = vpack.c.bf16 %v1568_v5, %v1568_v5  ;;  %v2756_v47 = vadd.f32 %v2755_v30, %v2707_v26  ;;  %v1358_v38 = vpop.permute.xlu2 %1357 }
 0x2c2   : > { %v2838_v33 = vpop.f32.mrf.mxu1  ;;  %v1395_v4 = vpack.c.bf16 %v1379_v29, %v1379_v29  ;;  %v1381_v30 = vmul.f32 %v1358_v38, %v5737_v10 }
 0x2c3   : > { %v1968_v2 = vunpack.c.l.b16 %v1584_v62  ;;  %v5465_v48 = vadd.f32 %v2838_v33, %v2790_v0  ;;  %v2804_v3 = vpop.f32.mrf.mxu0 }
 0x2c4   : > { %v5470_v27 = vadd.f32 %v2804_v3, %v2756_v47  ;;  %v1875_v23 = vunpack.c.l.b16 %v1395_v4  ;;  %v5738_v3 = vld [vmem:[#allocation21_spill] sm:$0xff] }
 0x2c5   : > { %v1980_v20 = vpack.c.b16 %v1969_v22, %v1968_v2 }
 0x2c7   : > { %v1346_v40 = vpop.permute.xlu1 %1345  ;;  %2987 = vmatmul.bf16.gmra.mxu0 %v1980_v20  ;;  %v2711_v12 = vpop.f32.mrf.mxu2 }
 0x2c8   : > { %v1378_v14 = vmul.f32 %v1346_v40, %v5014_v6  ;;  %v2712_v40 = vadd.f32 %v2711_v12, %v5372_v61  ;;  %v1366_v61 = vpop.permute.xlu0 %1365 }
 0x2ca   : > { %v1394_v44 = vpack.c.bf16 %v1378_v14, %v1378_v14  ;;  %v2841_v28 = vpop.f32.mrf.mxu1  ;;  %v1454_v62 = vpop.permute.xlu2 %1453 }
 0x2cb   : > { %v5476_v41 = vadd.f32 %v2841_v28, %v5382_v11  ;;  %v1602_v11 = vpack.c.bf16 %v5014_v6, %v5014_v6  ;;  %v2019_v6 = vunpack.c.l.b16 %v1603_v34  ;;  %v1477_v53 = vmul.f32 %v1454_v62, %v5737_v10 }
 0x2cc   : > { %v1874_v52 = vunpack.c.l.b16 %v1394_v44  ;;  %v1572_v34 = vmul.f32 %v1546_v9, %v5738_v3 }
 0x2cd   : > { %3036 = vmatmul.bf16.gmra.mxu1 %v2028_v57  ;;  %v2018_v33 = vunpack.c.l.b16 %v1602_v11  ;;  %v1493_v63 = vpack.c.bf16 %v1477_v53, %v1477_v53 }
 0x2ce   : > { %v1885_v32 = vpack.c.b16 %v1875_v23, %v1874_v52  ;;  %v1588_v62 = vpack.c.bf16 %v1572_v34, %v1572_v34 }
 0x2d0   : > { %v1446_v51 = vpop.permute.xlu1 %1445  ;;  %2894 = vmatmul.bf16.gmra.mxu2 %v1885_v32  ;;  %v1605_v32 = vpack.c.bf16 %v5737_v10, %v5737_v10 }
 0x2d1   : > { %v1475_v16 = vmul.f32 %v1446_v51, %v5036_v58  ;;  %v1397_v58 = vpack.c.bf16 %v1381_v30, %v1381_v30 }
 0x2d2   : > { %v2843_v36 = vpop.f32.mrf.mxu1 }
 0x2d3   : > { %v1491_v1 = vpack.c.bf16 %v1475_v16, %v1475_v16  ;;  %v5483_v24 = vadd.f32 %v2843_v36, %v5395_v59  ;;  %v1877_v7 = vunpack.c.l.b16 %v1397_v58  ;;  %v1362_v15 = vpop.permute.xlu2 %1361  ;;  %v1383_v16 = vmul.f32 %v1366_v61, %v5740_v42 }
 0x2d4   : > { %v1382_v51 = vmul.f32 %v1362_v15, %v5739_v25  ;;  %v1925_v36 = vunpack.c.l.b16 %v1493_v63 }
 0x2d5   : > { %v1923_v26 = vunpack.c.l.b16 %v1491_v1  ;;  %v2758_v5 = vpop.f32.mrf.mxu3  ;;  %v2021_v1 = vunpack.c.l.b16 %v1605_v32 }
 0x2d6   : > { %v2759_v0 = vadd.f32 %v2758_v5, %v2710_v31  ;;  %v2029_v31 = vpack.c.b16 %v2019_v6, %v2018_v33 }
 0x2d7   : > { %v1933_v47 = vpack.c.b16 %v1923_v26, %v1922_v18  ;;  %2992 = vmatmul.bf16.gmra.mxu0 %v1981_v17  ;;  %v1398_v18 = vpack.c.bf16 %v1382_v51, %v1382_v51  ;;  %v1399_v26 = vpack.c.bf16 %v1383_v16, %v1383_v16 }
 0x2d8   : > { %v2807_v22 = vpop.f32.mrf.mxu0 }
 0x2d9   : > { %v5488_v59 = vadd.f32 %v2807_v22, %v2759_v0  ;;  %v1354_v2 = vpop.permute.xlu1 %1353  ;;  %2943 = vmatmul.bf16.gmra.mxu3 %v1933_v47  ;;  %v1878_v47 = vunpack.c.l.b16 %v1398_v18  ;;  %v1879_v22 = vunpack.c.l.b16 %v1399_v26 }
 0x2da   : > { %v1380_v60 = vmul.f32 %v1354_v2, %v5738_v3  ;;  %v2846_v29 = vpop.f32.mrf.mxu1  ;;  %v1972_v2 = vunpack.c.l.b16 %v1588_v62 }
 0x2db   : > { %v5492_v20 = vadd.f32 %v2846_v29, %v5418_v43  ;;  %v1604_v43 = vpack.c.bf16 %v5738_v3, %v5738_v3  ;;  %v1887_v9 = vpack.c.b16 %v1879_v22, %v1878_v47 }
 0x2dc   : > { %v1396_v35 = vpack.c.bf16 %v1380_v60, %v1380_v60  ;;  %v1462_v6 = vpop.permute.xlu2 %1461 }
 0x2dd   : > { %v2760_v49 = vpop.f32.mrf.mxu3  ;;  %3041 = vmatmul.bf16.gmra.mxu1 %v2029_v31  ;;  %v2020_v19 = vunpack.c.l.b16 %v1604_v43  ;;  %v1479_v29 = vmul.f32 %v1462_v6, %v5740_v42 }
 0x2de   : > { %v1876_v4 = vunpack.c.l.b16 %v1396_v35  ;;  %v2761_v14 = vadd.f32 %v2760_v49, %v2712_v40 }
 0x2df   : > { %v2030_v0 = vpack.c.b16 %v2021_v1, %v2020_v19  ;;  %v1495_v53 = vpack.c.bf16 %v1479_v29, %v1479_v29 }
 0x2e0   : > { %v1886_v44 = vpack.c.b16 %v1877_v7, %v1876_v4  ;;  %v2809_v28 = vpop.f32.mrf.mxu0  ;;  %v1606_v7 = vpack.c.bf16 %v5739_v25, %v5739_v25  ;;  %v1607_v4 = vpack.c.bf16 %v5740_v42, %v5740_v42 }
 0x2e1   : > { %v5496_v57 = vadd.f32 %v2809_v28, %v2761_v14  ;;  %v1927_v43 = vunpack.c.l.b16 %v1495_v53 }
 0x2e2   : > { %v1450_v23 = vpop.permute.xlu1 %1449  ;;  %v2848_v52 = vpop.f32.mrf.mxu1  ;;  %2899 = vmatmul.bf16.gmra.mxu2 %v1886_v44 }
 0x2e3   : > { %v1476_v13 = vmul.f32 %v1450_v23, %v5738_v3  ;;  %v5502_v38 = vadd.f32 %v2848_v52, %v5429_v55  ;;  %v2022_v23 = vunpack.c.l.b16 %v1606_v7  ;;  %v2023_v52 = vunpack.c.l.b16 %v1607_v4 }
 0x2e5   : > { %v1492_v56 = vpack.c.bf16 %v1476_v13, %v1476_v13  ;;  %v2919_v58 = vpop.f32.mrf.mxu3  ;;  %v1558_v28 = vpop.permute.xlu2 %1557  ;;  %v2031_v19 = vpack.c.b16 %v2023_v52, %v2022_v23 }
 0x2e6   : > { %v1575_v13 = vmul.f32 %v1558_v28, %v5740_v42 }
 0x2e7   : > { %v1924_v11 = vunpack.c.l.b16 %v1492_v56 }
 0x2e8   : > { %v1591_v18 = vpack.c.bf16 %v1575_v13, %v1575_v13 }
 0x2e9   : > { %v1934_v17 = vpack.c.b16 %v1925_v36, %v1924_v11 }
 0x2ea   : > { %v2851_v5 = vpop.f32.mrf.mxu1 }
 0x2eb   : > { %v5510_v55 = vadd.f32 %v2851_v5, %v5456_v54  ;;  %v1550_v30 = vpop.permute.xlu1 %1549  ;;  %2948 = vmatmul.bf16.gmra.mxu3 %v1934_v17 }
 0x2ec   : > { %v1573_v33 = vmul.f32 %v1550_v30, %v5737_v10 }
 0x2ed   : > { %3046 = vmatmul.bf16.gmra.mxu1 %v2030_v0  ;;  %v2921_v32 = vpop.f32.mrf.mxu3 }
 0x2ee   : > { %v1589_v12 = vpack.c.bf16 %v1573_v33, %v1573_v33 }
 0x2f0   : > { %v1973_v3 = vunpack.c.l.b16 %v1589_v12  ;;  %v2870_v60 = vpop.f32.mrf.mxu2 }
 0x2f1   : > { %v2871_v54 = vadd.f32 %v2870_v60, %v5391_v46 }
 0x2f2   : > { %v1982_v31 = vpack.c.b16 %v1973_v3, %v1972_v2  ;;  %v2853_v40 = vpop.f32.mrf.mxu1  ;;  %2904 = vmatmul.bf16.gmra.mxu2 %v1887_v9 }
 0x2f3   : > { %v5516_v35 = vadd.f32 %v2853_v40, %v5470_v27  ;;  %v2920_v10 = vadd.f32 %v2919_v58, %v2871_v54  ;;  %v2968_v49 = vpop.f32.mrf.mxu0 }
 0x2f4   : > { %v1458_v14 = vpop.permute.xlu1 %1457  ;;  %2997 = vmatmul.bf16.gmra.mxu0 %v1982_v31 }
 0x2f5   : > { %v2969_v44 = vadd.f32 %v2968_v49, %v2920_v10  ;;  %v1478_v46 = vmul.f32 %v1458_v14, %v5739_v25 }
 0x2f7   : > { %v1494_v15 = vpack.c.bf16 %v1478_v46, %v1478_v46 }
 0x2f8   : > { %v2872_v27 = vpop.f32.mrf.mxu2 }
 0x2f9   : > { %v1926_v61 = vunpack.c.l.b16 %v1494_v15  ;;  %v2873_v63 = vadd.f32 %v2872_v27, %v5404_v39  ;;  %v1975_v39 = vunpack.c.l.b16 %v1591_v18 }
 0x2fa   : > { %v2856_v51 = vpop.f32.mrf.mxu1 }
 0x2fb   : > { %v1935_v56 = vpack.c.b16 %v1927_v43, %v1926_v61  ;;  %v5526_v16 = vadd.f32 %v2856_v51, %v5488_v59  ;;  %v2922_v36 = vadd.f32 %v2921_v32, %v2873_v63  ;;  %v2970_v11 = vpop.f32.mrf.mxu0 }
 0x2fd   : > { %v2971_v1 = vadd.f32 %v2970_v11, %v2922_v36  ;;  %v1554_v34 = vpop.permute.xlu1 %1553  ;;  %2953 = vmatmul.bf16.gmra.mxu3 %v1935_v56  ;;  %3051 = vmatmul.bf16.gmra.mxu1 %v2031_v19 }
 0x2fe   : > { %v1574_v17 = vmul.f32 %v1554_v34, %v5739_v25 }
 0x300   : > { %v1590_v26 = vpack.c.bf16 %v1574_v17, %v1574_v17 }
 0x302   : > { %v1974_v5 = vunpack.c.l.b16 %v1590_v26  ;;  %v2858_v42 = vpop.f32.mrf.mxu1  ;;  %v2875_v30 = vpop.f32.mrf.mxu2 }
 0x303   : > { %v5530_v0 = vadd.f32 %v2858_v42, %v5496_v57  ;;  %v2876_v59 = vadd.f32 %v2875_v30, %v5413_v45  ;;  %v2973_v33 = vpop.f32.mrf.mxu0 }
 0x304   : > { %v1983_v62 = vpack.c.b16 %v1975_v39, %v1974_v5 }
 0x306   : > { %3002 = vmatmul.bf16.gmra.mxu0 %v1983_v62 }
 0x30a   : > { %v3017_v47 = vpop.f32.mrf.mxu1  ;;  %v2877_v12 = vpop.f32.mrf.mxu2 }
 0x30b   : > { %v5533_v6 = vadd.f32 %v3017_v47, %v2969_v44  ;;  %v2924_v22 = vpop.f32.mrf.mxu3  ;;  %v2878_v9 = vadd.f32 %v2877_v12, %v5420_v37  ;;  %v2975_v54 = vpop.f32.mrf.mxu0 }
 0x30c   : > { %v2925_v2 = vadd.f32 %v2924_v22, %v2876_v59 }
 0x30e   : > { %v2974_v25 = vadd.f32 %v2973_v33, %v2925_v2 }
 0x312   : > { %v3019_v58 = vpop.f32.mrf.mxu1 }
 0x313   : > { %v5536_v3 = vadd.f32 %v3019_v58, %v2971_v1  ;;  %v2926_v60 = vpop.f32.mrf.mxu3 }
 0x314   : > { %v2927_v57 = vadd.f32 %v2926_v60, %v2878_v9  ;;  %v2880_v29 = vpop.f32.mrf.mxu2 }
 0x315   : > { %v3073_v45 = vpack.c.bf16 %v5536_v3, %v5533_v6  ;;  %v2881_v31 = vadd.f32 %v2880_v29, %v5434_v8  ;;  %v5748_v6 = vld [vmem:[#allocation13_spill] sm:$0xff]  ;;  %v3930_v3 = vld [vmem:[#allocation4 + $0x18] sm:$0xff] }
 0x316   : > { %v2976_v40 = vadd.f32 %v2975_v54, %v2927_v57 }
 0x31a   : > { %v3022_v10 = vpop.f32.mrf.mxu1 }
 0x31b   : > { %v5541_v49 = vadd.f32 %v3022_v10, %v2974_v25 }
 0x31c   : > { %v2882_v7 = vpop.f32.mrf.mxu2 }
 0x31d   : > { %v2929_v4 = vpop.f32.mrf.mxu3  ;;  %v2883_v28 = vadd.f32 %v2882_v7, %v5443_v21 }
 0x31e   : > { %v2930_v14 = vadd.f32 %v2929_v4, %v2881_v31 }
 0x320   : > { %v2978_v37 = vpop.f32.mrf.mxu0 }
 0x321   : > { %v2979_v53 = vadd.f32 %v2978_v37, %v2930_v14 }
 0x322   : > { %v3024_v44 = vpop.f32.mrf.mxu1 }
 0x323   : > { %v5543_v46 = vadd.f32 %v3024_v44, %v2976_v40 }
 0x324   : > { %v2885_v15 = vpop.f32.mrf.mxu2 }
 0x325   : > { %v3074_v23 = vpack.c.bf16 %v5543_v46, %v5541_v49  ;;  %v2886_v8 = vadd.f32 %v2885_v15, %v5454_v50  ;;  %v2931_v52 = vpop.f32.mrf.mxu3  ;;  %v5747_v49 = vld [vmem:[#allocation14_spill] sm:$0xff]  ;;  %v3929_v46 = vld [vmem:[#allocation4 + $0x38] sm:$0xff] }
 0x326   : > { %v2932_v27 = vadd.f32 %v2931_v52, %v2883_v28 }
 0x328   : > { %v2980_v43 = vpop.f32.mrf.mxu0 }
 0x329   : > { %v2981_v61 = vadd.f32 %v2980_v43, %v2932_v27 }
 0x32a   : > { %v3027_v63 = vpop.f32.mrf.mxu1 }
 0x32b   : > { %v5549_v13 = vadd.f32 %v3027_v63, %v2979_v53  ;;  %v3940_v63 = vld [vmem:[%s4459_s27 + $0x38] sm:$0xff] }
 0x32c   : > { %v2887_v11 = vpop.f32.mrf.mxu2  ;;  %3242 = vmatpush.bf16.msra.mxu3 %v3940_v63 }
 0x32d   : > { %v2888_v50 = vadd.f32 %v2887_v11, %v5465_v48 }
 0x32f   : > { %v2934_v32 = vpop.f32.mrf.mxu3 }
 0x330   : > { %v2935_v51 = vadd.f32 %v2934_v32, %v2886_v8 }
 0x332   : > { %v2983_v56 = vpop.f32.mrf.mxu0  ;;  %v3029_v36 = vpop.f32.mrf.mxu1 }
 0x333   : > { %v2984_v19 = vadd.f32 %v2983_v56, %v2935_v51  ;;  %v5551_v21 = vadd.f32 %v3029_v36, %v2981_v61  ;;  %v3939_v36 = vld [vmem:[%s4459_s27 + $0x30] sm:$0xff] }
 0x334   : > { %3243 = vmatpush.bf16.msra.mxu3 %v3939_v36 }
 0x335   : > { %v3075_v1 = vpack.c.bf16 %v5551_v21, %v5549_v13  ;;  %v3927_v13 = vld [vmem:[#allocation4 + $0x10] sm:$0xff]  ;;  %v5746_v21 = vld [vmem:[#allocation15_spill] sm:$0xff] }
 0x337   : > { %v2936_v34 = vpop.f32.mrf.mxu3 }
 0x338   : > { %v2937_v18 = vadd.f32 %v2936_v34, %v2888_v50 }
 0x33a   : > { %v2985_v17 = vpop.f32.mrf.mxu0  ;;  %v3032_v26 = vpop.f32.mrf.mxu1 }
 0x33b   : > { %v2986_v39 = vadd.f32 %v2985_v17, %v2937_v18  ;;  %v5556_v5 = vadd.f32 %v3032_v26, %v2984_v19  ;;  %v3938_v19 = vld [vmem:[%s4459_s27 + $0x28] sm:$0xff]  ;;  %v3937_v17 = vld [vmem:[%s4459_s27 + $0x20] sm:$0xff] }
 0x33c   : > { %3244 = vmatpush.bf16.msra.mxu3 %v3938_v19 }
 0x33f   : > { %v2939_v30 = vpop.f32.mrf.mxu3 }
 0x340   : > { %3245 = vmatpush.bf16.msra.mxu3 %v3937_v17 }
 0x341   : > { %v2890_v42 = vpop.f32.mrf.mxu2 }
 0x342   : > { %v2891_v59 = vadd.f32 %v2890_v42, %v5476_v41  ;;  %v3034_v62 = vpop.f32.mrf.mxu1 }
 0x343   : > { %v5559_v47 = vadd.f32 %v3034_v62, %v2986_v39 }
 0x344   : > { %v2940_v33 = vadd.f32 %v2939_v30, %v2891_v59  ;;  %v2988_v22 = vpop.f32.mrf.mxu0  ;;  %v3936_v59 = vld [vmem:[%s4459_s27 + $0x18] sm:$0xff] }
 0x345   : > { %v3076_v12 = vpack.c.bf16 %v5559_v47, %v5556_v5  ;;  %3246 = vmatpush.bf16.msra.mxu3 %v3936_v59  ;;  %v3926_v5 = vld [vmem:[#allocation4] sm:$0xff] }
 0x346   : > { %v2989_v48 = vadd.f32 %v2988_v22, %v2940_v33  ;;  %v5745_v47 = vld [vmem:[#allocation16_spill] sm:$0xff] }
 0x347   : > { %v2941_v60 = vpop.f32.mrf.mxu3 }
 0x349   : > { %v2892_v2 = vpop.f32.mrf.mxu2 }
 0x34a   : > { %v2893_v25 = vadd.f32 %v2892_v2, %v5483_v24  ;;  %v3037_v9 = vpop.f32.mrf.mxu1 }
 0x34b   : > { %v5564_v58 = vadd.f32 %v3037_v9, %v2989_v48 }
 0x34c   : > { %v2942_v57 = vadd.f32 %v2941_v60, %v2893_v25  ;;  %v2990_v29 = vpop.f32.mrf.mxu0  ;;  %v3935_v25 = vld [vmem:[%s4459_s27 + $0x10] sm:$0xff] }
 0x34d   : > { %3247 = vmatpush.bf16.msra.mxu3 %v3935_v25 }
 0x34e   : > { %v2991_v54 = vadd.f32 %v2990_v29, %v2942_v57  ;;  %v3934_v57 = vld [vmem:[%s4459_s27 + $0x8] sm:$0xff] }
 0x351   : > { %3248 = vmatpush.bf16.msra.mxu3 %v3934_v57 }
 0x352   : > { %v3039_v41 = vpop.f32.mrf.mxu1 }
 0x353   : > { %v5566_v31 = vadd.f32 %v3039_v41, %v2991_v54  ;;  %v2895_v40 = vpop.f32.mrf.mxu2 }
 0x354   : > { %v2993_v4 = vpop.f32.mrf.mxu0  ;;  %v2896_v24 = vadd.f32 %v2895_v40, %v5492_v20  ;;  %v3933_v40 = vld [vmem:[%s4459_s27] sm:$0xff] }
 0x355   : > { %v3077_v10 = vpack.c.bf16 %v5566_v31, %v5564_v58  ;;  %3249 = vmatpush.bf16.msra.mxu3 %v3933_v40  ;;  %v5744_v58 = vld [vmem:[#allocation17_spill] sm:$0xff] }
 0x35a   : > { %v3042_v7 = vpop.f32.mrf.mxu1 }
 0x35b   : > { %v2897_v37 = vpop.f32.mrf.mxu2 }
 0x35c   : > { %v2944_v14 = vpop.f32.mrf.mxu3  ;;  %v2898_v44 = vadd.f32 %v2897_v37, %v5502_v38  ;;  %v2995_v27 = vpop.f32.mrf.mxu0 }
 0x35d   : > { %v2945_v53 = vadd.f32 %v2944_v14, %v2896_v24  ;;  %v5741_v24 = vld [vmem:[#allocation20_spill] sm:$0xff] }
 0x35e   : > { %3250 = vmatmul.bf16.vlgmr.msra.gmra.mxu3 %v5741_v24 }
 0x35f   : > { %v2994_v15 = vadd.f32 %v2993_v4, %v2945_v53 }
 0x361   : > { %v3043_v32 = vadd.f32 %v3042_v7, %v2994_v15 }
 0x362   : > { %v3044_v8 = vpop.f32.mrf.mxu1 }
 0x364   : > { %v2946_v28 = vpop.f32.mrf.mxu3 }
 0x365   : > { %v2947_v52 = vadd.f32 %v2946_v28, %v2898_v44  ;;  %v2900_v43 = vpop.f32.mrf.mxu2 }
 0x366   : > { %v2901_v34 = vadd.f32 %v2900_v43, %v5510_v55  ;;  %v3925_v43 = vld [vmem:[#allocation4 + $0x30] sm:$0xff] }
 0x367   : > { %v2996_v61 = vadd.f32 %v2995_v27, %v2947_v52 }
 0x369   : > { %v3045_v51 = vadd.f32 %v3044_v8, %v2996_v61  ;;  %v5612_v61 = vld [vmem:[%s401_s13] ss:$0 sm:$0xff] }
 0x36a   : > { %v3047_v11 = vpop.f32.mrf.mxu1 }
 0x36b   : > { %v3078_v56 = vpack.c.bf16 %v3045_v51, %v3043_v32 }
 0x36d   : > { %v2902_v38 = vpop.f32.mrf.mxu2 }
 0x36e   : > { %v2949_v20 = vpop.f32.mrf.mxu3  ;;  %v2903_v26 = vadd.f32 %v2902_v38, %v5516_v35 }
 0x36f   : > { %v2950_v18 = vadd.f32 %v2949_v20, %v2901_v34 }
 0x371   : > { %v2998_v50 = vpop.f32.mrf.mxu0 }
 0x372   : > { %v2999_v30 = vadd.f32 %v2998_v50, %v2950_v18  ;;  %v3049_v62 = vpop.f32.mrf.mxu1 }
 0x374   : > { %v3048_v2 = vadd.f32 %v3047_v11, %v2999_v30 }
 0x375   : > { %v2905_v22 = vpop.f32.mrf.mxu2 }
 0x376   : > { %v2951_v39 = vpop.f32.mrf.mxu3  ;;  %v2906_v54 = vadd.f32 %v2905_v22, %v5526_v16  ;;  %v5742_v16 = vld [vmem:[#allocation19_spill] sm:$0xff] }
 0x377   : > { %v2952_v42 = vadd.f32 %v2951_v39, %v2903_v26  ;;  %3255 = vmatmul.bf16.gmra.mxu3 %v5742_v16 }
 0x379   : > { %v3000_v33 = vpop.f32.mrf.mxu0 }
 0x37a   : > { %v3001_v48 = vadd.f32 %v3000_v33, %v2952_v42  ;;  %v3052_v35 = vpop.f32.mrf.mxu1 }
 0x37c   : > { %v3050_v55 = vadd.f32 %v3049_v62, %v3001_v48 }
 0x37d   : > { %v2907_v41 = vpop.f32.mrf.mxu2 }
 0x37e   : > { %v3079_v9 = vpack.c.bf16 %v3050_v55, %v3048_v2  ;;  %v2908_v4 = vadd.f32 %v2907_v41, %v5530_v0  ;;  %v5743_v0 = vld [vmem:[#allocation18_spill] sm:$0xff] }
 0x380   : > { %v2954_v60 = vpop.f32.mrf.mxu3 }
 0x381   : > { %v2955_v7 = vadd.f32 %v2954_v60, %v2906_v54 }
 0x382   : > { %v3054_v15 = vpop.f32.mrf.mxu1 }
 0x383   : > { %v3003_v29 = vpop.f32.mrf.mxu0 }
 0x384   : > { %v3004_v53 = vadd.f32 %v3003_v29, %v2955_v7 }
 0x386   : > { %v3053_v8 = vadd.f32 %v3052_v35, %v3004_v53 }
 0x387   : > { %3260 = vmatmul.bf16.gmra.mxu3 %v5743_v0 }
 0x388   : > { %v2956_v14 = vpop.f32.mrf.mxu3 }
 0x389   : > { %v2957_v37 = vadd.f32 %v2956_v14, %v2908_v4 }
 0x38b   : > { %v3005_v44 = vpop.f32.mrf.mxu0 }
 0x38c   : > { %v3006_v28 = vadd.f32 %v3005_v44, %v2957_v37 }
 0x38e   : > { %v3055_v52 = vadd.f32 %v3054_v15, %v3006_v28 }
 0x390   : > { %v3080_v27 = vpack.c.bf16 %v3055_v52, %v3053_v8 }
 0x392   : > { %3129 = vmatpush.bf16.msra.mxu2 %v3080_v27 }
 0x396   : > { %3130 = vmatpush.bf16.msra.mxu2 %v3079_v9 }
 0x397   : > { %3265 = vmatmul.bf16.gmra.mxu3 %v5744_v58 }
 0x39a   : > { %3131 = vmatpush.bf16.msra.mxu2 %v3078_v56 }
 0x39e   : > { %3132 = vmatpush.bf16.msra.mxu2 %v3077_v10 }
 0x3a2   : > { %3133 = vmatpush.bf16.msra.mxu2 %v3076_v12  ;;  %v3932_v12 = vld [vmem:[#allocation4 + $0x20] sm:$0xff] }
 0x3a6   : > { %3134 = vmatpush.bf16.msra.mxu2 %v3075_v1  ;;  %v3928_v1 = vld [vmem:[#allocation4 + $0x28] sm:$0xff] }
 0x3a7   : > { %3270 = vmatmul.bf16.gmra.mxu3 %v5745_v47 }
 0x3aa   : > { %3135 = vmatpush.bf16.msra.mxu2 %v3074_v23 }
 0x3ae   : > { %3136 = vmatpush.bf16.msra.mxu2 %v3073_v45  ;;  %v3931_v45 = vld [vmem:[#allocation4 + $0x8] sm:$0xff] }
 0x3b1   : > { %3137 = vmatmul.bf16.vlgmr.msra.gmra.mxu2 %v3925_v43 }
 0x3b7   : > { %3275 = vmatmul.bf16.gmra.mxu3 %v5746_v21 }
 0x3c1   : > { %3142 = vmatmul.bf16.gmra.mxu2 %v3926_v5 }
 0x3c7   : > { %3280 = vmatmul.bf16.gmra.mxu3 %v5747_v49 }
 0x3d1   : > { %3147 = vmatmul.bf16.gmra.mxu2 %v3927_v13 }
 0x3d7   : > { %3285 = vmatmul.bf16.gmra.mxu3 %v5748_v6 }
 0x3e1   : > { %3152 = vmatmul.bf16.gmra.mxu2 %v3928_v1  ;;  %v3251_v23 = vpop.f32.mrf.mxu3 }
 0x3e9   : > { %v3253_v31 = vpop.f32.mrf.mxu3 }
 0x3f1   : > { %3157 = vmatmul.bf16.gmra.mxu2 %v3929_v46 }
 0x3fa   : > { %v3256_v10 = vpop.f32.mrf.mxu3 }
 0x401   : > { %3162 = vmatmul.bf16.gmra.mxu2 %v3930_v3 }
 0x402   : > { %v3258_v32 = vpop.f32.mrf.mxu3 }
 0x40a   : > { %v3261_v11 = vpop.f32.mrf.mxu3 }
 0x411   : > { %3167 = vmatmul.bf16.gmra.mxu2 %v3931_v45 }
 0x412   : > { %v3263_v18 = vpop.f32.mrf.mxu3 }
 0x41a   : > { %v3266_v42 = vpop.f32.mrf.mxu3 }
 0x421   : > { %3172 = vmatmul.bf16.gmra.mxu2 %v3932_v12 }
 0x422   : > { %v3268_v22 = vpop.f32.mrf.mxu3 }
 0x42a   : > { %v3271_v9 = vpop.f32.mrf.mxu3 }
 0x432   : > { %v3273_v54 = vpop.f32.mrf.mxu3 }
 0x434   : > { %v3138_v63 = vpop.f32.mrf.mxu2 }
 0x435   : > { %v3252_v51 = vadd.f32 %v3251_v23, %v3138_v63 }
 0x437   : > { %v5615_v56 = vadd.f32 %v5612_v61, %v3252_v51 }
 0x439   : > { %3311 = vst [vmem:[#allocation2 + $0x30] sm:$0xff] %v5615_v56 }
 0x43a   : > { %v3276_v4 = vpop.f32.mrf.mxu3 }
 0x43c   : > { %v3140_v36 = vpop.f32.mrf.mxu2 }
 0x43d   : > { %v3254_v20 = vadd.f32 %v3253_v31, %v3140_v36 }
 0x43f   : > { %v5619_v38 = vadd.f32 %v5612_v61, %v3254_v20 }
 0x441   : > { %3312 = vst [vmem:[#allocation2] sm:$0xff] %v5619_v38 }
 0x442   : > { %v3278_v44 = vpop.f32.mrf.mxu3 }
 0x444   : > { %v3143_v19 = vpop.f32.mrf.mxu2 }
 0x445   : > { %v3257_v50 = vadd.f32 %v3256_v10, %v3143_v19 }
 0x447   : > { %v5623_v34 = vadd.f32 %v5612_v61, %v3257_v50 }
 0x449   : > { %3313 = vst [vmem:[#allocation2 + $0x58] sm:$0xff] %v5623_v34 }
 0x44a   : > { %v3281_v27 = vpop.f32.mrf.mxu3 }
 0x44c   : > { %v3145_v17 = vpop.f32.mrf.mxu2 }
 0x44d   : > { %v3259_v26 = vadd.f32 %v3258_v32, %v3145_v17 }
 0x44f   : > { %v5627_v39 = vadd.f32 %v5612_v61, %v3259_v26 }
 0x451   : > { %3314 = vst [vmem:[#allocation2 + $0x18] sm:$0xff] %v5627_v39 }
 0x452   : > { %v3283_v5 = vpop.f32.mrf.mxu3 }
 0x454   : > { %v3148_v30 = vpop.f32.mrf.mxu2 }
 0x455   : > { %v3262_v59 = vadd.f32 %v3261_v11, %v3148_v30 }
 0x457   : > { %v5631_v62 = vadd.f32 %v5612_v61, %v3262_v59 }
 0x459   : > { %3315 = vst [vmem:[#allocation2 + $0x50] sm:$0xff] %v5631_v62 }
 0x45a   : > { %v3286_v1 = vpop.f32.mrf.mxu3 }
 0x45c   : > { %v3150_v33 = vpop.f32.mrf.mxu2 }
 0x45d   : > { %v3264_v48 = vadd.f32 %v3263_v18, %v3150_v33 }
 0x45f   : > { %v5635_v2 = vadd.f32 %v5612_v61, %v3264_v48 }
 0x461   : > { %3316 = vst [vmem:[#allocation2 + $0x68] sm:$0xff] %v5635_v2 }
 0x462   : > { %v3288_v45 = vpop.f32.mrf.mxu3 }
 0x464   : > { %v3153_v55 = vpop.f32.mrf.mxu2 }
 0x465   : > { %v3267_v25 = vadd.f32 %v3266_v42, %v3153_v55 }
 0x467   : > { %v3301_v60 = vadd.f32 %v5612_v61, %v3267_v25 }
 0x469   : > { %3317 = vst [vmem:[#allocation2 + $0x8] sm:$0xff] %v3301_v60 }
 0x46c   : > { %v3155_v57 = vpop.f32.mrf.mxu2 }
 0x46d   : > { %v3269_v35 = vadd.f32 %v3268_v22, %v3155_v57 }
 0x46f   : > { %v3302_v29 = vadd.f32 %v5612_v61, %v3269_v35 }
 0x471   : > { %3318 = vst [vmem:[#allocation2 + $0x48] sm:$0xff] %v3302_v29 }
 0x474   : > { %v3158_v41 = vpop.f32.mrf.mxu2 }
 0x475   : > { %v3272_v40 = vadd.f32 %v3271_v9, %v3158_v41 }
 0x477   : > { %v3303_v7 = vadd.f32 %v5612_v61, %v3272_v40 }
 0x479   : > { %3319 = vst [vmem:[#allocation2 + $0x40] sm:$0xff] %v3303_v7 }
 0x47c   : > { %v3160_v14 = vpop.f32.mrf.mxu2 }
 0x47d   : > { %v3274_v37 = vadd.f32 %v3273_v54, %v3160_v14 }
 0x47f   : > { %v3304_v24 = vadd.f32 %v5612_v61, %v3274_v37 }
 0x481   : > { %3320 = vst [vmem:[#allocation2 + $0x20] sm:$0xff] %v3304_v24 }
 0x484   : > { %v3163_v53 = vpop.f32.mrf.mxu2 }
 0x485   : > { %v3277_v28 = vadd.f32 %v3276_v4, %v3163_v53 }
 0x487   : > { %v3305_v15 = vadd.f32 %v5612_v61, %v3277_v28 }
 0x489   : > { %3321 = vst [vmem:[#allocation2 + $0x10] sm:$0xff] %v3305_v15 }
 0x48c   : > { %v3165_v8 = vpop.f32.mrf.mxu2 }
 0x48d   : > { %v3279_v52 = vadd.f32 %v3278_v44, %v3165_v8 }
 0x48f   : > { %v3306_v16 = vadd.f32 %v5612_v61, %v3279_v52 }
 0x491   : > { %3322 = vst [vmem:[#allocation2 + $0x38] sm:$0xff] %v3306_v16 }
 0x494   : > { %v3168_v0 = vpop.f32.mrf.mxu2 }
 0x495   : > { %v3282_v43 = vadd.f32 %v3281_v27, %v3168_v0 }
 0x497   : > { %v3307_v58 = vadd.f32 %v5612_v61, %v3282_v43 }
 0x499   : > { %3323 = vst [vmem:[#allocation2 + $0x60] sm:$0xff] %v3307_v58 }
 0x49c   : > { %v3170_v47 = vpop.f32.mrf.mxu2 }
 0x49d   : > { %v3284_v13 = vadd.f32 %v3283_v5, %v3170_v47 }
 0x49f   : > { %v3308_v21 = vadd.f32 %v5612_v61, %v3284_v13 }
 0x4a1   : > { %3324 = vst [vmem:[#allocation2 + $0x70] sm:$0xff] %v3308_v21 }
 0x4a4   : > { %v3173_v49 = vpop.f32.mrf.mxu2 }
 0x4a5   : > { %v3287_v46 = vadd.f32 %v3286_v1, %v3173_v49 }
 0x4a7   : > { %v3309_v6 = vadd.f32 %v5612_v61, %v3287_v46 }
 0x4a9   : > { %3325 = vst [vmem:[#allocation2 + $0x78] sm:$0xff] %v3309_v6 }
 0x4ac   : > { %v3175_v3 = vpop.f32.mrf.mxu2 }
 0x4ad   : > { %v3289_v23 = vadd.f32 %v3288_v45, %v3175_v3  ;;  %3330 = sbr.rel (%p3836_p7) target bundleno = 1369 (0x559), region = 72 }
 0x4af   : > { %v3310_v12 = vadd.f32 %v5612_v61, %v3289_v23 }
 0x4b1   : > { %3326 = vst [vmem:[#allocation2 + $0x28] sm:$0xff] %v3310_v12 }
 0x4b2   : > { %v3349_v31 = vpack.c.bf16 %v3310_v12, %v3309_v6  ;;  %v3348_v10 = vpack.c.bf16 %v3308_v21, %v3307_v58  ;;  %v3347_v63 = vpack.c.bf16 %v3306_v16, %v3305_v15  ;;  %v3346_v32 = vpack.c.bf16 %v3304_v24, %v3303_v7  ;;  %v4209_v19 = vld [vmem:[%s5683_s5] ss:$0 sm:$0xff] }
 0x4b3   : > { %v3345_v51 = vpack.c.bf16 %v3302_v29, %v3301_v60  ;;  %v3344_v36 = vpack.c.bf16 %v5635_v2, %v5631_v62  ;;  %v3331_v20 = vlaneseq  ;;  %v3343_v61 = vpack.c.bf16 %v5627_v39, %v5623_v34  ;;  %v4210_v50 = vld [vmem:[%s5684_s6] ss:$0 sm:$0xff] }
 0x4b4   : > { %3350 = vmatpush.bf16.msra.mxu0 %v3349_v31  ;;  %v3342_v18 = vpack.c.bf16 %v5619_v38, %v5615_v56  ;;  %v3838_v17 = vpack.c.bf16 %v4210_v50, %v4210_v50 }
 0x4b5   : > { %v3332_v11 = vshrl.u32 %v3331_v20, 7 }
 0x4b7   : > { %vm3335_vm0 = vcmp.eq.s32.totalorder %v3332_v11, %v4209_v19 }
 0x4b8   : > { %3351 = vmatpush.bf16.msra.mxu0 %v3348_v10  ;;  %vm3837_vm1 = vmpackc.low %vm3335_vm0, %vm3335_vm0 }
 0x4bc   : > { %3352 = vmatpush.bf16.msra.mxu0 %v3347_v63 }
 0x4c0   : > { %3353 = vmatpush.bf16.msra.mxu0 %v3346_v32 }
 0x4c4   : > { %3354 = vmatpush.bf16.msra.mxu0 %v3345_v51 }
 0x4c8   : > { %3355 = vmatpush.bf16.msra.mxu0 %v3344_v36 }
 0x4cc   : > { %3356 = vmatpush.bf16.msra.mxu0 %v3343_v61 }
 0x4d0   : > { %3357 = vmatpush.bf16.msra.mxu0 %v3342_v18 }
 0x4d3   : > { %3839 = vmatmul.msk.bf16.vlgmr.msra.gmra.mxu0 %vm3837_vm1, %v3838_v17 }
 0x550   : > { %v3359_v26 = vpop.f32.mrf.mxu0 }
 0x551   : > { %3363 = vst [vmem:[#allocation8] sm:$0xff] %v3359_v26 }
 0x558   : > { %v3361_v34 = vpop.f32.mrf.mxu0 }
 0x559 PF: > { %p4033_p9 = scmp.eq.s32.totalorder %s4396_s17, 1  ;;  %s4321_s28 = smov [#allocation8]  }
 0x55a   : > { %s3370_s15 = sshll.u32 %s4321_s28, 4  ;;  %s3372_s16 = sshll.u32 %s5688_s10, 4  ;;  %s3371_s15 = int_to_ptr.vmem [resolvable:$true] %s3370_s15  ;;  %s3373_s16 = int_to_ptr.hbm [resolvable:$true] %s3372_s16 }
 0x55b   : > { %4025 = dma.vmem_to_hbm [thread:$0]  (%p4033_p9), %s3371_s15, 128, %s3373_s16, [#allocation7]  }
 0x55c   : > { %4290 = dma.done.wait (%p4033_p9), [#allocation7], 128  }
 0x55d   : > { %4292 = vsyncadd (%p4033_p9), [#allocation7], 4294967168 }
 0x55e PF: > { %s5749_s11 = sld [smem:[#allocation11_spill]]  ;;  %p21_p10 = scmp.ge.s32.totalorder %s4399_s18, 4  }
 0x55f   : > { %s5750_s15 = sld [smem:[#allocation12_spill]]  ;;  %s5751_s13 = smov %s4299_s14 }
 0x560   : > { %s5753_s16 = smov %s4399_s18  ;;  %23 = sbr.rel (!%p21_p10) target bundleno = 4 (0x4), region = 111 }
 0x564   : > { %s5752_s14 = smov %s5749_s11 }
 0x565   :  { %3386 = vsyncpa [#allocation6], 1 }
 0x566   :  { %3388 = vsyncpa [#allocation6 + $0x1], 1 }
 0x567   :  { %3389 = vsyncpa [#allocation7], 1 }
 0x568   :  { %3391 = vsyncpa [#allocation7 + $0x1], 1 }

</bundles_post_ra>
